<compile_context>
chip_gen: v5e
topology: v5e:2x2
jax: 0.10.0
libtpu: 0.0.40
codegen_flags: <defaults>
</compile_context>

<pallas_src>
import functools

import jax
import jax.numpy as jnp
from jax import lax
from jax.experimental import pallas as pl
from jax.experimental.pallas import tpu as pltpu


def cca_kernel(gamma_ref, x_ref, w_ref, b_ref, o_ref, *, H, W, C, Cp,
               compute_dtype):
    # x_ref block: (Bt, H*W, C); weights: (C, 2*Cp+C); bias (1, 2*Cp+C)
    Bt = x_ref.shape[0]
    gamma = gamma_ref[0, 0]
    w_fused = w_ref[...].astype(compute_dtype)
    bias = b_ref[...]                                   # f32

    # Column-branch self mask (h' == h) — hoisted out of the per-image loop.
    hi = lax.broadcasted_iota(jnp.int32, (W, H, H), 1)
    gi = lax.broadcasted_iota(jnp.int32, (W, H, H), 2)
    col_self = hi == gi

    for i in range(Bt):                                 # small static unroll
        xr = x_ref[i]                                   # (H*W, C)

        # Fused 1x1-conv projections: one MXU matmul, f32 accumulation.
        qkv = jnp.dot(xr.astype(compute_dtype), w_fused,
                      preferred_element_type=jnp.float32) + bias  # (H*W, 2Cp+C)

        q = qkv[:, :Cp].reshape(H, W, Cp).astype(compute_dtype)
        k = qkv[:, Cp:2 * Cp].reshape(H, W, Cp).astype(compute_dtype)
        v = qkv[:, 2 * Cp:].reshape(H, W, C).astype(compute_dtype)

        # ---- row branch (batch over h, batch dim leading) ----
        # e_w[h, w, w'] = <Q[h,w,:], K[h,w',:]>
        e_w = jnp.einsum('hwc,hvc->hwv', q, k,
                         preferred_element_type=jnp.float32)      # (H, W, W)

        # ---- column branch (transpose ONCE so batch dim w is leading) ----
        q_t = jnp.transpose(q, (1, 0, 2))                         # (W, H, Cp)
        k_t = jnp.transpose(k, (1, 0, 2))                         # (W, H, Cp)
        # e_h_t[w, h, h'] = <Q[h,w,:], K[h',w,:]>
        e_h_t = jnp.einsum('whc,wgc->whg', q_t, k_t,
                           preferred_element_type=jnp.float32)    # (W, H, H)
        # mask the self term h' == h (counted once, in the row branch)
        e_h_t = jnp.where(col_self, -jnp.inf, e_h_t)

        # ---- joint softmax over the (H + W) criss-cross neighborhood ----
        # (no concatenate / slice: shared max + shared denominator)
        m_w = jnp.max(e_w, axis=-1)                               # (H, W)
        m_h = jnp.transpose(jnp.max(e_h_t, axis=-1))              # (W,H)->(H,W)
        m = jnp.maximum(m_w, m_h)                                 # finite

        p_w = jnp.exp(e_w - m[:, :, None])                        # (H, W, W)
        p_h_t = jnp.exp(e_h_t - jnp.transpose(m)[:, :, None])     # (W, H, H)

        denom = jnp.sum(p_w, axis=-1) + jnp.transpose(jnp.sum(p_h_t, axis=-1))
        inv = 1.0 / denom                                         # exact (no approx recip)

        # ---- apply V (normalization deferred: inv depends only on (h, w)) ----
        out_w = jnp.einsum('hwv,hvc->hwc', p_w.astype(compute_dtype), v,
                           preferred_element_type=jnp.float32)    # (H, W, C)
        v_t = jnp.transpose(v, (1, 0, 2))                         # (W, H, C)
        out_h_t = jnp.einsum('whg,wgc->whc', p_h_t.astype(compute_dtype), v_t,
                             preferred_element_type=jnp.float32)  # (W, H, C)
        out_h = jnp.transpose(out_h_t, (1, 0, 2))                 # (H, W, C)

        x3 = xr.reshape(H, W, C)                                  # f32 residual
        res = gamma * ((out_h + out_w) * inv[:, :, None]) + x3    # f32
        o_ref[i] = res.reshape(H * W, C).astype(o_ref.dtype)


def criss_cross_attention(x_nchw, params, *, block_batch=1,
                          compute_dtype=jnp.float32):
    """x_nchw: (B, C, H, W) float32, matches the PyTorch module's input."""
    B, C, H, W = x_nchw.shape
    Cp = params['wq'].shape[1]
    assert B % block_batch == 0
    F = 2 * Cp + C

    # Fuse projection weights/biases: [Wq | Wk | Wv] -> one MXU matmul in-kernel.
    w_fused = jnp.concatenate([params['wq'], params['wk'], params['wv']], axis=1)
    b_fused = jnp.concatenate([params['bq'], params['bk'], params['bv']], axis=1)

    # NHWC, pixel-major (B, H*W, C) — a metadata-only reshape of the NHWC buffer.
    x = jnp.transpose(x_nchw, (0, 2, 3, 1)).reshape(B, H * W, C)

    block_bytes = block_batch * H * W * C * 4
    vmem_limit = min(48 * 1024 * 1024,
                     max(16 * 1024 * 1024, 32 * block_bytes))

    kernel = functools.partial(cca_kernel, H=H, W=W, C=C, Cp=Cp,
                               compute_dtype=compute_dtype)

    out = pl.pallas_call(
        kernel,
        out_shape=jax.ShapeDtypeStruct((B, H * W, C), x.dtype),
        grid=(B // block_batch,),
        in_specs=[
            pl.BlockSpec(memory_space=pltpu.MemorySpace.SMEM),            # gamma (1,1)
            pl.BlockSpec((block_batch, H * W, C), lambda b: (b, 0, 0)),   # x
            pl.BlockSpec((C, F), lambda b: (0, 0)),                       # fused W
            pl.BlockSpec((1, F), lambda b: (0, 0)),                       # fused b
        ],
        out_specs=pl.BlockSpec((block_batch, H * W, C), lambda b: (b, 0, 0)),
        compiler_params=pltpu.CompilerParams(
            dimension_semantics=("parallel",),       # batch steps independent
            vmem_limit_bytes=vmem_limit),
    )(params['gamma'], x, w_fused, b_fused)

    out = out.reshape(B, H, W, C)
    return jnp.transpose(out, (0, 3, 1, 2))          # -> NCHW


def reference(x_nchw, p):
    """Pure-JAX reference mirroring the PyTorch forward exactly."""
    B, C, H, W = x_nchw.shape
    x = jnp.transpose(x_nchw, (0, 2, 3, 1))
    q = x @ p['wq'] + p['bq'][0]
    k = x @ p['wk'] + p['bk'][0]
    v = x @ p['wv'] + p['bv'][0]
    e_h = jnp.einsum('bhwc,bgwc->bhwg', q, k)
    diag = jnp.eye(H, dtype=bool)[:, None, :]        # (H, 1, H) broadcast over w
    e_h = jnp.where(diag, -jnp.inf, e_h)
    e_w = jnp.einsum('bhwc,bhvc->bhwv', q, k)
    att = jax.nn.softmax(jnp.concatenate([e_h, e_w], -1), axis=-1)
    att_h, att_w = att[..., :H], att[..., H:]
    out_h = jnp.einsum('bhwg,bgwc->bhwc', att_h, v)
    out_w = jnp.einsum('bhwv,bhvc->bhwc', att_w, v)
    out = p['gamma'][0, 0] * (out_h + out_w) + x
    return jnp.transpose(out, (0, 3, 1, 2))


if __name__ == "__main__":
    key = jax.random.PRNGKey(0)
    B, C, H, W = 2, 32, 16, 16          # in_dim=32 -> q/k channels = 32 // 8 = 4
    Cp = C // 8

    ks = jax.random.split(key, 8)
    x = jax.random.normal(ks[0], (B, C, H, W), jnp.float32)
    params = {
        'wq': 0.1 * jax.random.normal(ks[1], (C, Cp), jnp.float32),
        'bq': 0.1 * jax.random.normal(ks[2], (1, Cp), jnp.float32),
        'wk': 0.1 * jax.random.normal(ks[3], (C, Cp), jnp.float32),
        'bk': 0.1 * jax.random.normal(ks[4], (1, Cp), jnp.float32),
        'wv': 0.1 * jax.random.normal(ks[5], (C, C), jnp.float32),
        'bv': 0.1 * jax.random.normal(ks[6], (1, C), jnp.float32),
        # nn.Parameter(torch.zeros(1)) in __init__; nonzero here so the
        # attention path is exercised numerically.
        'gamma': jnp.full((1, 1), 0.5, jnp.float32),
    }

    ref = reference(x, params)

    # Tolerance note: kernel and reference group the MXU matmuls differently;
    # at TPU default matmul precision (bf16 operand passes for f32 inputs)
    # that legitimately yields ~1e-3 absolute differences, so 1e-2 is the
    # appropriate f32 check here (observed max |err| ~9e-4).
    TOL = 1e-2

    # f32, one image per grid step (grid=(2,), "parallel")
    out = jax.block_until_ready(criss_cross_attention(x, params))
    assert out.shape == (B, C, H, W)
    assert jnp.allclose(out, ref, rtol=TOL, atol=TOL), \
        float(jnp.max(jnp.abs(out - ref)))

    # f32, both images in a single grid step (amortized per-step overhead)
    out2 = jax.block_until_ready(
        criss_cross_attention(x, params, block_batch=2))
    assert jnp.allclose(out2, ref, rtol=TOL, atol=TOL), \
        float(jnp.max(jnp.abs(out2 - ref)))

    # bf16 MXU operands (f32 accumulation + f32 softmax)
    out3 = jax.block_until_ready(
        criss_cross_attention(x, params, compute_dtype=jnp.bfloat16))
    assert jnp.allclose(out3, ref, rtol=5e-2, atol=5e-2), \
        float(jnp.max(jnp.abs(out3 - ref)))

    print("KERNEL_OK")
</pallas_src>

<mosaic_0001>
module attributes {stable_mosaic.version = 11 : i64} {
  func.func @cca_kernel(%arg0: i32, %arg1: memref<1x1xf32, #tpu.memory_space<smem>>, %arg2: memref<1x256x32xf32, #tpu.memory_space<vmem>>, %arg3: memref<32x40xf32, #tpu.memory_space<vmem>>, %arg4: memref<1x40xf32, #tpu.memory_space<vmem>>, %arg5: memref<1x256x32xf32, #tpu.memory_space<vmem>>) attributes {dimension_semantics = [#tpu.dimension_semantics<parallel>], iteration_bounds = array<i64: 2>, scalar_prefetch = 0 : i64, scratch_operands = 0 : i64, tpu.core_type = #tpu.core_type<tc>, window_params = [{transform_indices = @transform_0, window_bounds = array<i64: 1, 1>}, {transform_indices = @transform_1, window_bounds = array<i64: 1, 256, 32>}, {pipeline_mode = #tpu.pipeline_mode<synchronous>, transform_indices = @transform_2, window_bounds = array<i64: 32, 40>}, {pipeline_mode = #tpu.pipeline_mode<synchronous>, transform_indices = @transform_3, window_bounds = array<i64: 1, 40>}, {transform_indices = @transform_4, window_bounds = array<i64: 1, 256, 32>}]} {
    %c0 = arith.constant 0 : index
    %c0_0 = arith.constant 0 : index
    %0 = memref.load %arg1[%c0, %c0_0] : memref<1x1xf32, #tpu.memory_space<smem>>
    %c0_1 = arith.constant 0 : index
    %c0_2 = arith.constant 0 : index
    %1 = vector.load %arg3[%c0_1, %c0_2] : memref<32x40xf32, #tpu.memory_space<vmem>>, vector<32x40xf32>
    %c0_3 = arith.constant 0 : index
    %c0_4 = arith.constant 0 : index
    %2 = vector.load %arg4[%c0_3, %c0_4] : memref<1x40xf32, #tpu.memory_space<vmem>>, vector<1x40xf32>
    %3 = tpu.iota {dimensions = array<i32: 1>} : vector<16x16x16xi32>
    %4 = tpu.iota {dimensions = array<i32: 2>} : vector<16x16x16xi32>
    %5 = arith.cmpi eq, %3, %4 : vector<16x16x16xi32>
    %c0_5 = arith.constant 0 : index
    %c0_6 = arith.constant 0 : index
    %c0_7 = arith.constant 0 : index
    %6 = vector.load %arg2[%c0_5, %c0_6, %c0_7] : memref<1x256x32xf32, #tpu.memory_space<vmem>>, vector<1x256x32xf32>
    %7 = vector.shape_cast %6 : vector<1x256x32xf32> to vector<256x32xf32>
    %cst = arith.constant dense<0.000000e+00> : vector<256x40xf32>
    %8 = tpu.matmul %7, %1, %cst {dimension_numbers = #tpu.dot_dimension_numbers<[1], [0], [0], [1], [0, 0, 1, 1], [], []>} : vector<256x32xf32>, vector<32x40xf32>, vector<256x40xf32> -> vector<256x40xf32>
    %9 = vector.broadcast %2 : vector<1x40xf32> to vector<256x40xf32>
    %10 = arith.addf %8, %9 : vector<256x40xf32>
    %11 = vector.extract_strided_slice %10 {offsets = [0, 0], sizes = [256, 4], strides = [1, 1]} : vector<256x40xf32> to vector<256x4xf32>
    %12 = vector.shape_cast %11 : vector<256x4xf32> to vector<16x16x4xf32>
    %13 = vector.extract_strided_slice %10 {offsets = [0, 4], sizes = [256, 4], strides = [1, 1]} : vector<256x40xf32> to vector<256x4xf32>
    %14 = vector.shape_cast %13 : vector<256x4xf32> to vector<16x16x4xf32>
    %15 = vector.extract_strided_slice %10 {offsets = [0, 8], sizes = [256, 32], strides = [1, 1]} : vector<256x40xf32> to vector<256x32xf32>
    %16 = vector.shape_cast %15 : vector<256x32xf32> to vector<16x16x32xf32>
    "tpu.trace_start"() <{level = 10 : i32, message = "hwc,hvc->hwv"}> : () -> ()
    %cst_8 = arith.constant dense<0.000000e+00> : vector<16x16x16xf32>
    %17 = tpu.matmul %12, %14, %cst_8 {dimension_numbers = #tpu.dot_dimension_numbers<[2], [2], [1], [1], [0, 0, 0, 1, 1, 1], [0], [0]>} : vector<16x16x4xf32>, vector<16x16x4xf32>, vector<16x16x16xf32> -> vector<16x16x16xf32>
    "tpu.trace_stop"() : () -> ()
    %18 = tpu.transpose %12, [1, 0, 2] : vector<16x16x4xf32> -> vector<16x16x4xf32>
    %19 = tpu.transpose %14, [1, 0, 2] : vector<16x16x4xf32> -> vector<16x16x4xf32>
    "tpu.trace_start"() <{level = 10 : i32, message = "whc,wgc->whg"}> : () -> ()
    %cst_9 = arith.constant dense<0.000000e+00> : vector<16x16x16xf32>
    %20 = tpu.matmul %18, %19, %cst_9 {dimension_numbers = #tpu.dot_dimension_numbers<[2], [2], [1], [1], [0, 0, 0, 1, 1, 1], [0], [0]>} : vector<16x16x4xf32>, vector<16x16x4xf32>, vector<16x16x16xf32> -> vector<16x16x16xf32>
    %cst_10 = arith.constant 0xFF800000 : f32
    "tpu.trace_stop"() : () -> ()
    %21 = vector.broadcast %cst_10 : f32 to vector<16x16x16xf32>
    %22 = arith.select %5, %21, %20 : vector<16x16x16xi1>, vector<16x16x16xf32>
    %cst_11 = arith.constant dense<0xFF800000> : vector<16x16xf32>
    %23 = vector.multi_reduction <maximumf>, %17, %cst_11 [2] : vector<16x16x16xf32> to vector<16x16xf32>
    %cst_12 = arith.constant dense<0xFF800000> : vector<16x16xf32>
    %24 = vector.multi_reduction <maximumf>, %22, %cst_12 [2] : vector<16x16x16xf32> to vector<16x16xf32>
    %25 = tpu.transpose %24, [1, 0] : vector<16x16xf32> -> vector<16x16xf32>
    %26 = arith.maximumf %23, %25 : vector<16x16xf32>
    %27 = vector.shape_cast %26 : vector<16x16xf32> to vector<16x16x1xf32>
    %28 = vector.broadcast %27 : vector<16x16x1xf32> to vector<16x16x16xf32>
    %29 = arith.subf %17, %28 : vector<16x16x16xf32>
    %30 = math.exp %29 : vector<16x16x16xf32>
    %31 = tpu.transpose %26, [1, 0] : vector<16x16xf32> -> vector<16x16xf32>
    %32 = vector.shape_cast %31 : vector<16x16xf32> to vector<16x16x1xf32>
    %33 = vector.broadcast %32 : vector<16x16x1xf32> to vector<16x16x16xf32>
    %34 = arith.subf %22, %33 : vector<16x16x16xf32>
    %35 = math.exp %34 : vector<16x16x16xf32>
    %cst_13 = arith.constant dense<0.000000e+00> : vector<16x16xf32>
    %36 = vector.multi_reduction <add>, %30, %cst_13 [2] : vector<16x16x16xf32> to vector<16x16xf32>
    %cst_14 = arith.constant dense<0.000000e+00> : vector<16x16xf32>
    %37 = vector.multi_reduction <add>, %35, %cst_14 [2] : vector<16x16x16xf32> to vector<16x16xf32>
    %38 = tpu.transpose %37, [1, 0] : vector<16x16xf32> -> vector<16x16xf32>
    %39 = arith.addf %36, %38 : vector<16x16xf32>
    %cst_15 = arith.constant 1.000000e+00 : f32
    %40 = vector.broadcast %cst_15 : f32 to vector<16x16xf32>
    %41 = arith.divf %40, %39 : vector<16x16xf32>
    "tpu.trace_start"() <{level = 10 : i32, message = "hwv,hvc->hwc"}> : () -> ()
    %cst_16 = arith.constant dense<0.000000e+00> : vector<16x16x32xf32>
    %42 = tpu.matmul %30, %16, %cst_16 {dimension_numbers = #tpu.dot_dimension_numbers<[2], [1], [1], [2], [0, 0, 0, 1, 1, 2], [0], [0]>} : vector<16x16x16xf32>, vector<16x16x32xf32>, vector<16x16x32xf32> -> vector<16x16x32xf32>
    "tpu.trace_stop"() : () -> ()
    %43 = tpu.transpose %16, [1, 0, 2] : vector<16x16x32xf32> -> vector<16x16x32xf32>
    "tpu.trace_start"() <{level = 10 : i32, message = "whg,wgc->whc"}> : () -> ()
    %cst_17 = arith.constant dense<0.000000e+00> : vector<16x16x32xf32>
    %44 = tpu.matmul %35, %43, %cst_17 {dimension_numbers = #tpu.dot_dimension_numbers<[2], [1], [1], [2], [0, 0, 0, 1, 1, 2], [0], [0]>} : vector<16x16x16xf32>, vector<16x16x32xf32>, vector<16x16x32xf32> -> vector<16x16x32xf32>
    "tpu.trace_stop"() : () -> ()
    %45 = tpu.transpose %44, [1, 0, 2] : vector<16x16x32xf32> -> vector<16x16x32xf32>
    %46 = vector.shape_cast %7 : vector<256x32xf32> to vector<16x16x32xf32>
    %47 = arith.addf %45, %42 : vector<16x16x32xf32>
    %48 = vector.shape_cast %41 : vector<16x16xf32> to vector<16x16x1xf32>
    %49 = vector.broadcast %48 : vector<16x16x1xf32> to vector<16x16x32xf32>
    %50 = arith.mulf %47, %49 : vector<16x16x32xf32>
    %51 = vector.broadcast %0 : f32 to vector<16x16x32xf32>
    %52 = arith.mulf %51, %50 : vector<16x16x32xf32>
    %53 = arith.addf %52, %46 : vector<16x16x32xf32>
    %54 = vector.shape_cast %53 : vector<16x16x32xf32> to vector<256x32xf32>
    %c0_18 = arith.constant 0 : index
    %c0_19 = arith.constant 0 : index
    %c0_20 = arith.constant 0 : index
    %55 = vector.load %arg5[%c0_18, %c0_19, %c0_20] : memref<1x256x32xf32, #tpu.memory_space<vmem>>, vector<1x256x32xf32>
    %56 = vector.shape_cast %55 : vector<1x256x32xf32> to vector<256x32xf32>
    %57 = vector.shape_cast %54 : vector<256x32xf32> to vector<1x256x32xf32>
    tpu.vector_store %arg5[%c0_18, %c0_19, %c0_20], %57 {strides = array<i32>} : memref<1x256x32xf32, #tpu.memory_space<vmem>>, vector<1x256x32xf32>,
    return
  }
  func.func @transform_0(%arg0: i32) -> (i32, i32) {
    %c0_i32 = arith.constant 0 : i32
    %c0_i32_0 = arith.constant 0 : i32
    %c0_i32_1 = arith.constant 0 : i32
    return %c0_i32, %c0_i32_0 : i32, i32
  }
  func.func @transform_1(%arg0: i32) -> (i32, i32, i32) {
    %c0_i32 = arith.constant 0 : i32
    %c0_i32_0 = arith.constant 0 : i32
    %c0_i32_1 = arith.constant 0 : i32
    return %arg0, %c0_i32, %c0_i32_0 : i32, i32, i32
  }
  func.func @transform_2(%arg0: i32) -> (i32, i32) {
    %c0_i32 = arith.constant 0 : i32
    %c0_i32_0 = arith.constant 0 : i32
    %c0_i32_1 = arith.constant 0 : i32
    return %c0_i32, %c0_i32_0 : i32, i32
  }
  func.func @transform_3(%arg0: i32) -> (i32, i32) {
    %c0_i32 = arith.constant 0 : i32
    %c0_i32_0 = arith.constant 0 : i32
    %c0_i32_1 = arith.constant 0 : i32
    return %c0_i32, %c0_i32_0 : i32, i32
  }
  func.func @transform_4(%arg0: i32) -> (i32, i32, i32) {
    %c0_i32 = arith.constant 0 : i32
    %c0_i32_0 = arith.constant 0 : i32
    %c0_i32_1 = arith.constant 0 : i32
    return %arg0, %c0_i32, %c0_i32_0 : i32, i32, i32
  }
}

</mosaic_0001>

<bundles_post_ra>
// kernel: tpu_custom_call.1
= control target key start
LH: loop header
LB: loop body
LE: loop exit
PB: predicated region body
PF: predicated region fallthrough
CT: control target
= control target key end

     0   :  { %s7837_s17 = smov 0   ;;  %s12056_s0 = inlined_call_operand.<no memory space> [shape: f32[1,1], index: 0, kind: input, shape index: {}]   ;;  %s12057_s1 = inlined_call_operand.vmem [shape: f32[2,256,32], index: 1, kind: input, shape index: {}]   ;;  %s12058_s2 = inlined_call_operand.vmem [shape: f32[32,40], index: 2, kind: input, shape index: {}]   ;;  %s12059_s3 = inlined_call_operand.vmem [shape: f32[1,40], index: 3, kind: input, shape index: {}]   ;;  %s12060_s4 = inlined_call_operand.vmem [shape: f32[2,256,32], index: 4, kind: output, shape index: {}]  }
   0x1   :  { %9 = sst [smem:[#allocation2]] %s12056_s0 }
   0x2 LB: > { %s7201_s18 = sadd.s32 4294967295, %s7802_s17   ;;  %p7205_p0 = scmp.ge.s32.totalorder %s7802_s17, 1  ;;  %s7802_s17 = sphi %s7837_s17, %s15_s17  }
   0x3   : > { %p163_p1 = scmp.lt.s32.totalorder %s7802_s17, 3 }
   0x5   : > { %p164_p2 = pnand %p7205_p0, %p163_p1 }
   0x7   : > { %167 = sbr.rel (%p164_p2) target bundleno = 2561 (0xa01), region = 36 }
   0xc   : > { %v203_v0 = vld [vmem:[%s12058_s2 + $0x18] sm:$0xff]  ;;  %v202_v1 = vld [vmem:[%s12058_s2 + $0x10] sm:$0xff]  ;;  %p189_p3 = scmp.lt.s32.totalorder %s7201_s18, 1  ;;  %v201_v2 = vld [vmem:[%s12058_s2 + $0x8] sm:$0xff]  ;;  %vm247_vm0 = vcmask 261120   ;;  %s7804_s6 = smov 124  }
   0xd   : > { %356 = vmatpush.msra.mxu0 %v203_v0  ;;  %v200_v3 = vld [vmem:[%s12058_s2] sm:$0xff]  ;;  %s7805_s7 = smov 120   ;;  %vm463_vm1 = vcmask 31744   ;;  %vm1051_vm2 = vcmask 1047556   ;;  %vm2571_vm3 = vcmask 130048   ;;  %vm2799_vm6 = vcmask 130112  }
   0xe   : > { %s12688_s18 = smov (!%p189_p3, %s7201_s18), 1  ;;  %v7902_v20 = vld [vmem:[%s12059_s3] ss:$0 sm:$0xff]  ;;  %vm2846_vm7 = vcmask 1041409   ;;  %vm2848_vm8 = vcmask 1042434   ;;  %vm2850_vm9 = vcmask 1043459  }
   0xf   : > { %357 = vmatpush.msra.mxu0 %v202_v1  ;;  %s7436_s26 = sshll.u32 %s12688_s18, 8  ;;  %vm2852_vm10 = vcmask 1044484   ;;  %vm2854_vm11 = vcmask 1045509   ;;  %vm2856_vm12 = vcmask 1046534   ;;  %vm2858_vm13 = vcmask 1047559   ;;  %s11570_s8 = sld [smem:[#allocation2]] }
  0x10   : > { %s7865_s29 = scalar_lea.vmem %s12057_s1, %s7436_s26  ;;  %s11628_s11 = scalar_lea.vmem %s12060_s4, %s7436_s26 }
  0x11   : > { %358 = vmatpush.msra.mxu0 %v201_v2  ;;  %v212_v4 = vld [vmem:[%s7865_s29] sm:$0xff]  ;;  %v213_v5 = vld [vmem:[%s7865_s29 + $0x8] sm:$0xff]  ;;  %v214_v6 = vld [vmem:[%s7865_s29 + $0x10] sm:$0xff] }
  0x12   : > { %v215_v7 = vld [vmem:[%s7865_s29 + $0x18] sm:$0xff]  ;;  %v216_v8 = vld [vmem:[%s7865_s29 + $0x20] sm:$0xff]  ;;  %v217_v9 = vld [vmem:[%s7865_s29 + $0x28] sm:$0xff] }
  0x13   : > { %359 = vmatpush.msra.mxu0 %v200_v3  ;;  %v218_v10 = vld [vmem:[%s7865_s29 + $0x30] sm:$0xff]  ;;  %v219_v11 = vld [vmem:[%s7865_s29 + $0x38] sm:$0xff]  ;;  %v220_v12 = vld [vmem:[%s7865_s29 + $0x40] sm:$0xff] }
  0x14   : > { %7210 = vmatmul.msk.f32.vlgmr.msra.gmra.mxu0 %vm247_vm0, %v212_v4  ;;  %v221_v13 = vld [vmem:[%s7865_s29 + $0x48] sm:$0xff]  ;;  %v222_v14 = vld [vmem:[%s7865_s29 + $0x50] sm:$0xff]  ;;  %v223_v15 = vld [vmem:[%s7865_s29 + $0x58] sm:$0xff] }
  0x15   : > { %v224_v16 = vld [vmem:[%s7865_s29 + $0x60] sm:$0xff]  ;;  %v225_v17 = vld [vmem:[%s7865_s29 + $0x68] sm:$0xff]  ;;  %v226_v18 = vld [vmem:[%s7865_s29 + $0x70] sm:$0xff] }
  0x16   : > { %v227_v19 = vld [vmem:[%s7865_s29 + $0x78] sm:$0xff]  ;;  %v228_v22 = vld [vmem:[%s7865_s29 + $0x80] sm:$0xff]  ;;  %v229_v25 = vld [vmem:[%s7865_s29 + $0x88] sm:$0xff] }
  0x17   : > { %v230_v29 = vld [vmem:[%s7865_s29 + $0x90] sm:$0xff]  ;;  %v231_v32 = vld [vmem:[%s7865_s29 + $0x98] sm:$0xff]  ;;  %v232_v36 = vld [vmem:[%s7865_s29 + $0xa0] sm:$0xff] }
  0x18   : > { %v233_v39 = vld [vmem:[%s7865_s29 + $0xa8] sm:$0xff]  ;;  %v234_v42 = vld [vmem:[%s7865_s29 + $0xb0] sm:$0xff]  ;;  %v235_v46 = vld [vmem:[%s7865_s29 + $0xb8] sm:$0xff] }
  0x19   : > { %v236_v50 = vld [vmem:[%s7865_s29 + $0xc0] sm:$0xff]  ;;  %v237_v53 = vld [vmem:[%s7865_s29 + $0xc8] sm:$0xff]  ;;  %v238_v57 = vld [vmem:[%s7865_s29 + $0xd0] sm:$0xff] }
  0x1a   : > { %v239_v60 = vld [vmem:[%s7865_s29 + $0xd8] sm:$0xff]  ;;  %v240_v63 = vld [vmem:[%s7865_s29 + $0xe0] sm:$0xff]  ;;  %v241_v3 = vld [vmem:[%s7865_s29 + $0xe8] sm:$0xff] }
  0x1c   : > { %7211 = vmatmul.msk.f32.gmra.mxu0 %vm247_vm0, %v213_v5 }
  0x24   : > { %7212 = vmatmul.msk.f32.gmra.mxu0 %vm247_vm0, %v214_v6 }
  0x2c   : > { %7213 = vmatmul.msk.f32.gmra.mxu0 %vm247_vm0, %v215_v7  ;;  %v242_v7 = vld [vmem:[%s7865_s29 + $0xf0] sm:$0xff] }
  0x34   : > { %7214 = vmatmul.msk.f32.gmra.mxu0 %vm247_vm0, %v216_v8 }
  0x3c   : > { %7215 = vmatmul.msk.f32.gmra.mxu0 %vm247_vm0, %v217_v9 }
  0x44   : > { %7216 = vmatmul.msk.f32.gmra.mxu0 %vm247_vm0, %v218_v10 }
  0x4c   : > { %7217 = vmatmul.msk.f32.gmra.mxu0 %vm247_vm0, %v219_v11 }
  0x54   : > { %7218 = vmatmul.msk.f32.gmra.mxu0 %vm247_vm0, %v220_v12 }
  0x5c   : > { %7219 = vmatmul.msk.f32.gmra.mxu0 %vm247_vm0, %v221_v13  ;;  %v243_v13 = vld [vmem:[%s7865_s29 + $0xf8] sm:$0xff] }
  0x64   : > { %7220 = vmatmul.msk.f32.gmra.mxu0 %vm247_vm0, %v222_v14 }
  0x6c   : > { %7221 = vmatmul.msk.f32.gmra.mxu0 %vm247_vm0, %v223_v15 }
  0x74   : > { %7222 = vmatmul.msk.f32.gmra.mxu0 %vm247_vm0, %v224_v16 }
  0x7c   : > { %7223 = vmatmul.msk.f32.gmra.mxu0 %vm247_vm0, %v225_v17 }
  0x84   : > { %7224 = vmatmul.msk.f32.gmra.mxu0 %vm247_vm0, %v226_v18 }
  0x8c   : > { %7225 = vmatmul.msk.f32.gmra.mxu0 %vm247_vm0, %v227_v19 }
  0x91   : > { %v361_v21 = vpop.f32.mrf.mxu0 }
  0x92   : > { %v7906_v23 = vadd.f32 %v7902_v20, %v361_v21 }
  0x94   : > { %7226 = vmatmul.msk.f32.gmra.mxu0 %vm247_vm0, %v228_v22  ;;  %459 = vrot.lane.b32.xlu0 %v7906_v23, %s7804_s6 }
  0x99   : > { %v364_v24 = vpop.f32.mrf.mxu0 }
  0x9a   : > { %v7913_v26 = vadd.f32 %v7902_v20, %v364_v24 }
  0x9c   : > { %7227 = vmatmul.msk.f32.gmra.mxu0 %vm247_vm0, %v229_v25  ;;  %461 = vrot.lane.b32.xlu0 %v7913_v26, %s7804_s6  ;;  %v7452_v27 = vpack.i.bf16 %v7906_v23, %v7913_v26 }
  0x9e   : > { %7453 = vrot.lane.b32.xlu2 %v7452_v27, %s7805_s7 }
  0xa1   : > { %v367_v28 = vpop.f32.mrf.mxu0 }
  0xa2   : > { %v7923_v30 = vadd.f32 %v7902_v20, %v367_v28 }
  0xa4   : > { %7228 = vmatmul.msk.f32.gmra.mxu0 %vm247_vm0, %v230_v29  ;;  %497 = vrot.lane.b32.xlu1 %v7923_v30, %s7804_s6 }
  0xa9   : > { %v370_v31 = vpop.f32.mrf.mxu0 }
  0xaa   : > { %v7930_v33 = vadd.f32 %v7902_v20, %v370_v31 }
  0xac   : > { %7229 = vmatmul.msk.f32.gmra.mxu0 %vm247_vm0, %v231_v32  ;;  %499 = vrot.lane.b32.xlu1 %v7930_v33, %s7804_s6  ;;  %v7457_v34 = vpack.i.bf16 %v7923_v30, %v7930_v33 }
  0xae   : > { %7458 = vrot.lane.b32.xlu2 %v7457_v34, %s7805_s7 }
  0xb1   : > { %v373_v35 = vpop.f32.mrf.mxu0 }
  0xb2   : > { %v7940_v37 = vadd.f32 %v7902_v20, %v373_v35 }
  0xb4   : > { %7230 = vmatmul.msk.f32.gmra.mxu0 %vm247_vm0, %v232_v36 }
  0xb6   : > { %534 = vrot.lane.b32.xlu2 %v7940_v37, %s7804_s6 }
  0xb9   : > { %v376_v38 = vpop.f32.mrf.mxu0 }
  0xba   : > { %v7947_v40 = vadd.f32 %v7902_v20, %v376_v38 }
  0xbc   : > { %7231 = vmatmul.msk.f32.gmra.mxu0 %vm247_vm0, %v233_v39 }
  0xbe   : > { %536 = vrot.lane.b32.xlu2 %v7947_v40, %s7804_s6 }
  0xc1   : > { %v379_v41 = vpop.f32.mrf.mxu0 }
  0xc2   : > { %v7954_v43 = vadd.f32 %v7902_v20, %v379_v41 }
  0xc4   : > { %7232 = vmatmul.msk.f32.gmra.mxu0 %vm247_vm0, %v234_v42  ;;  %571 = vrot.lane.b32.xlu0 %v7954_v43, %s7804_s6  ;;  %v7462_v44 = vpack.i.bf16 %v7954_v43, %v7940_v37 }
  0xc6   : > { %7463 = vrot.lane.b32.xlu1 %v7462_v44, %s7805_s7 }
  0xc9   : > { %v382_v45 = vpop.f32.mrf.mxu0 }
  0xca   : > { %v7964_v47 = vadd.f32 %v7902_v20, %v382_v45 }
  0xcc   : > { %7233 = vmatmul.msk.f32.gmra.mxu0 %vm247_vm0, %v235_v46  ;;  %v7467_v48 = vpack.i.bf16 %v7964_v47, %v7947_v40 }
  0xce   : > { %573 = vrot.lane.b32.xlu1 %v7964_v47, %s7804_s6  ;;  %7468 = vrot.lane.b32.xlu2 %v7467_v48, %s7805_s7 }
  0xd1   : > { %v385_v49 = vpop.f32.mrf.mxu0 }
  0xd2   : > { %v7974_v51 = vadd.f32 %v7902_v20, %v385_v49 }
  0xd4   : > { %7234 = vmatmul.msk.f32.gmra.mxu0 %vm247_vm0, %v236_v50 }
  0xd6   : > { %608 = vrot.lane.b32.xlu2 %v7974_v51, %s7804_s6 }
  0xd9   : > { %v388_v52 = vpop.f32.mrf.mxu0 }
  0xda   : > { %v7981_v54 = vadd.f32 %v7902_v20, %v388_v52 }
  0xdc   : > { %12223 = vst [vmem:[#allocation3_spill] sm:$0xff] %v7981_v54  ;;  %7235 = vmatmul.msk.f32.gmra.mxu0 %vm247_vm0, %v237_v53  ;;  %610 = vrot.lane.b32.xlu0 %v7981_v54, %s7804_s6  ;;  %v7472_v55 = vpack.i.bf16 %v7974_v51, %v7981_v54  ;;  %v7806_v53 = vmov 1983009808  }
  0xde   : > { %7473 = vrot.lane.b32.xlu1 %v7472_v55, %s7805_s7  ;;  %v1056_v55 = vunpack.c.l.s4 %v7806_v53 }
  0xe1   : > { %v391_v56 = vpop.f32.mrf.mxu0 }
  0xe2   : > { %v7991_v58 = vadd.f32 %v7902_v20, %v391_v56 }
  0xe4   : > { %7236 = vmatmul.msk.f32.gmra.mxu0 %vm247_vm0, %v238_v57 }
  0xe6   : > { %645 = vrot.lane.b32.xlu1 %v7991_v58, %s7804_s6 }
  0xe9   : > { %v394_v59 = vpop.f32.mrf.mxu0 }
  0xea   : > { %v7998_v61 = vadd.f32 %v7902_v20, %v394_v59 }
  0xec   : > { %12224 = vst [vmem:[#allocation4_spill] sm:$0xff] %v7998_v61  ;;  %7237 = vmatmul.msk.f32.gmra.mxu0 %vm247_vm0, %v239_v60  ;;  %647 = vrot.lane.b32.xlu2 %v7998_v61, %s7804_s6 }
  0xf1   : > { %v397_v62 = vpop.f32.mrf.mxu0 }
  0xf2   : > { %v8005_v0 = vadd.f32 %v7902_v20, %v397_v62 }
  0xf4   : > { %7238 = vmatmul.msk.f32.gmra.mxu0 %vm247_vm0, %v240_v63  ;;  %682 = vrot.lane.b32.xlu0 %v8005_v0, %s7804_s6  ;;  %v7477_v1 = vpack.i.bf16 %v8005_v0, %v7991_v58  ;;  %v8145_v63 = vunpack.c.0.s8 %v1056_v55 }
  0xf6   : > { %7478 = vrot.lane.b32.xlu2 %v7477_v1, %s7805_s7  ;;  %12236 = vst [vmem:[#allocation16_spill] sm:$0xff] %v8145_v63 }
  0xf8   : > { %v8020_v5 = vpop.permute.xlu2 %7453 }
  0xf9   : > { %v400_v2 = vpop.f32.mrf.mxu0  ;;  %12226 = vst [vmem:[#allocation6_spill] sm:$0xff] %v8020_v5  ;;  %v8123_v48 = vunpack.i.h.bf16 %v8020_v5 }
  0xfa   : > { %v8015_v4 = vadd.f32 %v7902_v20, %v400_v2 }
  0xfb   : > { %12233 = vst [vmem:[#allocation13_spill] sm:$0xff] %v8123_v48  ;;  %v5467_v56 = vrot.slane %v8123_v48, 4 }
  0xfc   : > { %12225 = vst [vmem:[#allocation5_spill] sm:$0xff] %v8015_v4  ;;  %7239 = vmatmul.msk.f32.gmra.mxu0 %vm247_vm0, %v241_v3  ;;  %684 = vrot.lane.b32.xlu1 %v8015_v4, %s7804_s6  ;;  %v7482_v9 = vpack.i.bf16 %v8015_v4, %v7998_v61 }
 0x101   : > { %v403_v6 = vpop.f32.mrf.mxu0 }
 0x102   : > { %v8024_v8 = vadd.f32 %v7902_v20, %v403_v6 }
 0x104   : > { %7240 = vmatmul.msk.f32.gmra.mxu0 %vm247_vm0, %v242_v7  ;;  %7483 = vrot.lane.b32.xlu1 %v7482_v9, %s7805_s7 }
 0x105   : > { %719 = vrot.lane.b32.xlu2 %v8024_v8, %s7804_s6 }
 0x106   : > { %v8032_v10 = vpop.permute.xlu0 %459 }
 0x108   : > { %v8034_v11 = vpop.permute.xlu2 %7458 }
 0x109   : > { %12227 = vst [vmem:[#allocation7_spill] sm:$0xff] %v8034_v11  ;;  %v406_v12 = vpop.f32.mrf.mxu0  ;;  %v8136_v59 = vunpack.i.h.bf16 %v8034_v11 }
 0x10a   : > { %v8038_v14 = vadd.f32 %v7902_v20, %v406_v12 }
 0x10b   : > { %12235 = vst [vmem:[#allocation15_spill] sm:$0xff] %v8136_v59  ;;  %v5479_v7 = vrot.slane %v8136_v59, 4 }
 0x10c   : > { %12228 = vst [vmem:[#allocation8_spill] sm:$0xff] %v8038_v14  ;;  %7241 = vmatmul.msk.f32.gmra.mxu0 %vm247_vm0, %v243_v13  ;;  %721 = vrot.lane.b32.xlu0 %v8038_v14, %s7804_s6  ;;  %v7487_v15 = vpack.i.bf16 %v8024_v8, %v8038_v14 }
 0x10e   : > { %7488 = vrot.lane.b32.xlu2 %v7487_v15, %s7805_s7  ;;  %v8046_v16 = vpop.permute.xlu0 %461 }
 0x10f   : > { %7242 = vmatpush.xpose.msk.msra.mxu1 %vm463_vm1, %v8046_v16 }
 0x110   : > { %v8050_v17 = vpop.permute.xlu2 %534 }
 0x111   : > { %v409_v18 = vpop.f32.mrf.mxu0 }
 0x112   : > { %v8053_v19 = vadd.f32 %v7902_v20, %v409_v18 }
 0x113   : > { %7243 = vmatpush.xpose.msk.msra.mxu1 %vm463_vm1, %v8032_v10 }
 0x114   : > { %756 = vrot.lane.b32.xlu1 %v8053_v19, %s7804_s6 }
 0x116   : > { %v8059_v21 = vpop.permute.xlu1 %497  ;;  %7244 = vmatmul.msk.f32.vlgmr.msra.gmra.mxu1 %vm463_vm1, %v7906_v23 }
 0x118   : > { %v8063_v22 = vpop.permute.xlu2 %536 }
 0x119   : > { %v412_v24 = vpop.f32.mrf.mxu0  ;;  %7250 = vmatpush.xpose.msk.msra.mxu3 %vm463_vm1, %v8063_v22 }
 0x11a   : > { %v8068_v25 = vadd.f32 %v7902_v20, %v412_v24 }
 0x11c   : > { %12229 = vst [vmem:[#allocation9_spill] sm:$0xff] %v8068_v25  ;;  %758 = vrot.lane.b32.xlu2 %v8068_v25, %s7804_s6 }
 0x11d   : > { %7251 = vmatpush.xpose.msk.msra.mxu3 %vm463_vm1, %v8050_v17 }
 0x11e   : > { %v8074_v27 = vpop.permute.xlu1 %499  ;;  %7245 = vmatmul.msk.f32.gmra.mxu1 %vm463_vm1, %v7913_v26 }
 0x11f   : > { %7246 = vmatpush.xpose.msk.msra.mxu2 %vm463_vm1, %v8074_v27 }
 0x120   : > { %7252 = vmatmul.msk.f32.vlgmr.msra.gmra.mxu3 %vm463_vm1, %v7940_v37 }
 0x121   : > { %v415_v28 = vpop.f32.mrf.mxu0 }
 0x122   : > { %v8083_v29 = vadd.f32 %v7902_v20, %v415_v28 }
 0x123   : > { %7247 = vmatpush.xpose.msk.msra.mxu2 %vm463_vm1, %v8059_v21 }
 0x124   : > { %793 = vrot.lane.b32.xlu0 %v8083_v29, %s7804_s6  ;;  %v7492_v31 = vpack.i.bf16 %v8083_v29, %v8053_v19 }
 0x126   : > { %7493 = vrot.lane.b32.xlu1 %v7492_v31, %s7805_s7  ;;  %7248 = vmatmul.msk.f32.vlgmr.msra.gmra.mxu2 %vm463_vm1, %v7923_v30 }
 0x128   : > { %7253 = vmatmul.msk.f32.gmra.mxu3 %vm463_vm1, %v7947_v40  ;;  %v8106_v38 = vpop.permute.xlu2 %7468 }
 0x129   : > { %v418_v32 = vpop.f32.mrf.mxu0  ;;  %12231 = vst [vmem:[#allocation11_spill] sm:$0xff] %v8106_v38 }
 0x12a   : > { %v8097_v34 = vadd.f32 %v7902_v20, %v418_v32 }
 0x12c   : > { %12230 = vst [vmem:[#allocation10_spill] sm:$0xff] %v8097_v34  ;;  %v7497_v35 = vpack.i.bf16 %v8097_v34, %v8068_v25 }
 0x12e   : > { %795 = vrot.lane.b32.xlu1 %v8097_v34, %s7804_s6  ;;  %7249 = vmatmul.msk.f32.gmra.mxu2 %vm463_vm1, %v7930_v33 }
 0x12f   : > { %7498 = vrot.lane.b32.xlu2 %v7497_v35, %s7805_s7 }
 0x130   : > { %v8120_v46 = vpop.permute.xlu2 %608 }
 0x131   : > { %v421_v36 = vpop.f32.mrf.mxu0 }
 0x132   : > { %v8109_v39 = vadd.f32 %v7902_v20, %v421_v36 }
 0x136   : > { %v8133_v57 = vpop.permute.xlu0 %571 }
 0x137   : > { %830 = vrot.lane.b32.xlu2 %v8109_v39, %s7804_s6 }
 0x138   : > { %v7464_v41 = vpop.permute.xlu1 %7463 }
 0x139   : > { %v424_v42 = vpop.f32.mrf.mxu0  ;;  %v8128_v50 = vunpack.i.l.bf16 %v7464_v41  ;;  %v8149_v2 = vunpack.i.h.bf16 %v7464_v41 }
 0x13a   : > { %v8114_v44 = vadd.f32 %v7902_v20, %v424_v42 }
 0x13b   : > { %12234 = vst [vmem:[#allocation14_spill] sm:$0xff] %v8128_v50  ;;  %v5468_v60 = vsel %vm1051_vm2, %v8128_v50, %v5467_v56  ;;  %v5465_v3 = vrot.slane %v8128_v50, 4  ;;  %v5480_v13 = vsel %vm1051_vm2, %v8149_v2, %v5479_v7  ;;  %v5477_v24 = vrot.slane %v8149_v2, 4 }
 0x13c   : > { %12232 = vst [vmem:[#allocation12_spill] sm:$0xff] %v8114_v44  ;;  %832 = vrot.lane.b32.xlu0 %v8114_v44, %s7804_s6  ;;  %v7502_v45 = vpack.i.bf16 %v8109_v39, %v8114_v44  ;;  %v8157_v6 = vperm.slane %v5468_v60, %v8145_v63  ;;  %v8174_v28 = vperm.slane %v5480_v13, %v8145_v63 }
 0x13d   : > { %12237 = vst [vmem:[#allocation17_spill] sm:$0xff] %v8149_v2  ;;  %v5466_v18 = vsel %vm1051_vm2, %v5465_v3, %v8123_v48  ;;  %v5478_v42 = vsel %vm1051_vm2, %v5477_v24, %v8136_v59 }
 0x13e   : > { %7503 = vrot.lane.b32.xlu1 %v7502_v45, %s7805_s7  ;;  %v5527_v15 = vrot.slane %v8157_v6, 4  ;;  %v8181_v32 = vperm.slane %v5466_v18, %v8145_v63  ;;  %v5484_v55 = vperm.slane %v5478_v42, %v8145_v63  ;;  %v5525_v48 = vrot.slane %v8174_v28, 4 }
 0x140   : > { %v8126_v49 = vpop.permute.xlu1 %573  ;;  %v8189_v36 = vsel %vm1051_vm2, %v8174_v28, %v5527_v15 }
 0x141   : > { %v427_v52 = vpop.f32.mrf.mxu0  ;;  %7254 = vmatpush.xpose.msk.msrb.mxu1 %vm463_vm1, %v8126_v49 }
 0x142   : > { %v8141_v62 = vadd.f32 %v7902_v20, %v427_v52  ;;  %v5515_v52 = vrot.slane %v8181_v32, 4 }
 0x144   : > { %v8208_v56 = vsel %vm1051_vm2, %v5484_v55, %v5515_v52 }
 0x145   : > { %7255 = vmatpush.xpose.msk.msrb.mxu1 %vm463_vm1, %v8133_v57 }
 0x146   : > { %v8147_v1 = vpop.permute.xlu2 %647  ;;  %867 = vrot.lane.b32.xlu1 %v8141_v62, %s7804_s6 }
 0x147   : > { %7262 = vmatpush.xpose.msk.msrb.mxu3 %vm463_vm1, %v8147_v1 }
 0x148   : > { %7256 = vmatmul.msk.f32.vlgmr.msrb.gmra.mxu1 %vm463_vm1, %v7954_v43 }
 0x149   : > { %v430_v9 = vpop.f32.mrf.mxu0 }
 0x14a   : > { %v8163_v12 = vadd.f32 %v7902_v20, %v430_v9 }
 0x14c   : > { %12238 = vst [vmem:[#allocation18_spill] sm:$0xff] %v8163_v12  ;;  %869 = vrot.lane.b32.xlu2 %v8163_v12, %s7804_s6 }
 0x14e   : > { %v8176_v31 = vpop.permute.xlu0 %610 }
 0x14f   : > { %12239 = vst [vmem:[#allocation19_spill] sm:$0xff] %v8176_v31  ;;  %7258 = vmatpush.xpose.msk.msrb.mxu2 %vm463_vm1, %v8176_v31 }
 0x150   : > { %v8183_v35 = vpop.permute.xlu1 %7473  ;;  %7257 = vmatmul.msk.f32.gmra.mxu1 %vm463_vm1, %v7964_v47  ;;  %v7479_v60 = vpop.permute.xlu2 %7478 }
 0x151   : > { %12240 = vst [vmem:[#allocation20_spill] sm:$0xff] %v8183_v35  ;;  %v433_v41 = vpop.f32.mrf.mxu0  ;;  %v8239_v52 = vunpack.i.h.bf16 %v7479_v60 }
 0x152   : > { %v8194_v45 = vadd.f32 %v7902_v20, %v433_v41  ;;  %v8235_v41 = vunpack.i.l.bf16 %v7479_v60 }
 0x153   : > { %7259 = vmatpush.xpose.msk.msrb.mxu2 %vm463_vm1, %v8120_v46  ;;  %12245 = vst [vmem:[#allocation25_spill] sm:$0xff] %v8239_v52 }
 0x154   : > { %904 = vrot.lane.b32.xlu0 %v8194_v45, %s7804_s6  ;;  %v7507_v53 = vpack.i.bf16 %v8194_v45, %v8141_v62  ;;  %12243 = vst [vmem:[#allocation23_spill] sm:$0xff] %v8235_v41 }
 0x156   : > { %7508 = vrot.lane.b32.xlu2 %v7507_v53, %s7805_s7  ;;  %7260 = vmatmul.msk.f32.vlgmr.msrb.gmra.mxu2 %vm463_vm1, %v7974_v51 }
 0x158   : > { %v8210_v3 = vpop.permute.xlu1 %645 }
 0x159   : > { %v436_v7 = vpop.f32.mrf.mxu0  ;;  %7263 = vmatpush.xpose.msk.msrb.mxu3 %vm463_vm1, %v8210_v3 }
 0x15a   : > { %v8215_v9 = vadd.f32 %v7902_v20, %v436_v7 }
 0x15c   : > { %12241 = vst [vmem:[#allocation21_spill] sm:$0xff] %v8215_v9  ;;  %906 = vrot.lane.b32.xlu1 %v8215_v9, %s7804_s6  ;;  %7264 = vmatmul.msk.f32.vlgmr.msrb.gmra.mxu3 %vm463_vm1, %v7991_v58  ;;  %v7512_v24 = vpack.i.bf16 %v8215_v9, %v8163_v12 }
 0x15e   : > { %7261 = vmatmul.msk.f32.gmra.mxu2 %vm463_vm1, %v7981_v54 }
 0x15f   : > { %v8223_v13 = vpop.permute.xlu2 %719 }
 0x161   : > { %v439_v15 = vpop.f32.mrf.mxu0 }
 0x162   : > { %v8226_v18 = vadd.f32 %v7902_v20, %v439_v15  ;;  %v8245_v15 = vunpack.i.h.bf16 %v8183_v35 }
 0x164   : > { %12242 = vst [vmem:[#allocation22_spill] sm:$0xff] %v8226_v18  ;;  %7513 = vrot.lane.b32.xlu1 %v7512_v24, %s7805_s7  ;;  %941 = vrot.lane.b32.xlu2 %v8226_v18, %s7804_s6  ;;  %v5503_v24 = vrot.slane %v8235_v41, 4  ;;  %v5491_v38 = vrot.slane %v8245_v15, 4 }
 0x165   : > { %7265 = vmatmul.msk.f32.gmra.mxu3 %vm463_vm1, %v7998_v61  ;;  %12247 = vst [vmem:[#allocation27_spill] sm:$0xff] %v8245_v15 }
 0x168   : > { %v8237_v42 = vpop.permute.xlu2 %7488 }
 0x169   : > { %12244 = vst [vmem:[#allocation24_spill] sm:$0xff] %v8237_v42  ;;  %v8242_v53 = vunpack.i.h.bf16 %v8237_v42  ;;  %v442_v7 = vpop.f32.mrf.mxu0  ;;  %v5489_v42 = vrot.slane %v8239_v52, 4 }
 0x16a   : > { %v8249_v50 = vadd.f32 %v7902_v20, %v442_v7 }
 0x16b   : > { %12246 = vst [vmem:[#allocation26_spill] sm:$0xff] %v8242_v53  ;;  %v5501_v2 = vrot.slane %v8242_v53, 4  ;;  %v5504_v59 = vsel %vm1051_vm2, %v8242_v53, %v5503_v24  ;;  %v5513_v53 = vrot.slane %v5484_v55, 4  ;;  %v5490_v5 = vsel %vm1051_vm2, %v5489_v42, %v8245_v15 }
 0x16c   : > { %12248 = vst [vmem:[#allocation28_spill] sm:$0xff] %v8249_v50  ;;  %943 = vrot.lane.b32.xlu0 %v8249_v50, %s7804_s6  ;;  %v7517_v60 = vpack.i.bf16 %v8226_v18, %v8249_v50  ;;  %v5512_v24 = vperm.slane %v5504_v59, %v8145_v63  ;;  %v5496_v28 = vperm.slane %v5490_v5, %v8145_v63 }
 0x16d   : > { %v5502_v35 = vsel %vm1051_vm2, %v5501_v2, %v8235_v41  ;;  %v7807_v41 = vmov 1934713408   ;;  %v5514_v55 = vsel %vm1051_vm2, %v5513_v53, %v8181_v32 }
 0x16e   : > { %v5508_v7 = vperm.slane %v5502_v35, %v8145_v63  ;;  %7518 = vrot.lane.b32.xlu1 %v7517_v60, %s7805_s7  ;;  %v8264_v11 = vpop.permute.xlu1 %684  ;;  %v1104_v31 = vunpack.c.l.s4 %v7807_v41  ;;  %v5492_v35 = vsel %vm1051_vm2, %v8239_v52, %v5491_v38  ;;  %v8274_v60 = vpop.permute.xlu0 %682  ;;  %v5549_v18 = vrot.slane %v5512_v24, 4 }
 0x16f   : > { %12249 = vst [vmem:[#allocation29_spill] sm:$0xff] %v8264_v11  ;;  %7266 = vmatpush.xpose.msk.msra.mxu1 %vm463_vm1, %v8264_v11  ;;  %v5500_v41 = vperm.slane %v5492_v35, %v8145_v63  ;;  %v5526_v38 = vsel %vm1051_vm2, %v5525_v48, %v8157_v6 }
 0x170   : > { %v5537_v50 = vrot.slane %v5508_v7, 4  ;;  %v8285_v42 = vunpack.c.0.s8 %v1104_v31 }
 0x171   : > { %v445_v2 = vpop.f32.mrf.mxu0  ;;  %v5550_v31 = vsel %vm1051_vm2, %v5549_v18, %v5500_v41 }
 0x172   : > { %v8279_v59 = vadd.f32 %v7902_v20, %v445_v2  ;;  %12251 = vst [vmem:[#allocation31_spill] sm:$0xff] %v8285_v42  ;;  %v5538_v5 = vsel %vm1051_vm2, %v5537_v50, %v5496_v28  ;;  %v8299_v32 = vperm.slane %v5514_v55, %v8285_v42  ;;  %v8303_v48 = vperm.slane %v5526_v38, %v8285_v42 }
 0x173   : > { %7267 = vmatpush.xpose.msk.msra.mxu1 %vm463_vm1, %v8274_v60  ;;  %v8306_v53 = vperm.slane %v5538_v5, %v8285_v42  ;;  %v5539_v2 = vrot.slane %v5496_v28, 4  ;;  %v8312_v50 = vperm.slane %v5550_v31, %v8285_v42  ;;  %v5524_v55 = vperm.slane %v8208_v56, %v8285_v42 }
 0x174   : > { %12250 = vst [vmem:[#allocation30_spill] sm:$0xff] %v8279_v59  ;;  %v5563_v18 = vrot.slane %v8299_v32, 4  ;;  %v5551_v38 = vrot.slane %v5500_v41, 4  ;;  %v5571_v5 = vrot.slane %v8303_v48, 4  ;;  %v5536_v31 = vperm.slane %v8189_v36, %v8285_v42 }
 0x175   : > { %12253 = vst [vmem:[#allocation33_spill] sm:$0xff] %v8299_v32  ;;  %v5540_v15 = vsel %vm1051_vm2, %v5508_v7, %v5539_v2  ;;  %v5567_v41 = vrot.slane %v5524_v55, 4 }
 0x176   : > { %978 = vrot.lane.b32.xlu1 %v8279_v59, %s7804_s6  ;;  %v8291_v52 = vpop.permute.xlu2 %758  ;;  %7268 = vmatmul.msk.f32.vlgmr.msra.gmra.mxu1 %vm463_vm1, %v8005_v0  ;;  %12254 = vst [vmem:[#allocation34_spill] sm:$0xff] %v8303_v48  ;;  %v5548_v28 = vperm.slane %v5540_v15, %v8285_v42  ;;  %v8328_v56 = vpop.permute.xlu1 %7483  ;;  %v5552_v2 = vsel %vm1051_vm2, %v5512_v24, %v5551_v38  ;;  %v5575_v48 = vrot.slane %v5536_v31, 4 }
 0x177   : > { %12252 = vst [vmem:[#allocation32_spill] sm:$0xff] %v8291_v52  ;;  %7274 = vmatpush.xpose.msk.msra.mxu3 %vm463_vm1, %v8291_v52  ;;  %v8337_v15 = vsel %vm1051_vm2, %v8312_v50, %v5571_v5  ;;  %v5560_v52 = vperm.slane %v5552_v2, %v8285_v42 }
 0x178   : > { %12256 = vst [vmem:[#allocation36_spill] sm:$0xff] %v8312_v50  ;;  %v8342_v36 = vsel %vm1051_vm2, %v5548_v28, %v5567_v41 }
 0x179   : > { %v448_v6 = vpop.f32.mrf.mxu0  ;;  %12258 = vst [vmem:[#allocation38_spill] sm:$0xff] %v8328_v56  ;;  %v8354_v38 = vsel %vm1051_vm2, %v5560_v52, %v5575_v48  ;;  %v5573_v41 = vrot.slane %v5560_v52, 4 }
 0x17a   : > { %v8309_v35 = vadd.f32 %v7902_v20, %v448_v6  ;;  %v8324_v6 = vsel %vm1051_vm2, %v8306_v53, %v5563_v18  ;;  %12260 = vst [vmem:[#allocation40_spill] sm:$0xff] %v8337_v15  ;;  %v5565_v18 = vrot.slane %v5548_v28, 4 }
 0x17b   : > { %12257 = vst [vmem:[#allocation37_spill] sm:$0xff] %v8324_v6 }
 0x17c   : > { %12255 = vst [vmem:[#allocation35_spill] sm:$0xff] %v8309_v35  ;;  %980 = vrot.lane.b32.xlu2 %v8309_v35, %s7804_s6  ;;  %v8345_v56 = vsel %vm1051_vm2, %v5565_v18, %v5524_v55 }
 0x17d   : > { %12261 = vst [vmem:[#allocation41_spill] sm:$0xff] %v8342_v36  ;;  %v1050_v36 = vrot.slane %v7940_v37, 4 }
 0x17e   : > { %7269 = vmatmul.msk.f32.gmra.mxu1 %vm463_vm1, %v8015_v4  ;;  %v8332_v7 = vpop.permute.xlu0 %721  ;;  %12262 = vst [vmem:[#allocation42_spill] sm:$0xff] %v8345_v56 }
 0x17f   : > { %12259 = vst [vmem:[#allocation39_spill] sm:$0xff] %v8332_v7  ;;  %7270 = vmatpush.xpose.msk.msra.mxu2 %vm463_vm1, %v8332_v7 }
 0x180   : > { %12264 = vst [vmem:[#allocation44_spill] sm:$0xff] %v8354_v38 }
 0x181   : > { %v451_v6 = vpop.f32.mrf.mxu0 }
 0x182   : > { %v8349_v24 = vadd.f32 %v7902_v20, %v451_v6 }
 0x183   : > { %7271 = vmatpush.xpose.msk.msra.mxu2 %vm463_vm1, %v8223_v13 }
 0x184   : > { %12263 = vst [vmem:[#allocation43_spill] sm:$0xff] %v8349_v24  ;;  %1015 = vrot.lane.b32.xlu0 %v8349_v24, %s7804_s6  ;;  %v7522_v5 = vpack.i.bf16 %v8349_v24, %v8279_v59  ;;  %v1063_v24 = vrot.slane %v7954_v43, 4 }
 0x186   : > { %v8360_v55 = vpop.permute.xlu1 %756  ;;  %7523 = vrot.lane.b32.xlu2 %v7522_v5, %s7805_s7  ;;  %7272 = vmatmul.msk.f32.vlgmr.msra.gmra.mxu2 %vm463_vm1, %v8024_v8 }
 0x187   : > { %12265 = vst [vmem:[#allocation45_spill] sm:$0xff] %v8360_v55  ;;  %7275 = vmatpush.xpose.msk.msra.mxu3 %vm463_vm1, %v8360_v55  ;;  %v1052_v55 = vsel %vm1051_vm2, %v1050_v36, %v7906_v23 }
 0x189   : > { %v454_v28 = vpop.f32.mrf.mxu0  ;;  %v8384_v2 = vpop.permute.xlu2 %7498 }
 0x18a   : > { %v8368_v48 = vadd.f32 %v7902_v20, %v454_v28  ;;  %7276 = vmatmul.msk.f32.vlgmr.msra.gmra.mxu3 %vm463_vm1, %v8053_v19  ;;  %v8382_v20 = vsel %vm1051_vm2, %v5573_v41, %v5536_v31  ;;  %12268 = vst [vmem:[#allocation48_spill] sm:$0xff] %v8384_v2  ;;  %v1053_v2 = vrot.slane %v7906_v23, 4 }
 0x18b   : > { %12267 = vst [vmem:[#allocation47_spill] sm:$0xff] %v8382_v20 }
 0x18c   : > { %12266 = vst [vmem:[#allocation46_spill] sm:$0xff] %v8368_v48  ;;  %1017 = vrot.lane.b32.xlu1 %v8368_v48, %s7804_s6  ;;  %v7527_v6 = vpack.i.bf16 %v8368_v48, %v8309_v35 }
 0x18e   : > { %7273 = vmatmul.msk.f32.gmra.mxu2 %vm463_vm1, %v8038_v14  ;;  %7528 = vrot.lane.b32.xlu0 %v7527_v6, %s7805_s7 }
 0x191   : > { %v8386_v5 = vpop.permute.xlu2 %830 }
 0x192   : > { %7277 = vmatmul.msk.f32.gmra.mxu3 %vm463_vm1, %v8068_v25 }
 0x193   : > { %v8404_v6 = vpop.f32.mrf.mxu1 }
 0x194   : > { %12272 = vst [vmem:[#allocation52_spill] sm:$0xff] %v8404_v6  ;;  %v2572_v20 = vsel %vm2571_vm3, %v8404_v6, -inf }
 0x196   : > { %v8392_v38 = vpop.permute.xlu0 %793 }
 0x198   : > { %v7494_v18 = vpop.permute.xlu1 %7493 }
 0x199   : > { %v8406_v41 = vunpack.i.l.bf16 %v7494_v18 }
 0x19b   : > { %12273 = vst [vmem:[#allocation53_spill] sm:$0xff] %v8406_v41  ;;  %v5579_v6 = vrot.slane %v8406_v41, 4 }
 0x1a0   : > { %v8388_v28 = vpop.permute.xlu1 %795 }
 0x1a1   : > { %12269 = vst [vmem:[#allocation49_spill] sm:$0xff] %v8388_v28  ;;  %7278 = vmatpush.xpose.msk.msrb.mxu1 %vm463_vm1, %v8388_v28  ;;  %v1065_v28 = vrot.slane %v7923_v30, 4 }
 0x1a3   : > { %v1066_v32 = vsel %vm1051_vm2, %v7954_v43, %v1065_v28  ;;  %v1275_v28 = vrot.slane %v7947_v40, 4 }
 0x1a5   : > { %7279 = vmatpush.xpose.msk.msrb.mxu1 %vm463_vm1, %v8392_v38 }
 0x1a6   : > { %v8396_v52 = vpop.permute.xlu2 %869 }
 0x1a7   : > { %12270 = vst [vmem:[#allocation50_spill] sm:$0xff] %v8396_v52  ;;  %7286 = vmatpush.xpose.msk.msrb.mxu3 %vm463_vm1, %v8396_v52  ;;  %v8432_v52 = vunpack.i.h.bf16 %v7494_v18 }
 0x1a8   : > { %7280 = vmatmul.msk.f32.vlgmr.msrb.gmra.mxu1 %vm463_vm1, %v8083_v29 }
 0x1a9   : > { %v8402_v31 = vpop.f32.mrf.mxu2  ;;  %12278 = vst [vmem:[#allocation58_spill] sm:$0xff] %v8432_v52 }
 0x1aa   : > { %12271 = vst [vmem:[#allocation51_spill] sm:$0xff] %v8402_v31  ;;  %v2578_v18 = vsel %vm2571_vm3, %v8402_v31, -inf }
 0x1ae   : > { %v8408_v15 = vpop.permute.xlu0 %832 }
 0x1af   : > { %12274 = vst [vmem:[#allocation54_spill] sm:$0xff] %v8408_v15  ;;  %2573 = vmax.xlane.f32.xlu2 %v2572_v20  ;;  %7282 = vmatpush.xpose.msk.msrb.mxu2 %vm463_vm1, %v8408_v15  ;;  %v1054_v15 = vsel %vm1051_vm2, %v7940_v37, %v1053_v2  ;;  %v8446_v37 = vpop.f32.mrf.mxu1 }
 0x1b0   : > { %v8415_v56 = vpop.permute.xlu2 %7508  ;;  %7281 = vmatmul.msk.f32.gmra.mxu1 %vm463_vm1, %v8097_v34  ;;  %v8420_v25 = vpop.permute.xlu1 %7503  ;;  %12281 = vst [vmem:[#allocation61_spill] sm:$0xff] %v8446_v37 }
 0x1b1   : > { %12275 = vst [vmem:[#allocation55_spill] sm:$0xff] %v8420_v25  ;;  %v8423_v48 = vunpack.i.l.bf16 %v8415_v56  ;;  %v8427_v20 = vunpack.i.h.bf16 %v8420_v25  ;;  %v8434_v34 = vpop.f32.mrf.mxu3  ;;  %v8436_v7 = vpop.f32.mrf.mxu2 }
 0x1b2   : > { %12279 = vst [vmem:[#allocation59_spill] sm:$0xff] %v8434_v34  ;;  %v2581_v23 = vsel %vm2571_vm3, %v8436_v7, -inf }
 0x1b3   : > { %12276 = vst [vmem:[#allocation56_spill] sm:$0xff] %v8423_v48  ;;  %7283 = vmatpush.xpose.msk.msrb.mxu2 %vm463_vm1, %v8386_v5  ;;  %v5577_v35 = vrot.slane %v8427_v20, 4  ;;  %v5580_v25 = vsel %vm1051_vm2, %v8427_v20, %v5579_v6  ;;  %v5589_v2 = vrot.slane %v8423_v48, 4  ;;  %v1062_v6 = vperm.slane %v1054_v15, %v8145_v63 }
 0x1b4   : > { %12277 = vst [vmem:[#allocation57_spill] sm:$0xff] %v8427_v20  ;;  %v8454_v11 = vperm.slane %v5580_v25, %v8145_v63  ;;  %v5591_v20 = vrot.slane %v8432_v52, 4  ;;  %v1058_v25 = vperm.slane %v1052_v55, %v8145_v63  ;;  %v1074_v15 = vperm.slane %v1066_v32, %v8145_v63 }
 0x1b5   : > { %12280 = vst [vmem:[#allocation60_spill] sm:$0xff] %v8436_v7  ;;  %v5578_v36 = vsel %vm1051_vm2, %v5577_v35, %v8406_v41  ;;  %v1087_v7 = vrot.slane %v8024_v8, 4  ;;  %v2575_v35 = vsel %vm2571_vm3, %v8446_v37, -inf  ;;  %v1075_v41 = vrot.slane %v8005_v0, 4 }
 0x1b6   : > { %2579 = vmax.xlane.f32.xlu1 %v2578_v18  ;;  %7284 = vmatmul.msk.f32.vlgmr.msrb.gmra.mxu2 %vm463_vm1, %v8109_v39  ;;  %v8465_v43 = vperm.slane %v5578_v36, %v8145_v63  ;;  %v1064_v18 = vsel %vm1051_vm2, %v1063_v24, %v7923_v30  ;;  %v5592_v55 = vsel %vm1051_vm2, %v8423_v48, %v5591_v20  ;;  %v1089_v30 = vrot.slane %v7991_v58, 4 }
 0x1b7   : > { %2582 = vmax.xlane.f32.xlu2 %v2581_v23  ;;  %v5590_v23 = vsel %vm1051_vm2, %v5589_v2, %v8432_v52  ;;  %v5639_v24 = vrot.slane %v8454_v11, 4  ;;  %v1113_v37 = vrot.slane %v1062_v6, 4  ;;  %v1070_v31 = vperm.slane %v1064_v18, %v8145_v63 }
 0x1b8   : > { %v8480_v36 = vpop.permute.xlu1 %867  ;;  %2576 = vmax.xlane.f32.xlu0 %v2575_v35  ;;  %v5627_v32 = vrot.slane %v8465_v43, 4  ;;  %v1090_v2 = vsel %vm1051_vm2, %v8024_v8, %v1089_v30  ;;  %v8491_v20 = vperm.slane %v5592_v55, %v8145_v63  ;;  %v8494_v35 = vperm.slane %v5590_v23, %v8145_v63 }
 0x1b9   : > { %7287 = vmatpush.xpose.msk.msrb.mxu3 %vm463_vm1, %v8480_v36  ;;  %v1088_v52 = vsel %vm1051_vm2, %v1087_v7, %v7991_v58  ;;  %v8498_v48 = vpop.f32.mrf.mxu3  ;;  %v1076_v18 = vsel %vm1051_vm2, %v1075_v41, %v7974_v51  ;;  %v1101_v50 = vrot.slane %v1058_v25, 4  ;;  %v1111_v59 = vrot.slane %v1074_v15, 4 }
 0x1ba   : > { %12282 = vst [vmem:[#allocation62_spill] sm:$0xff] %v8498_v48  ;;  %v1276_v8 = vsel %vm1051_vm2, %v1275_v28, %v7913_v26  ;;  %v2584_v23 = vsel %vm2571_vm3, %v8434_v34, -inf  ;;  %v1114_v58 = vsel %vm1051_vm2, %v1074_v15, %v1113_v37  ;;  %v8513_v7 = vsel %vm1051_vm2, %v8494_v35, %v5627_v32 }
 0x1bb   : > { %v8517_v41 = vsel %vm1051_vm2, %v8491_v20, %v5639_v24  ;;  %v1077_v55 = vrot.slane %v7974_v51, 4  ;;  %v1098_v28 = vperm.slane %v1090_v2, %v8145_v63  ;;  %v1094_v30 = vperm.slane %v1088_v52, %v8145_v63 }
 0x1bc   : > { %7288 = vmatmul.msk.f32.vlgmr.msrb.gmra.mxu3 %vm463_vm1, %v8141_v62  ;;  %v2587_v34 = vsel %vm2571_vm3, %v8498_v48, -inf  ;;  %v1082_v37 = vperm.slane %v1076_v18, %v8145_v63  ;;  %v1102_v15 = vsel %vm1051_vm2, %v1070_v31, %v1101_v50  ;;  %v8529_v24 = vperm.slane %v1276_v8, %v8145_v63 }
 0x1bd   : > { %v1078_v32 = vsel %vm1051_vm2, %v8005_v0, %v1077_v55  ;;  %v1277_v51 = vrot.slane %v7913_v26, 4  ;;  %v1112_v2 = vsel %vm1051_vm2, %v1111_v59, %v1062_v6  ;;  %v8534_v52 = vperm.slane %v1114_v58, %v8285_v42 }
 0x1be   : > { %7285 = vmatmul.msk.f32.gmra.mxu2 %vm463_vm1, %v8114_v44  ;;  %v1099_v44 = vrot.slane %v1070_v31, 4  ;;  %12283 = vst [vmem:[#allocation63_spill] sm:$0xff] %v8529_v24  ;;  %v1123_v18 = vrot.slane %v1094_v30, 4  ;;  %v8538_v50 = vperm.slane %v1102_v15, %v8285_v42  ;;  %v1287_v0 = vrot.slane %v7964_v47, 4 }
 0x1bf   : > { %2585 = vmax.xlane.f32.xlu2 %v2584_v23  ;;  %12284 = vst [vmem:[#allocation64_spill] sm:$0xff] %v8534_v52  ;;  %v1135_v23 = vrot.slane %v1098_v28, 4  ;;  %v1299_v31 = vrot.slane %v8015_v4, 4  ;;  %v1125_v8 = vrot.slane %v1082_v37, 4  ;;  %v1289_v26 = vrot.slane %v7930_v33, 4 }
 0x1c0   : > { %2588 = vmax.xlane.f32.xlu0 %v2587_v34  ;;  %v1100_v48 = vsel %vm1051_vm2, %v1099_v44, %v1058_v25  ;;  %v1086_v34 = vperm.slane %v1078_v32, %v8145_v63  ;;  %v8546_v59 = vsel %vm1051_vm2, %v7947_v40, %v1277_v51  ;;  %v8553_v6 = vperm.slane %v1112_v2, %v8285_v42 }
 0x1c1   : > { %12285 = vst [vmem:[#allocation65_spill] sm:$0xff] %v8546_v59  ;;  %v1543_v58 = vrot.slane %v8133_v57, 4  ;;  %v1126_v15 = vsel %vm1051_vm2, %v1094_v30, %v1125_v8  ;;  %v8563_v32 = vsel %vm1051_vm2, %v7964_v47, %v1289_v26  ;;  %v1106_v51 = vperm.slane %v1100_v48, %v8285_v42 }
 0x1c2   : > { %12287 = vst [vmem:[#allocation67_spill] sm:$0xff] %v8553_v6  ;;  %v1124_v2 = vsel %vm1051_vm2, %v1123_v18, %v1082_v37  ;;  %v1136_v25 = vsel %vm1051_vm2, %v1135_v23, %v1086_v34  ;;  %v1153_v59 = vrot.slane %v8538_v50, 4  ;;  %v1137_v4 = vrot.slane %v1086_v34, 4 }
 0x1c3   : > { %12288 = vst [vmem:[#allocation68_spill] sm:$0xff] %v8563_v32  ;;  %v1300_v30 = vsel %vm1051_vm2, %v1299_v31, %v7981_v54  ;;  %v1531_v8 = vrot.slane %v8050_v17, 4  ;;  %v1545_v47 = vrot.slane %v8059_v21, 4  ;;  %v1755_v26 = vrot.slane %v8063_v22, 4 }
 0x1c4   : > { %7289 = vmatmul.msk.f32.gmra.mxu3 %vm463_vm1, %v8163_v12  ;;  %v1134_v48 = vperm.slane %v1126_v15, %v8285_v42  ;;  %v1533_v37 = vrot.slane %v8032_v10, 4  ;;  %v1544_v23 = vsel %vm1051_vm2, %v1543_v58, %v8059_v21  ;;  %v1130_v18 = vperm.slane %v1124_v2, %v8285_v42 }
 0x1c5   : > { %v8550_v44 = vpop.f32.mrf.mxu1  ;;  %v1546_v34 = vsel %vm1051_vm2, %v8133_v57, %v1545_v47  ;;  %v1149_v31 = vrot.slane %v1106_v51, 4  ;;  %v1175_v40 = vrot.slane %v8141_v62, 4  ;;  %v1138_v21 = vsel %vm1051_vm2, %v1098_v28, %v1137_v4 }
 0x1c6   : > { %12286 = vst [vmem:[#allocation66_spill] sm:$0xff] %v8550_v44  ;;  %v2590_v55 = vsel %vm2571_vm3, %v8550_v44, -inf  ;;  %v1288_v44 = vsel %vm1051_vm2, %v1287_v0, %v7930_v33  ;;  %v8582_v33 = vperm.slane %v1136_v25, %v8285_v42  ;;  %v1311_v0 = vrot.slane %v8038_v14, 4  ;;  %v8638_v12 = vpop.permute.xlu0 %904 }
 0x1c7   : > { %2591 = vmax.xlane.f32.xlu1 %v2590_v55  ;;  %v8588_v55 = vperm.slane %v1288_v44, %v8145_v63  ;;  %v1534_v15 = vsel %vm1051_vm2, %v8050_v17, %v1533_v37  ;;  %v8595_v58 = vperm.slane %v1300_v30, %v8145_v63  ;;  %v1532_v25 = vsel %vm1051_vm2, %v1531_v8, %v8032_v10  ;;  %v8605_v37 = vpop.permute.xlu2 %941 }
 0x1c8   : > { %12289 = vst [vmem:[#allocation69_spill] sm:$0xff] %v8582_v33  ;;  %v1756_v57 = vsel %vm1051_vm2, %v1755_v26, %v8046_v16  ;;  %v1550_v2 = vperm.slane %v1544_v23, %v8145_v63  ;;  %v1151_v47 = vrot.slane %v1134_v48, 4  ;;  %v1554_v17 = vperm.slane %v1546_v34, %v8145_v63 }
 0x1c9   : > { %12290 = vst [vmem:[#allocation70_spill] sm:$0xff] %v8595_v58  ;;  %v1147_v28 = vrot.slane %v1130_v18, 4  ;;  %v1155_v10 = vrot.slane %v8582_v33, 4  ;;  %v1312_v30 = vsel %vm1051_vm2, %v1311_v0, %v7998_v61  ;;  %v1542_v8 = vperm.slane %v1534_v15, %v8145_v63 }
 0x1ca   : > { %v1163_v26 = vrot.slane %v8109_v39, 4  ;;  %v8619_v23 = vperm.slane %v1138_v21, %v8285_v42  ;;  %v1538_v34 = vperm.slane %v1532_v25, %v8145_v63  ;;  %v1176_v54 = vsel %vm1051_vm2, %v1175_v40, %v8083_v29 }
 0x1cb   : > { %v8628_v0 = vsel %vm1051_vm2, %v1134_v48, %v1153_v59  ;;  %v1757_v15 = vrot.slane %v8046_v16, 4  ;;  %v8632_v61 = vsel %vm1051_vm2, %v1130_v18, %v1149_v31  ;;  %v8636_v21 = vsel %vm1051_vm2, %v1151_v47, %v8538_v50 }
 0x1cc   : > { %12292 = vst [vmem:[#allocation72_spill] sm:$0xff] %v8619_v23  ;;  %v1591_v25 = vrot.slane %v1554_v17, 4  ;;  %v8645_v59 = vsel %vm1051_vm2, %v1155_v10, %v8553_v6  ;;  %v8648_v16 = vperm.slane %v1312_v30, %v8145_v63  ;;  %v1593_v40 = vrot.slane %v1542_v8, 4 }
 0x1cd   : > { %v8602_v44 = vpop.f32.mrf.mxu1  ;;  %v1165_v48 = vrot.slane %v8053_v19, 4  ;;  %v1164_v50 = vsel %vm1051_vm2, %v1163_v26, %v8053_v19  ;;  %v8656_v18 = vperm.slane %v1176_v54, %v8145_v63  ;;  %v8660_v31 = vsel %vm1051_vm2, %v8063_v22, %v1757_v15 }
 0x1ce   : > { %12291 = vst [vmem:[#allocation71_spill] sm:$0xff] %v8602_v44  ;;  %v8607_v14 = vpop.permute.xlu1 %906  ;;  %v2593_v4 = vsel %vm2571_vm3, %v8602_v44, -inf  ;;  %v8623_v44 = vperm.slane %v1756_v57, %v8145_v63  ;;  %v8641_v57 = vsel %vm1051_vm2, %v1147_v28, %v1106_v51  ;;  %v1581_v51 = vrot.slane %v1538_v34, 4 }
 0x1cf   : > { %2594 = vmax.xlane.f32.xlu2 %v2593_v4  ;;  %7290 = vmatpush.xpose.msk.msra.mxu1 %vm463_vm1, %v8607_v14  ;;  %v1579_v4 = vrot.slane %v1550_v2, 4  ;;  %12293 = vst [vmem:[#allocation73_spill] sm:$0xff] %v8648_v16  ;;  %v1767_v28 = vrot.slane %v8126_v49, 4  ;;  %v1769_v10 = vrot.slane %v8074_v27, 4  ;;  %v1177_v30 = vrot.slane %v8083_v29, 4 }
 0x1d0   : > { %12294 = vst [vmem:[#allocation74_spill] sm:$0xff] %v8660_v31  ;;  %v1805_v47 = vrot.slane %v8623_v44, 4  ;;  %v1594_v19 = vsel %vm1051_vm2, %v1554_v17, %v1593_v40  ;;  %v1567_v54 = vrot.slane %v8223_v13, 4  ;;  %v1582_v22 = vsel %vm1051_vm2, %v1550_v2, %v1581_v51 }
 0x1d1   : > { %v1580_v33 = vsel %vm1051_vm2, %v1579_v4, %v1538_v34  ;;  %v1592_v15 = vsel %vm1051_vm2, %v1591_v25, %v1542_v8  ;;  %v8676_v52 = vperm.slane %v1164_v50, %v8145_v63  ;;  %v1557_v29 = vrot.slane %v8120_v46, 4 }
 0x1d2   : > { %v1569_v34 = vrot.slane %v8210_v3, 4  ;;  %v1211_v17 = vrot.slane %v8656_v18, 4  ;;  %v1166_v4 = vsel %vm1051_vm2, %v8109_v39, %v1165_v48  ;;  %v1768_v2 = vsel %vm1051_vm2, %v1767_v28, %v8074_v27 }
 0x1d3   : > { %7291 = vmatpush.xpose.msk.msra.mxu1 %vm463_vm1, %v8638_v12  ;;  %v1555_v8 = vrot.slane %v8274_v60, 4  ;;  %v8691_v40 = vperm.slane %v1580_v33, %v8285_v42  ;;  %v8694_v50 = vperm.slane %v1594_v19, %v8285_v42  ;;  %v1770_v51 = vsel %vm1051_vm2, %v8126_v49, %v1769_v10 }
 0x1d4   : > { %v1570_v58 = vsel %vm1051_vm2, %v8223_v13, %v1569_v34  ;;  %v8703_v27 = vperm.slane %v1582_v22, %v8285_v42  ;;  %v8706_v48 = vperm.slane %v1592_v15, %v8285_v42  ;;  %v1568_v33 = vsel %vm1051_vm2, %v1567_v54, %v8210_v3 }
 0x1d5   : > { %v8714_v49 = vperm.slane %v1166_v4, %v8145_v63  ;;  %v8717_v13 = vperm.slane %v1768_v2, %v8145_v63  ;;  %v1178_v10 = vsel %vm1051_vm2, %v8141_v62, %v1177_v30  ;;  %v1558_v22 = vsel %vm1051_vm2, %v8274_v60, %v1557_v29 }
 0x1d6   : > { %v8669_v26 = vpop.permute.xlu2 %980  ;;  %7292 = vmatmul.msk.f32.vlgmr.msra.gmra.mxu1 %vm463_vm1, %v8194_v45  ;;  %v8688_v25 = vpop.permute.xlu1 %7513  ;;  %v1212_v3 = vsel %vm1051_vm2, %v1211_v17, %v8676_v52  ;;  %v8726_v54 = vperm.slane %v1770_v51, %v8145_v63  ;;  %v8729_v15 = vperm.slane %v1570_v58, %v8145_v63  ;;  %v1556_v34 = vsel %vm1051_vm2, %v1555_v8, %v8120_v46 }
 0x1d7   : > { %7298 = vmatpush.xpose.msk.msra.mxu3 %vm463_vm1, %v8669_v26  ;;  %12295 = vst [vmem:[#allocation75_spill] sm:$0xff] %v8688_v25  ;;  %v8735_v62 = vperm.slane %v1568_v33, %v8145_v63  ;;  %v8741_v17 = vperm.slane %v1558_v22, %v8145_v63  ;;  %v8744_v58 = vunpack.i.h.bf16 %v8415_v56  ;;  %v8751_v2 = vperm.slane %v1212_v3, %v8285_v42 }
 0x1d8   : > { %12297 = vst [vmem:[#allocation77_spill] sm:$0xff] %v8714_v49  ;;  %v8754_v8 = vperm.slane %v1178_v10, %v8145_v63  ;;  %v8767_v22 = vsel %vm1051_vm2, %v8717_v13, %v1805_v47  ;;  %v1615_v3 = vrot.slane %v8729_v15, 4  ;;  %v5637_v10 = vrot.slane %v8491_v20, 4 }
 0x1d9   : > { %v8700_v39 = vpop.f32.mrf.mxu2  ;;  %12298 = vst [vmem:[#allocation78_spill] sm:$0xff] %v8726_v54  ;;  %v5625_v33 = vrot.slane %v8494_v35, 4  ;;  %v1603_v29 = vrot.slane %v8735_v62, 4  ;;  %v5603_v20 = vrot.slane %v8744_v58, 4 }
 0x1da   : > { %12296 = vst [vmem:[#allocation76_spill] sm:$0xff] %v8700_v39  ;;  %v2596_v28 = vsel %vm2571_vm3, %v8700_v39, -inf  ;;  %v8791_v35 = vsel %vm1051_vm2, %v1615_v3, %v8741_v17 }
 0x1db   : > { %2597 = vmax.xlane.f32.xlu0 %v2596_v28  ;;  %12299 = vst [vmem:[#allocation79_spill] sm:$0xff] %v8744_v58  ;;  %v8759_v28 = vperm.slane %v1556_v34, %v8145_v63  ;;  %v5626_v25 = vsel %vm1051_vm2, %v5625_v33, %v8465_v43  ;;  %v1655_v33 = vrot.slane %v8480_v36, 4 }
 0x1de   : > { %7293 = vmatmul.msk.f32.gmra.mxu1 %vm463_vm1, %v8215_v9  ;;  %v8748_v46 = vpop.permute.xlu0 %943  ;;  %v5638_v9 = vsel %vm1051_vm2, %v5637_v10, %v8454_v11 }
 0x1df   : > { %v8761_v56 = vpop.f32.mrf.mxu3  ;;  %7294 = vmatpush.xpose.msk.msra.mxu2 %vm463_vm1, %v8748_v46  ;;  %v5644_v10 = vperm.slane %v5638_v9, %v8285_v42  ;;  %v5648_v9 = vperm.slane %v8517_v41, %v8285_v42  ;;  %v1656_v41 = vsel %vm1051_vm2, %v1655_v33, %v8392_v38 }
 0x1e0   : > { %12300 = vst [vmem:[#allocation80_spill] sm:$0xff] %v8761_v56  ;;  %v8771_v19 = vpop.permute.xlu1 %7518  ;;  %v7524_v51 = vpop.permute.xlu2 %7523  ;;  %v2602_v34 = vsel %vm2571_vm3, %v8761_v56, -inf }
 0x1e1   : > { %12301 = vst [vmem:[#allocation81_spill] sm:$0xff] %v8771_v19  ;;  %v8778_v30 = vunpack.i.h.bf16 %v8771_v19  ;;  %v8780_v60 = vunpack.i.h.bf16 %v7524_v51  ;;  %v8782_v47 = vunpack.i.l.bf16 %v7524_v51  ;;  %2603 = vmax.xlane.f32.xlu2 %v2602_v34  ;;  %v8784_v4 = vpop.f32.mrf.mxu2  ;;  %v1604_v34 = vsel %vm1051_vm2, %v1603_v29, %v8759_v28 }
 0x1e2   : > { %12305 = vst [vmem:[#allocation85_spill] sm:$0xff] %v8784_v4  ;;  %v2599_v39 = vsel %vm2571_vm3, %v8784_v4, -inf  ;;  %v1605_v4 = vrot.slane %v8759_v28, 4  ;;  %v8821_v43 = vperm.slane %v1604_v34, %v8285_v42 }
 0x1e3   : > { %12302 = vst [vmem:[#allocation82_spill] sm:$0xff] %v8778_v30  ;;  %v5615_v19 = vrot.slane %v8778_v30, 4  ;;  %v5613_v56 = vrot.slane %v8780_v60, 4  ;;  %v5601_v51 = vrot.slane %v8782_v47, 4  ;;  %2600 = vmax.xlane.f32.xlu1 %v2599_v39  ;;  %7295 = vmatpush.xpose.msk.msra.mxu2 %vm463_vm1, %v8605_v37  ;;  %v5604_v3 = vsel %vm1051_vm2, %v8782_v47, %v5603_v20 }
 0x1e4   : > { %12303 = vst [vmem:[#allocation83_spill] sm:$0xff] %v8780_v60  ;;  %v5612_v28 = vperm.slane %v5604_v3, %v8145_v63 }
 0x1e5   : > { %12304 = vst [vmem:[#allocation84_spill] sm:$0xff] %v8782_v47  ;;  %v5614_v39 = vsel %vm1051_vm2, %v5613_v56, %v8778_v30  ;;  %v5616_v16 = vsel %vm1051_vm2, %v8780_v60, %v5615_v19  ;;  %v5602_v29 = vsel %vm1051_vm2, %v5601_v51, %v8744_v58  ;;  %v12306_v47 = vld [vmem:[#allocation22_spill] sm:$0xff]  ;;  %v5632_v56 = vperm.slane %v5626_v25, %v8285_v42 }
 0x1e6   : > { %v5620_v24 = vperm.slane %v5614_v39, %v8145_v63  ;;  %v5624_v20 = vperm.slane %v5616_v16, %v8145_v63  ;;  %7296 = vmatmul.msk.f32.vlgmr.msra.gmra.mxu2 %vm463_vm1, %v12306_v47  ;;  %v5608_v11 = vperm.slane %v5602_v29, %v8145_v63  ;;  %v5663_v19 = vrot.slane %v5612_v28, 4 }
 0x1e7   : > { %v5636_v29 = vperm.slane %v8513_v7, %v8285_v42  ;;  %v5561_v25 = vrot.slane %v8306_v53, 4  ;;  %v1643_v58 = vrot.slane %v8386_v5, 4  ;;  %v5675_v31 = vrot.slane %v5632_v56, 4 }
 0x1e8   : > { %v5661_v51 = vrot.slane %v5624_v20, 4  ;;  %v8826_v3 = vpop.f32.mrf.mxu3  ;;  %v8828_v39 = vpop.permute.xlu1 %978  ;;  %v5649_v16 = vrot.slane %v5620_v24, 4  ;;  %v5651_v60 = vrot.slane %v5608_v11, 4  ;;  %v5664_v30 = vsel %vm1051_vm2, %v5624_v20, %v5663_v19  ;;  %v12308_v20 = vld [vmem:[#allocation30_spill] sm:$0xff] }
 0x1e9   : > { %12307 = vst [vmem:[#allocation22_spill] sm:$0xff] %v8826_v3  ;;  %7299 = vmatpush.xpose.msk.msra.mxu3 %vm463_vm1, %v8828_v39  ;;  %v2605_v34 = vsel %vm2571_vm3, %v8826_v3, -inf  ;;  %v5679_v19 = vrot.slane %v5636_v29, 4 }
 0x1ea   : > { %2606 = vmax.xlane.f32.xlu0 %v2605_v34  ;;  %v5650_v23 = vsel %vm1051_vm2, %v5649_v16, %v5608_v11  ;;  %v5662_v7 = vsel %vm1051_vm2, %v5661_v51, %v5612_v28  ;;  %v5652_v6 = vsel %vm1051_vm2, %v5620_v24, %v5651_v60  ;;  %v5672_v11 = vperm.slane %v5664_v30, %v8285_v42  ;;  %v12310_v60 = vld [vmem:[#allocation28_spill] sm:$0xff] }
 0x1eb   : > { %v5656_v32 = vperm.slane %v5650_v23, %v8285_v42  ;;  %v5668_v3 = vperm.slane %v5662_v7, %v8285_v42  ;;  %v5660_v53 = vperm.slane %v5652_v6, %v8285_v42  ;;  %v5683_v16 = vrot.slane %v5644_v10, 4 }
 0x1ec   : > { %7300 = vmatmul.msk.f32.vlgmr.msra.gmra.mxu3 %vm463_vm1, %v12308_v20  ;;  %v5687_v23 = vrot.slane %v5648_v9, 4  ;;  %v5685_v33 = vrot.slane %v5672_v11, 4  ;;  %v1667_v30 = vrot.slane %v8828_v39, 4 }
 0x1ed   : > { %v5673_v28 = vrot.slane %v5656_v32, 4  ;;  %v5677_v51 = vrot.slane %v5660_v53, 4  ;;  %v8853_v24 = vsel %vm1051_vm2, %v5656_v32, %v5675_v31  ;;  %v5681_v6 = vrot.slane %v5668_v3, 4 }
 0x1ee   : > { %12309 = vst [vmem:[#allocation30_spill] sm:$0xff] %v8853_v24  ;;  %7297 = vmatmul.msk.f32.gmra.mxu2 %vm463_vm1, %v12310_v60  ;;  %v8858_v34 = vsel %vm1051_vm2, %v5660_v53, %v5679_v19  ;;  %v8861_v7 = vsel %vm1051_vm2, %v5668_v3, %v5683_v16  ;;  %v8869_v32 = vsel %vm1051_vm2, %v5672_v11, %v5687_v23  ;;  %v12315_v53 = vld [vmem:[#allocation36_spill] sm:$0xff]  ;;  %v12318_v11 = vld [vmem:[#allocation33_spill] sm:$0xff]  ;;  %v1891_v60 = vrot.slane %v8669_v26, 4 }
 0x1ef   : > { %12311 = vst [vmem:[#allocation86_spill] sm:$0xff] %v8858_v34  ;;  %v5674_v54 = vsel %vm1051_vm2, %v5673_v28, %v5632_v56  ;;  %v8866_v49 = vsel %vm1051_vm2, %v5677_v51, %v5636_v29  ;;  %v8872_v31 = vperm.slane %v1656_v41, %v8145_v63  ;;  %v5569_v19 = vrot.slane %v12315_v53, 4  ;;  %v12317_v28 = vld [vmem:[#allocation29_spill] sm:$0xff]  ;;  %v12325_v29 = vld [vmem:[#allocation43_spill] sm:$0xff] }
 0x1f0   : > { %12312 = vst [vmem:[#allocation87_spill] sm:$0xff] %v8861_v7  ;;  %5933 = vmatpush.msrb.mxu0 %v5674_v54  ;;  %v1606_v3 = vsel %vm1051_vm2, %v8735_v62, %v1605_v4  ;;  %v8878_v16 = vsel %vm1051_vm2, %v5685_v33, %v5648_v9  ;;  %v1779_v51 = vrot.slane %v12317_v28, 4  ;;  %v5562_v23 = vsel %vm1051_vm2, %v5561_v25, %v12318_v11  ;;  %v12319_v62 = vld [vmem:[#allocation45_spill] sm:$0xff] }
 0x1f1   : > { %12313 = vst [vmem:[#allocation88_spill] sm:$0xff] %v8866_v49  ;;  %v1657_v54 = vrot.slane %v8392_v38, 4  ;;  %v5682_v53 = vsel %vm1051_vm2, %v5681_v6, %v5644_v10  ;;  %v8890_v4 = vperm.slane %v8791_v35, %v8285_v42  ;;  %v1644_v9 = vsel %vm1051_vm2, %v1643_v58, %v12319_v62  ;;  %v12322_v6 = vld [vmem:[#allocation35_spill] sm:$0xff] }
 0x1f2   : > { %12314 = vst [vmem:[#allocation89_spill] sm:$0xff] %v8869_v32  ;;  %5934 = vmatpush.msrb.mxu0 %v5562_v23  ;;  %v1668_v33 = vsel %vm1051_vm2, %v1667_v30, %v8638_v12  ;;  %v12321_v25 = vrot.slane %v8691_v40, 4  ;;  %v8905_v10 = vperm.slane %v1606_v3, %v8285_v42  ;;  %v1691_v58 = vrot.slane %v8872_v31, 4  ;;  %v12323_v30 = vld [vmem:[#allocation34_spill] sm:$0xff] }
 0x1f3   : > { %12316 = vst [vmem:[#allocation36_spill] sm:$0xff] %v8878_v16  ;;  %v8896_v56 = vpop.f32.mrf.mxu1  ;;  %v1658_v35 = vsel %vm1051_vm2, %v8480_v36, %v1657_v54  ;;  %v5570_v11 = vsel %vm1051_vm2, %v5569_v19, %v12323_v30  ;;  %v1199_v3 = vrot.slane %v12325_v29, 4  ;;  %v1681_v41 = vrot.slane %v8605_v37, 4 }
 0x1f4   : > { %12320 = vst [vmem:[#allocation33_spill] sm:$0xff] %v8896_v56  ;;  %6049 = vmatpush.msra.mxu0 %v5682_v53  ;;  %v8902_v38 = vsel %vm1051_vm2, %v8821_v43, %v12321_v25  ;;  %7301 = vmatmul.msk.f32.gmra.mxu3 %vm463_vm1, %v12322_v6  ;;  %v2608_v23 = vsel %vm2571_vm3, %v8896_v56, -inf  ;;  %v12324_v53 = vld [vmem:[#allocation19_spill] sm:$0xff]  ;;  %v1669_v36 = vrot.slane %v8638_v12, 4  ;;  %v1645_v54 = vrot.slane %v12319_v62, 4 }
 0x1f5   : > { %v1780_v25 = vsel %vm1051_vm2, %v1779_v51, %v12324_v53  ;;  %2609 = vmax.xlane.f32.xlu1 %v2608_v23  ;;  %v1650_v32 = vperm.slane %v1644_v9, %v8145_v63  ;;  %v1674_v19 = vperm.slane %v1668_v33, %v8145_v63  ;;  %v1627_v7 = vrot.slane %v8821_v43, 4  ;;  %v12326_v43 = vld [vmem:[#allocation39_spill] sm:$0xff] }
 0x1f6   : > { %6050 = vmatpush.msra.mxu0 %v5570_v11  ;;  %v1016_v30 = vpop.permute.xlu0 %1015  ;;  %v1666_v16 = vperm.slane %v1658_v35, %v8145_v63  ;;  %v1670_v51 = vsel %vm1051_vm2, %v8828_v39, %v1669_v36  ;;  %v1646_v12 = vsel %vm1051_vm2, %v8386_v5, %v1645_v54  ;;  %v1187_v11 = vrot.slane %v12308_v20, 4 }
 0x1f7   : > { %v1679_v34 = vrot.slane %v1016_v30, 4  ;;  %v1682_v24 = vsel %vm1051_vm2, %v1016_v30, %v1681_v41  ;;  %v1692_v9 = vsel %vm1051_vm2, %v1691_v58, %v1650_v32  ;;  %v1791_v23 = vrot.slane %v12326_v43, 4 }
 0x1f8   : > { %v1690_v62 = vperm.slane %v1682_v24, %v8145_v63  ;;  %v1200_v39 = vsel %vm1051_vm2, %v1199_v3, %v12306_v47  ;;  %v1678_v41 = vperm.slane %v1670_v51, %v8145_v63  ;;  %v1717_v36 = vrot.slane %v1674_v19, 4 }
 0x1f9   : > { %v1680_v35 = vsel %vm1051_vm2, %v1679_v34, %v8605_v37  ;;  %v1654_v58 = vperm.slane %v1646_v12, %v8145_v63  ;;  %v1693_v54 = vrot.slane %v1650_v32, 4  ;;  %v1703_v33 = vrot.slane %v1666_v16, 4 }
 0x1fa   : > { %v1686_v5 = vperm.slane %v1680_v35, %v8145_v63  ;;  %v1727_v24 = vrot.slane %v1690_v62, 4  ;;  %v1698_v56 = vperm.slane %v1692_v9, %v8285_v42  ;;  %v8951_v51 = vperm.slane %v1780_v25, %v8145_v63 }
 0x1fb   : > { %v8943_v49 = vpop.f32.mrf.mxu1  ;;  %v1628_v32 = vsel %vm1051_vm2, %v1627_v7, %v8691_v40  ;;  %v1188_v9 = vsel %vm1051_vm2, %v1187_v11, %v8194_v45  ;;  %v8965_v25 = vperm.slane %v1200_v39, %v8145_v63 }
 0x1fc   : > { %12327 = vst [vmem:[#allocation45_spill] sm:$0xff] %v8943_v49  ;;  %v1715_v6 = vrot.slane %v1686_v5, 4  ;;  %v2611_v37 = vsel %vm2571_vm3, %v8943_v49, -inf  ;;  %v1718_v34 = vsel %vm1051_vm2, %v1686_v5, %v1717_v36  ;;  %v1728_v3 = vsel %vm1051_vm2, %v1727_v24, %v1678_v41 }
 0x1fd   : > { %2612 = vmax.xlane.f32.xlu2 %v2611_v37  ;;  %v1726_v12 = vperm.slane %v1718_v34, %v8285_v42  ;;  %v1694_v36 = vsel %vm1051_vm2, %v8872_v31, %v1693_v54  ;;  %v1734_v5 = vperm.slane %v1728_v3, %v8285_v42  ;;  %v1741_v7 = vrot.slane %v1698_v56, 4 }
 0x1fe   : > { %v8958_v35 = vpop.permute.xlu1 %1017  ;;  %v1716_v49 = vsel %vm1051_vm2, %v1715_v6, %v1674_v19  ;;  %v1792_v6 = vsel %vm1051_vm2, %v1791_v23, %v8147_v1  ;;  %v1705_v19 = vrot.slane %v1654_v58, 4  ;;  %v1729_v37 = vrot.slane %v1678_v41, 4 }
 0x1ff   : > { %v1903_v24 = vrot.slane %v8958_v35, 4  ;;  %7302 = vmatpush.xpose.msk.msrb.mxu1 %vm463_vm1, %v8958_v35  ;;  %v1722_v40 = vperm.slane %v1716_v49, %v8285_v42  ;;  %v1743_v11 = vrot.slane %v1726_v12, 4  ;;  %v1704_v31 = vsel %vm1051_vm2, %v1703_v33, %v1654_v58 }
 0x200   : > { %v1702_v3 = vperm.slane %v1694_v36, %v8285_v42  ;;  %v1747_v49 = vrot.slane %v1734_v5, 4  ;;  %v1730_v28 = vsel %vm1051_vm2, %v1690_v62, %v1729_v37  ;;  %v1235_v23 = vrot.slane %v8965_v25, 4  ;;  %v12329_v62 = vld [vmem:[#allocation50_spill] sm:$0xff] }
 0x201   : > { %v1904_v39 = vsel %vm1051_vm2, %v1903_v24, %v8748_v46  ;;  %v1742_v54 = vsel %vm1051_vm2, %v1722_v40, %v1741_v7  ;;  %v1739_v34 = vrot.slane %v1722_v40, 4  ;;  %v1706_v41 = vsel %vm1051_vm2, %v1666_v16, %v1705_v19 }
 0x202   : > { %7310 = vmatpush.xpose.msk.msrb.mxu3 %vm463_vm1, %v1742_v54  ;;  %v1744_v58 = vsel %vm1051_vm2, %v1743_v11, %v1702_v3  ;;  %v1710_v24 = vperm.slane %v1704_v31, %v8285_v42  ;;  %v8988_v36 = vperm.slane %v1792_v6, %v8145_v63  ;;  %v8991_v40 = vperm.slane %v1904_v39, %v8145_v63  ;;  %v12330_v11 = vld [vmem:[#allocation54_spill] sm:$0xff] }
 0x203   : > { %7303 = vmatpush.xpose.msk.msrb.mxu1 %vm463_vm1, %v1016_v30  ;;  %v1740_v33 = vsel %vm1051_vm2, %v1739_v34, %v1698_v56  ;;  %v1635_v16 = vrot.slane %v8890_v4, 4  ;;  %v12328_v30 = vrot.slane %v8741_v17, 4  ;;  %v1879_v7 = vrot.slane %v12329_v62, 4 }
 0x204   : > { %7306 = vmatpush.xpose.msk.msrb.mxu2 %vm463_vm1, %v1740_v33  ;;  %v1867_v19 = vrot.slane %v12330_v11, 4  ;;  %v1738_v6 = vperm.slane %v1730_v28, %v8285_v42  ;;  %v9004_v37 = vperm.slane %v1188_v9, %v8145_v63  ;;  %v1892_v31 = vsel %vm1051_vm2, %v1891_v60, %v8607_v14 }
 0x205   : > { %v1618_v56 = vsel %vm1051_vm2, %v8729_v15, %v12328_v30  ;;  %v1748_v15 = vsel %vm1051_vm2, %v1747_v49, %v1710_v24  ;;  %v1745_v17 = vrot.slane %v1702_v3, 4  ;;  %v1714_v39 = vperm.slane %v1706_v41, %v8285_v42 }
 0x206   : > { %7304 = vmatmul.msk.f32.vlgmr.msrb.gmra.mxu1 %vm463_vm1, %v12325_v29  ;;  %7311 = vmatpush.xpose.msk.msrb.mxu3 %vm463_vm1, %v8902_v38  ;;  %v12331_v28 = vrot.slane %v8905_v10, 4  ;;  %v1749_v54 = vrot.slane %v1710_v24, 4  ;;  %v1626_v60 = vperm.slane %v1618_v56, %v8285_v42  ;;  %v1236_v34 = vsel %vm1051_vm2, %v1235_v23, %v9004_v37 }
 0x207   : > { %7314 = vmatpush.xpose.msk.msra.mxu1 %vm463_vm1, %v1744_v58  ;;  %v1827_v38 = vrot.slane %v8988_v36, 4  ;;  %v12332_v49 = vrot.slane %v12306_v47, 4  ;;  %v1939_v41 = vrot.slane %v8991_v40, 4  ;;  %v1746_v33 = vsel %vm1051_vm2, %v1726_v12, %v1745_v17  ;;  %v12333_v58 = vld [vmem:[#allocation49_spill] sm:$0xff] }
 0x208   : > { %v1632_v9 = vsel %vm1051_vm2, %v12331_v28, %v8703_v27  ;;  %7307 = vmatpush.xpose.msk.msrb.mxu2 %vm463_vm1, %v1628_v32  ;;  %v1880_v24 = vsel %vm1051_vm2, %v1879_v7, %v12333_v58  ;;  %v1898_v23 = vperm.slane %v1892_v31, %v8145_v63  ;;  %v1750_v47 = vsel %vm1051_vm2, %v1734_v5, %v1749_v54  ;;  %v12335_v32 = vld [vmem:[#allocation32_spill] sm:$0xff] }
 0x209   : > { %v1202_v3 = vsel %vm1051_vm2, %v12325_v29, %v12332_v49  ;;  %v9034_v30 = vpop.f32.mrf.mxu2  ;;  %7312 = vmatmul.msk.f32.vlgmr.msrb.gmra.mxu3 %vm463_vm1, %v8632_v61  ;;  %v1751_v29 = vrot.slane %v1738_v6, 4  ;;  %v1868_v56 = vsel %vm1051_vm2, %v1867_v19, %v12335_v32  ;;  %v1753_v7 = vrot.slane %v1714_v39, 4 }
 0x20a   : > { %7322 = vmatpush.xpose.msk.msra.mxu3 %vm463_vm1, %v1748_v15  ;;  %12334 = vst [vmem:[#allocation34_spill] sm:$0xff] %v9034_v30  ;;  %v2614_v12 = vsel %vm2571_vm3, %v9034_v30, -inf  ;;  %v1242_v31 = vperm.slane %v1236_v34, %v8285_v42  ;;  %v1636_v61 = vsel %vm1051_vm2, %v1635_v16, %v8706_v48  ;;  %v12336_v5 = vrot.slane %v8703_v27, 4 }
 0x20b   : > { %7315 = vmatpush.xpose.msk.msra.mxu1 %vm463_vm1, %v1632_v9  ;;  %2615 = vmax.xlane.f32.xlu0 %v2614_v12  ;;  %v12337_v15 = vrot.slane %v8706_v48, 4  ;;  %v1639_v28 = vrot.slane %v1626_v60, 4  ;;  %v9059_v9 = vperm.slane %v1202_v3, %v8145_v63  ;;  %v1886_v54 = vperm.slane %v1880_v24, %v8145_v63  ;;  %v12339_v24 = vld [vmem:[#allocation46_spill] sm:$0xff] }
 0x20c   : > { %7318 = vmatpush.xpose.msk.msra.mxu2 %vm463_vm1, %v1746_v33  ;;  %v1634_v19 = vsel %vm1051_vm2, %v8905_v10, %v12336_v5  ;;  %v1940_v27 = vsel %vm1051_vm2, %v1939_v41, %v1898_v23  ;;  %v1874_v16 = vperm.slane %v1868_v56, %v8145_v63  ;;  %v1941_v10 = vrot.slane %v1898_v23, 4 }
 0x20d   : > { %7308 = vmatmul.msk.f32.vlgmr.msrb.gmra.mxu2 %vm463_vm1, %v8641_v57  ;;  %v1638_v17 = vsel %vm1051_vm2, %v8890_v4, %v12337_v15  ;;  %v1754_v57 = vsel %vm1051_vm2, %v1738_v6, %v1753_v7  ;;  %v9067_v48 = vpop.f32.mrf.mxu3  ;;  %v1752_v4 = vsel %vm1051_vm2, %v1751_v29, %v1714_v39  ;;  %v1828_v34 = vsel %vm1051_vm2, %v1827_v38, %v8951_v51 }
 0x20e   : > { %7323 = vmatpush.xpose.msk.msra.mxu3 %vm463_vm1, %v1636_v61  ;;  %v1829_v49 = vrot.slane %v8951_v51, 4  ;;  %v12338_v6 = vrot.slane %v8194_v45, 4  ;;  %v2620_v41 = vsel %vm2571_vm3, %v9067_v48, -inf  ;;  %v1259_v33 = vrot.slane %v1242_v31, 4  ;;  %7305 = vmatmul.msk.f32.gmra.mxu1 %vm463_vm1, %v12339_v24 }
 0x20f   : > { %7326 = vmatpush.xpose.msk.msrb.mxu1 %vm463_vm1, %v1750_v47  ;;  %2621 = vmax.xlane.f32.xlu2 %v2620_v41  ;;  %v12340_v39 = vrot.slane %v8694_v50, 4  ;;  %v9088_v45 = vperm.slane %v1940_v27, %v8285_v42  ;;  %v1237_v38 = vrot.slane %v9004_v37, 4  ;;  %v1915_v23 = vrot.slane %v1886_v54, 4 }
 0x210   : > { %7319 = vmatpush.xpose.msk.msra.mxu2 %vm463_vm1, %v1634_v19  ;;  %v1190_v3 = vsel %vm1051_vm2, %v12308_v20, %v12338_v6  ;;  %v1942_v20 = vsel %vm1051_vm2, %v8991_v40, %v1941_v10  ;;  %v1640_v47 = vsel %vm1051_vm2, %v1639_v28, %v8694_v50  ;;  %v9096_v29 = vperm.slane %v1828_v34, %v8285_v42 }
 0x211   : > { %v1642_v51 = vsel %vm1051_vm2, %v1626_v60, %v12340_v39  ;;  %v1830_v56 = vsel %vm1051_vm2, %v8988_v36, %v1829_v49  ;;  %v1917_v12 = vrot.slane %v1874_v16, 4  ;;  %v9101_v60 = vpop.f32.mrf.mxu2  ;;  %v12342_v7 = vrot.slane %v8751_v2, 4 }
 0x212   : > { %7334 = vmatpush.xpose.msk.msrb.mxu3 %vm463_vm1, %v1754_v57  ;;  %12341 = vst [vmem:[#allocation19_spill] sm:$0xff] %v9101_v60  ;;  %v1238_v37 = vsel %vm1051_vm2, %v8965_v25, %v1237_v38  ;;  %v1247_v50 = vrot.slane %v9059_v9, 4  ;;  %v2617_v36 = vsel %vm2571_vm3, %v9101_v60, -inf  ;;  %v1260_v61 = vsel %vm1051_vm2, %v1259_v33, %v8751_v2 }
 0x213   : > { %7327 = vmatpush.xpose.msk.msrb.mxu1 %vm463_vm1, %v1638_v17  ;;  %v1262_v40 = vsel %vm1051_vm2, %v1242_v31, %v12342_v7  ;;  %v1916_v5 = vsel %vm1051_vm2, %v1915_v23, %v1874_v16  ;;  %v9117_v19 = vperm.slane %v1942_v20, %v8285_v42  ;;  %v1905_v31 = vrot.slane %v8748_v46, 4  ;;  %2618 = vmax.xlane.f32.xlu1 %v2617_v36  ;;  %v12346_v7 = vld [vmem:[#allocation77_spill] sm:$0xff]  ;;  %v12347_v36 = vld [vmem:[#allocation78_spill] sm:$0xff] }
 0x214   : > { %7330 = vmatpush.xpose.msk.msrb.mxu2 %vm463_vm1, %v1752_v4  ;;  %7313 = vmatmul.msk.f32.gmra.mxu3 %vm463_vm1, %v1262_v40  ;;  %v1963_v25 = vrot.slane %v9088_v45, 4  ;;  %v9124_v15 = vperm.slane %v8767_v22, %v8285_v42  ;;  %v1223_v17 = vrot.slane %v8754_v8, 4  ;;  %v12343_v2 = vrot.slane %v8717_v13, 4 }
 0x215   : > { %7309 = vmatmul.msk.f32.gmra.mxu2 %vm463_vm1, %v1260_v61  ;;  %v1851_v57 = vrot.slane %v9096_v29, 4  ;;  %v9133_v46 = vperm.slane %v1830_v56, %v8285_v42  ;;  %v9136_v27 = vperm.slane %v1190_v3, %v8145_v63  ;;  %v1906_v16 = vsel %vm1051_vm2, %v8958_v35, %v1905_v31  ;;  %v9140_v22 = vpop.f32.mrf.mxu3 }
 0x216   : > { %7335 = vmatpush.xpose.msk.msrb.mxu3 %vm463_vm1, %v1642_v51  ;;  %v1804_v28 = vsel %vm1051_vm2, %v12343_v2, %v8623_v44  ;;  %v1922_v10 = vperm.slane %v1916_v5, %v8285_v42  ;;  %v1918_v4 = vsel %vm1051_vm2, %v1886_v54, %v1917_v12  ;;  %v9145_v13 = vperm.slane %v1238_v37, %v8285_v42  ;;  %v12348_v2 = vld [vmem:[#allocation29_spill] sm:$0xff] }
 0x217   : > { %v1881_v44 = vrot.slane %v12333_v58, 4  ;;  %v2623_v34 = vsel %vm2571_vm3, %v9140_v22, -inf  ;;  %v1967_v49 = vrot.slane %v9117_v19, 4  ;;  %v1248_v6 = vsel %vm1051_vm2, %v1247_v50, %v9136_v27  ;;  %7316 = vmatmul.msk.f32.vlgmr.msra.gmra.mxu1 %vm463_vm1, %v8636_v21 }
 0x218   : > { %7331 = vmatpush.xpose.msk.msrb.mxu2 %vm463_vm1, %v1640_v47  ;;  %v1869_v35 = vrot.slane %v12335_v32, 4  ;;  %v1964_v54 = vsel %vm1051_vm2, %v1963_v25, %v1922_v10  ;;  %2624 = vmax.xlane.f32.xlu0 %v2623_v34  ;;  %v1810_v3 = vperm.slane %v1804_v28, %v8285_v42  ;;  %v12344_v58 = vrot.slane %v8676_v52, 4 }
 0x219   : > { %v12345_v33 = vrot.slane %v8147_v1, 4  ;;  %v1882_v32 = vsel %vm1051_vm2, %v12329_v62, %v1881_v44  ;;  %v9169_v21 = vperm.slane %v1906_v16, %v8145_v63  ;;  %7338 = vmatpush.xpose.msk.msra.mxu1 %vm463_vm1, %v1964_v54  ;;  %v9173_v51 = vperm.slane %v1918_v4, %v8285_v42  ;;  %v12349_v16 = vld [vmem:[#allocation74_spill] sm:$0xff]  ;;  %v12351_v54 = vld [vmem:[#allocation67_spill] sm:$0xff] }
 0x21a   : > { %v1214_v41 = vsel %vm1051_vm2, %v8656_v18, %v12344_v58  ;;  %v1893_v52 = vrot.slane %v8607_v14, 4  ;;  %v1965_v20 = vrot.slane %v1922_v10, 4  ;;  %v1855_v18 = vrot.slane %v9133_v46, 4 }
 0x21b   : > { %v1794_v39 = vsel %vm1051_vm2, %v12326_v43, %v12345_v33  ;;  %v9178_v1 = vperm.slane %v1248_v6, %v8285_v42  ;;  %v1870_v43 = vsel %vm1051_vm2, %v12330_v11, %v1869_v35  ;;  %v1968_v62 = vsel %vm1051_vm2, %v1967_v49, %v9173_v51  ;;  %v12350_v49 = vld [vmem:[#allocation68_spill] sm:$0xff] }
 0x21c   : > { %7324 = vmatmul.msk.f32.vlgmr.msra.gmra.mxu3 %vm463_vm1, %v8645_v59  ;;  %v1852_v38 = vsel %vm1051_vm2, %v1851_v57, %v1810_v3  ;;  %v1263_v23 = vrot.slane %v9145_v13, 4  ;;  %v9189_v14 = vperm.slane %v1882_v32, %v8145_v63  ;;  %v1894_v47 = vsel %vm1051_vm2, %v8669_v26, %v1893_v52  ;;  %v12352_v33 = vld [vmem:[#allocation72_spill] sm:$0xff] }
 0x21d   : > { %7346 = vmatpush.xpose.msk.msra.mxu3 %vm463_vm1, %v1968_v62  ;;  %7320 = vmatmul.msk.f32.vlgmr.msra.gmra.mxu2 %vm463_vm1, %v8628_v0  ;;  %v1966_v59 = vsel %vm1051_vm2, %v9088_v45, %v1965_v20  ;;  %v1323_v11 = vrot.slane %v8588_v55, 4  ;;  %v9200_v56 = vperm.slane %v1794_v39, %v8145_v63  ;;  %v1951_v12 = vrot.slane %v9169_v21, 4  ;;  %v12353_v20 = vld [vmem:[#allocation63_spill] sm:$0xff] }
 0x21e   : > { %7339 = vmatpush.xpose.msk.msra.mxu1 %vm463_vm1, %v1852_v38  ;;  %7342 = vmatpush.xpose.msk.msra.mxu2 %vm463_vm1, %v1966_v59  ;;  %v1222_v26 = vperm.slane %v1214_v41, %v8285_v42  ;;  %v1224_v40 = vsel %vm1051_vm2, %v1223_v17, %v12346_v7  ;;  %v1781_v0 = vrot.slane %v12324_v53, 4  ;;  %v9210_v45 = vperm.slane %v1870_v43, %v8145_v63  ;;  %v12354_v43 = vld [vmem:[#allocation73_spill] sm:$0xff]  ;;  %v12355_v38 = vld [vmem:[#allocation70_spill] sm:$0xff] }
 0x21f   : > { %v1853_v37 = vrot.slane %v1810_v3, 4  ;;  %v1267_v50 = vrot.slane %v9178_v1, 4  ;;  %v1815_v61 = vrot.slane %v12347_v36, 4  ;;  %v9215_v5 = vperm.slane %v1894_v47, %v8145_v63 }
 0x220   : > { %v1856_v31 = vsel %vm1051_vm2, %v1855_v18, %v9124_v15  ;;  %v1264_v25 = vsel %vm1051_vm2, %v1263_v23, %v1222_v26  ;;  %v1782_v17 = vsel %vm1051_vm2, %v12348_v2, %v1781_v0  ;;  %v1927_v53 = vrot.slane %v9189_v14, 4  ;;  %v12357_v0 = vld [vmem:[#allocation64_spill] sm:$0xff] }
 0x221   : > { %7347 = vmatpush.xpose.msk.msra.mxu3 %vm463_vm1, %v1856_v31  ;;  %7317 = vmatmul.msk.f32.gmra.mxu1 %vm463_vm1, %v1264_v25  ;;  %v1854_v28 = vsel %vm1051_vm2, %v9096_v29, %v1853_v37  ;;  %v9228_v57 = vperm.slane %v1224_v40, %v8285_v42  ;;  %v9232_v10 = vperm.slane %v12349_v16, %v8145_v63  ;;  %v1839_v4 = vrot.slane %v9200_v56, 4  ;;  %v12359_v31 = vld [vmem:[#allocation69_spill] sm:$0xff] }
 0x222   : > { %7343 = vmatpush.xpose.msk.msra.mxu2 %vm463_vm1, %v1854_v28  ;;  %v1265_v44 = vrot.slane %v1222_v26, 4  ;;  %v1952_v34 = vsel %vm1051_vm2, %v1951_v12, %v9215_v5  ;;  %v9240_v6 = vperm.slane %v12350_v49, %v8145_v63  ;;  %v1928_v29 = vsel %vm1051_vm2, %v1927_v53, %v9210_v45 }
 0x223   : > { %v1268_v35 = vsel %vm1051_vm2, %v1267_v50, %v9228_v57  ;;  %v1157_v3 = vrot.slane %v12351_v54, 4  ;;  %v9248_v58 = vperm.slane %v1782_v17, %v8145_v63  ;;  %v1159_v39 = vrot.slane %v12352_v33, 4 }
 0x224   : > { %7325 = vmatmul.msk.f32.gmra.mxu3 %vm463_vm1, %v1268_v35  ;;  %v1266_v41 = vsel %vm1051_vm2, %v9145_v13, %v1265_v44  ;;  %v1816_v32 = vsel %vm1051_vm2, %v1815_v61, %v9232_v10  ;;  %v1958_v52 = vperm.slane %v1952_v34, %v8285_v42  ;;  %v9260_v18 = vsel %vm1051_vm2, %v1323_v11, %v12353_v20  ;;  %v12360_v44 = vld [vmem:[#allocation28_spill] sm:$0xff] }
 0x225   : > { %7321 = vmatmul.msk.f32.gmra.mxu2 %vm463_vm1, %v1266_v41  ;;  %v1347_v62 = vrot.slane %v12354_v43, 4  ;;  %v1349_v23 = vrot.slane %v12355_v38, 4  ;;  %v1423_v47 = vrot.slane %v12339_v24, 4  ;;  %v1934_v13 = vperm.slane %v1928_v29, %v8285_v42  ;;  %v9269_v26 = vpop.f32.mrf.mxu1  ;;  %v12362_v29 = vld [vmem:[#allocation35_spill] sm:$0xff] }
 0x226   : > { %v1840_v59 = vsel %vm1051_vm2, %v1839_v4, %v9248_v58  ;;  %v1225_v12 = vrot.slane %v12346_v7, 4  ;;  %12356 = vst [vmem:[#allocation43_spill] sm:$0xff] %v9269_v26  ;;  %v1969_v40 = vrot.slane %v9173_v51, 4  ;;  %v12358_v11 = vrot.slane %v12357_v0, 4 }
 0x227   : > { %v1822_v50 = vperm.slane %v1816_v32, %v8285_v42  ;;  %v1249_v61 = vrot.slane %v9136_v27, 4  ;;  %v1158_v25 = vsel %vm1051_vm2, %v12359_v31, %v1157_v3  ;;  %v2626_v2 = vsel %vm2571_vm3, %v9269_v26, -inf }
 0x228   : > { %v1162_v37 = vsel %vm1051_vm2, %v12352_v33, %v12358_v11  ;;  %v1160_v7 = vsel %vm1051_vm2, %v1159_v39, %v12357_v0  ;;  %v1226_v51 = vsel %vm1051_vm2, %v8754_v8, %v1225_v12  ;;  %v1970_v17 = vsel %vm1051_vm2, %v9117_v19, %v1969_v40  ;;  %2627 = vmax.xlane.f32.xlu1 %v2626_v2  ;;  %v12361_v19 = vld [vmem:[#allocation18_spill] sm:$0xff]  ;;  %v12366_v0 = vld [vmem:[#allocation21_spill] sm:$0xff] }
 0x229   : > { %7328 = vmatmul.msk.f32.vlgmr.msrb.gmra.mxu1 %vm463_vm1, %v1158_v25  ;;  %v1971_v53 = vrot.slane %v1958_v52, 4  ;;  %v1846_v27 = vperm.slane %v1840_v59, %v8285_v42  ;;  %v1250_v28 = vsel %vm1051_vm2, %v9059_v9, %v1249_v61  ;;  %v1973_v16 = vrot.slane %v1934_v13, 4  ;;  %v12365_v12 = vld [vmem:[#allocation10_spill] sm:$0xff] }
 0x22a   : > { %7350 = vmatpush.xpose.msk.msrb.mxu1 %vm463_vm1, %v1970_v17  ;;  %v1348_v4 = vsel %vm1051_vm2, %v1347_v62, %v12355_v38  ;;  %v1350_v8 = vsel %vm1051_vm2, %v12354_v43, %v1349_v23  ;;  %v1424_v34 = vsel %vm1051_vm2, %v1423_v47, %v12360_v44  ;;  %v1399_v49 = vrot.slane %v12361_v19, 4  ;;  %v12363_v62 = vld [vmem:[#allocation12_spill] sm:$0xff] }
 0x22b   : > { %v1411_v35 = vrot.slane %v12362_v29, 4  ;;  %v1857_v54 = vrot.slane %v9124_v15, 4  ;;  %v1861_v3 = vrot.slane %v1822_v50, 4  ;;  %v1953_v9 = vrot.slane %v9215_v5, 4 }
 0x22c   : > { %7336 = vmatmul.msk.f32.vlgmr.msrb.gmra.mxu3 %vm463_vm1, %v1162_v37  ;;  %v1974_v41 = vsel %vm1051_vm2, %v1958_v52, %v1973_v16  ;;  %v1234_v33 = vperm.slane %v1226_v51, %v8285_v42  ;;  %v1258_v39 = vperm.slane %v1250_v28, %v8285_v42  ;;  %v1972_v15 = vsel %vm1051_vm2, %v1971_v53, %v1934_v13  ;;  %v12368_v28 = vld [vmem:[#allocation4_spill] sm:$0xff] }
 0x22d   : > { %7358 = vmatpush.xpose.msk.msrb.mxu3 %vm463_vm1, %v1974_v41  ;;  %v1858_v32 = vsel %vm1051_vm2, %v9133_v46, %v1857_v54  ;;  %7332 = vmatmul.msk.f32.vlgmr.msrb.gmra.mxu2 %vm463_vm1, %v1160_v7  ;;  %v1859_v43 = vrot.slane %v1846_v27, 4  ;;  %v1430_v5 = vperm.slane %v1424_v34, %v8145_v63  ;;  %v1387_v38 = vrot.slane %v12363_v62, 4  ;;  %v9323_v13 = vpop.f32.mrf.mxu1  ;;  %v12369_v34 = vld [vmem:[#allocation9_spill] sm:$0xff]  ;;  %v12370_v54 = vld [vmem:[#allocation3_spill] sm:$0xff] }
 0x22e   : > { %v1954_v52 = vsel %vm1051_vm2, %v9169_v21, %v1953_v9  ;;  %7351 = vmatpush.xpose.msk.msrb.mxu1 %vm463_vm1, %v1858_v32  ;;  %7354 = vmatpush.xpose.msk.msrb.mxu2 %vm463_vm1, %v1972_v15  ;;  %v1269_v23 = vrot.slane %v9228_v57, 4  ;;  %v9320_v46 = vperm.slane %v1348_v4, %v8285_v42  ;;  %v1841_v47 = vrot.slane %v9248_v58, 4  ;;  %12364 = vst [vmem:[#allocation39_spill] sm:$0xff] %v9323_v13 }
 0x22f   : > { %v1862_v59 = vsel %vm1051_vm2, %v1846_v27, %v1861_v3  ;;  %v1400_v40 = vsel %vm1051_vm2, %v1399_v49, %v12365_v12  ;;  %v1412_v21 = vsel %vm1051_vm2, %v1411_v35, %v12366_v0  ;;  %v1929_v11 = vrot.slane %v9210_v45, 4 }
 0x230   : > { %v1270_v57 = vsel %vm1051_vm2, %v9178_v1, %v1269_v23  ;;  %v2629_v37 = vsel %vm2571_vm3, %v9323_v13, -inf  ;;  %v1271_v61 = vrot.slane %v1258_v39, 4  ;;  %v1860_v58 = vsel %vm1051_vm2, %v1859_v43, %v1822_v50 }
 0x231   : > { %7359 = vmatpush.xpose.msk.msrb.mxu3 %vm463_vm1, %v1862_v59  ;;  %7329 = vmatmul.msk.f32.gmra.mxu1 %vm463_vm1, %v1270_v57  ;;  %v1273_v31 = vrot.slane %v1234_v33, 4  ;;  %v1962_v25 = vperm.slane %v1954_v52, %v8285_v42  ;;  %v1459_v2 = vrot.slane %v1430_v5, 4  ;;  %v12367_v45 = vrot.slane %v12353_v20, 4 }
 0x232   : > { %2630 = vmax.xlane.f32.xlu2 %v2629_v37  ;;  %7355 = vmatpush.xpose.msk.msrb.mxu2 %vm463_vm1, %v1860_v58  ;;  %v1842_v7 = vsel %vm1051_vm2, %v9200_v56, %v1841_v47  ;;  %v1418_v51 = vperm.slane %v1412_v21, %v8145_v63  ;;  %v1371_v50 = vrot.slane %v9320_v46, 4  ;;  %v9350_v53 = vperm.slane %v1350_v8, %v8285_v42  ;;  %v12372_v21 = vld [vmem:[#allocation6_spill] sm:$0xff] }
 0x233   : > { %v1326_v1 = vsel %vm1051_vm2, %v8588_v55, %v12367_v45  ;;  %v1274_v17 = vsel %vm1051_vm2, %v1258_v39, %v1273_v31  ;;  %v1406_v27 = vperm.slane %v1400_v40, %v8145_v63  ;;  %v1313_v16 = vrot.slane %v12368_v28, 4 }
 0x234   : > { %v1930_v20 = vsel %vm1051_vm2, %v9189_v14, %v1929_v11  ;;  %7337 = vmatmul.msk.f32.gmra.mxu3 %vm463_vm1, %v1274_v17  ;;  %v1272_v55 = vsel %vm1051_vm2, %v1271_v61, %v1234_v33  ;;  %v1330_v56 = vperm.slane %v9260_v18, %v8285_v42  ;;  %v1975_v4 = vrot.slane %v1962_v25, 4  ;;  %v12371_v14 = vld [vmem:[#allocation8_spill] sm:$0xff] }
 0x235   : > { %7333 = vmatmul.msk.f32.gmra.mxu2 %vm463_vm1, %v1272_v55  ;;  %v1850_v8 = vperm.slane %v1842_v7, %v8285_v42  ;;  %v1388_v49 = vsel %vm1051_vm2, %v1387_v38, %v12369_v34  ;;  %v1460_v35 = vsel %vm1051_vm2, %v1459_v2, %v1418_v51  ;;  %v1301_v3 = vrot.slane %v12370_v54, 4  ;;  %v12377_v54 = vld [vmem:[#allocation13_spill] sm:$0xff] }
 0x236   : > { %v1314_v9 = vsel %vm1051_vm2, %v12371_v14, %v1313_v16  ;;  %v1817_v41 = vrot.slane %v9232_v10, 4  ;;  %v1461_v33 = vrot.slane %v1418_v51, 4  ;;  %v1372_v18 = vsel %vm1051_vm2, %v1371_v50, %v1330_v56 }
 0x237   : > { %v1938_v39 = vperm.slane %v1930_v20, %v8285_v42  ;;  %v1375_v32 = vrot.slane %v9350_v53, 4  ;;  %v1435_v15 = vrot.slane %v1406_v27, 4  ;;  %v1394_v38 = vperm.slane %v1388_v49, %v8145_v63 }
 0x238   : > { %v1818_v43 = vsel %vm1051_vm2, %v12347_v36, %v1817_v41  ;;  %v9376_v52 = vperm.slane %v1460_v35, %v8285_v42  ;;  %v1462_v23 = vsel %vm1051_vm2, %v1430_v5, %v1461_v33  ;;  %v1335_v10 = vrot.slane %v9240_v6, 4  ;;  %v12374_v36 = vld [vmem:[#allocation5_spill] sm:$0xff] }
 0x239   : > { %7340 = vmatmul.msk.f32.vlgmr.msra.gmra.mxu1 %vm463_vm1, %v1372_v18  ;;  %v1976_v47 = vsel %vm1051_vm2, %v1975_v4, %v1938_v39  ;;  %v9383_v59 = vperm.slane %v1326_v1, %v8285_v42  ;;  %v1863_v40 = vrot.slane %v1850_v8, 4  ;;  %v9386_v11 = vunpack.i.l.bf16 %v12372_v21  ;;  %v9394_v61 = vpop.f32.mrf.mxu2  ;;  %v12376_v4 = vld [vmem:[#allocation65_spill] sm:$0xff] }
 0x23a   : > { %v1302_v57 = vsel %vm1051_vm2, %v12374_v36, %v1301_v3  ;;  %v9391_v37 = vperm.slane %v1314_v9, %v8145_v63  ;;  %7362 = vmatpush.xpose.msk.msra.mxu1 %vm463_vm1, %v1976_v47  ;;  %v1373_v5 = vrot.slane %v1330_v56, 4  ;;  %12375 = vst [vmem:[#allocation54_spill] sm:$0xff] %v9394_v61  ;;  %v1826_v31 = vperm.slane %v1818_v43, %v8285_v42 }
 0x23b   : > { %12373 = vst [vmem:[#allocation50_spill] sm:$0xff] %v9386_v11  ;;  %v1376_v58 = vsel %vm1051_vm2, %v1375_v32, %v9383_v59  ;;  %v1436_v2 = vsel %vm1051_vm2, %v1435_v15, %v1394_v38  ;;  %v9401_v45 = vperm.slane %v1462_v23, %v8285_v42  ;;  %v2632_v1 = vsel %vm2571_vm3, %v9394_v61, -inf }
 0x23c   : > { %7348 = vmatmul.msk.f32.vlgmr.msra.gmra.mxu3 %vm463_vm1, %v1376_v58  ;;  %v1977_v7 = vrot.slane %v1938_v39, 4  ;;  %v1483_v51 = vrot.slane %v9376_v52, 4  ;;  %v1437_v17 = vrot.slane %v1394_v38, 4  ;;  %v1401_v50 = vrot.slane %v12365_v12, 4  ;;  %2633 = vmax.xlane.f32.xlu0 %v2632_v1  ;;  %v12380_v58 = vld [vmem:[#allocation7_spill] sm:$0xff] }
 0x23d   : > { %v1425_v28 = vrot.slane %v12360_v44, 4  ;;  %4931 = vmatpush.msra.mxu3 %v9386_v11  ;;  %v1864_v16 = vsel %vm1051_vm2, %v1863_v40, %v1826_v31  ;;  %v1374_v20 = vsel %vm1051_vm2, %v9320_v46, %v1373_v5  ;;  %v1442_v56 = vperm.slane %v1436_v2, %v8285_v42 }
 0x23e   : > { %7363 = vmatpush.xpose.msk.msra.mxu1 %vm463_vm1, %v1864_v16  ;;  %7344 = vmatmul.msk.f32.vlgmr.msra.gmra.mxu2 %vm463_vm1, %v1374_v20  ;;  %v1978_v55 = vsel %vm1051_vm2, %v1962_v25, %v1977_v7  ;;  %v1438_v12 = vsel %vm1051_vm2, %v1406_v27, %v1437_v17  ;;  %v1359_v44 = vrot.slane %v9391_v37, 4  ;;  %v9421_v49 = vperm.slane %v12376_v4, %v8145_v63  ;;  %v12385_v16 = vld [vmem:[#allocation15_spill] sm:$0xff] }
 0x23f   : > { %v1402_v35 = vsel %vm1051_vm2, %v12361_v19, %v1401_v50  ;;  %v1426_v46 = vsel %vm1051_vm2, %v12339_v24, %v1425_v28  ;;  %7366 = vmatpush.xpose.msk.msra.mxu2 %vm463_vm1, %v1978_v55  ;;  %4932 = vmatpush.msra.mxu3 %v12377_v54  ;;  %v1487_v25 = vrot.slane %v9401_v45, 4  ;;  %v1310_v27 = vperm.slane %v1302_v57, %v8145_v63  ;;  %v9439_v41 = vpop.f32.mrf.mxu3  ;;  %v12383_v50 = vld [vmem:[#allocation11_spill] sm:$0xff] }
 0x240   : > { %v1484_v3 = vsel %vm1051_vm2, %v1483_v51, %v1442_v56  ;;  %v1865_v14 = vrot.slane %v1826_v31, 4  ;;  %v1446_v9 = vperm.slane %v1438_v12, %v8285_v42  ;;  %v1336_v19 = vsel %vm1051_vm2, %v1335_v10, %v9421_v49  ;;  %12378 = vst [vmem:[#allocation49_spill] sm:$0xff] %v9439_v41 }
 0x241   : > { %7341 = vmatmul.msk.f32.gmra.mxu1 %vm463_vm1, %v1484_v3  ;;  %v9437_v24 = vperm.slane %v1402_v35, %v8145_v63  ;;  %v1360_v18 = vsel %vm1051_vm2, %v1359_v44, %v1310_v27  ;;  %v9444_v39 = vperm.slane %v1426_v46, %v8145_v63  ;;  %v1413_v32 = vrot.slane %v12366_v0, 4  ;;  %v9450_v43 = vpop.f32.mrf.mxu2  ;;  %v12387_v46 = vld [vmem:[#allocation17_spill] sm:$0xff] }
 0x242   : > { %v1866_v33 = vsel %vm1051_vm2, %v1850_v8, %v1865_v14  ;;  %v2638_v15 = vsel %vm2571_vm3, %v9439_v41, -inf  ;;  %12379 = vst [vmem:[#allocation32_spill] sm:$0xff] %v9450_v43  ;;  %v1488_v38 = vsel %vm1051_vm2, %v1487_v25, %v1446_v9  ;;  %v1485_v23 = vrot.slane %v1442_v56, 4 }
 0x243   : > { %7367 = vmatpush.xpose.msk.msra.mxu2 %vm463_vm1, %v1866_v33  ;;  %v1389_v10 = vrot.slane %v12369_v34, 4  ;;  %2639 = vmax.xlane.f32.xlu2 %v2638_v15  ;;  %v2635_v8 = vsel %vm2571_vm3, %v9450_v43, -inf  ;;  %v1366_v47 = vperm.slane %v1360_v18, %v8285_v42  ;;  %v1414_v40 = vsel %vm1051_vm2, %v12362_v29, %v1413_v32 }
 0x244   : > { %7349 = vmatmul.msk.f32.gmra.mxu3 %vm463_vm1, %v1488_v38  ;;  %2636 = vmax.xlane.f32.xlu1 %v2635_v8  ;;  %v1486_v0 = vsel %vm1051_vm2, %v9376_v52, %v1485_v23  ;;  %v1377_v34 = vrot.slane %v9383_v59, 4  ;;  %v1342_v36 = vperm.slane %v1336_v19, %v8285_v42  ;;  %v1471_v57 = vrot.slane %v9444_v39, 4  ;;  %v12390_v38 = vld [vmem:[#allocation20_spill] sm:$0xff] }
 0x245   : > { %v1390_v21 = vsel %vm1051_vm2, %v12363_v62, %v1389_v10  ;;  %v1447_v5 = vrot.slane %v9437_v24, 4  ;;  %v9470_v52 = vunpack.i.l.bf16 %v12380_v58  ;;  %v1422_v29 = vperm.slane %v1414_v40, %v8145_v63  ;;  %v12392_v40 = vld [vmem:[#allocation27_spill] sm:$0xff] }
 0x246   : > { %7345 = vmatmul.msk.f32.gmra.mxu2 %vm463_vm1, %v1486_v0  ;;  %v1378_v31 = vsel %vm1051_vm2, %v9350_v53, %v1377_v34  ;;  %v1379_v62 = vrot.slane %v1366_v47, 4  ;;  %v1398_v2 = vperm.slane %v1390_v21, %v8145_v63  ;;  %v1381_v1 = vrot.slane %v1342_v36, 4  ;;  %v12393_v34 = vld [vmem:[#allocation38_spill] sm:$0xff] }
 0x247   : > { %12381 = vst [vmem:[#allocation46_spill] sm:$0xff] %v9470_v52  ;;  %v9478_v59 = vpop.f32.mrf.mxu3  ;;  %v1472_v7 = vsel %vm1051_vm2, %v1471_v57, %v1422_v29  ;;  %v1361_v51 = vrot.slane %v1310_v27, 4  ;;  %v9485_v28 = vunpack.i.h.bf16 %v12383_v50  ;;  %v9490_v55 = vunpack.i.l.bf16 %v12383_v50  ;;  %v12388_v27 = vld [vmem:[#allocation14_spill] sm:$0xff] }
 0x248   : > { %12382 = vst [vmem:[#allocation77_spill] sm:$0xff] %v9478_v59  ;;  %v2641_v17 = vsel %vm2571_vm3, %v9478_v59, -inf  ;;  %v1448_v53 = vsel %vm1051_vm2, %v1447_v5, %v1398_v2  ;;  %v1382_v20 = vsel %vm1051_vm2, %v1366_v47, %v1381_v1  ;;  %v1380_v56 = vsel %vm1051_vm2, %v1379_v62, %v1342_v36 }
 0x249   : > { %7352 = vmatmul.msk.f32.vlgmr.msrb.gmra.mxu1 %vm463_vm1, %v1378_v31  ;;  %12384 = vst [vmem:[#allocation78_spill] sm:$0xff] %v9485_v28  ;;  %2642 = vmax.xlane.f32.xlu0 %v2641_v17  ;;  %v1478_v12 = vperm.slane %v1472_v7, %v8285_v42  ;;  %v1362_v44 = vsel %vm1051_vm2, %v9391_v37, %v1361_v51  ;;  %v1489_v4 = vrot.slane %v1446_v9, 4  ;;  %v1337_v3 = vrot.slane %v9421_v49, 4 }
 0x24a   : > { %4966 = vmatpush.msrb.mxu1 %v9470_v52  ;;  %12386 = vst [vmem:[#allocation29_spill] sm:$0xff] %v9490_v55  ;;  %v1454_v35 = vperm.slane %v1448_v53, %v8285_v42  ;;  %v1370_v25 = vperm.slane %v1362_v44, %v8285_v42  ;;  %v1473_v19 = vrot.slane %v1422_v29, 4  ;;  %v9522_v23 = vunpack.i.l.bf16 %v12390_v38  ;;  %v12396_v29 = vld [vmem:[#allocation23_spill] sm:$0xff] }
 0x24b   : > { %v1490_v54 = vsel %vm1051_vm2, %v9401_v45, %v1489_v4  ;;  %v1491_v37 = vrot.slane %v1478_v12, 4  ;;  %v1338_v9 = vsel %vm1051_vm2, %v9240_v6, %v1337_v3  ;;  %v1449_v0 = vrot.slane %v1398_v2, 4 }
 0x24c   : > { %4967 = vmatpush.msrb.mxu1 %v12385_v16  ;;  %7360 = vmatmul.msk.f32.vlgmr.msrb.gmra.mxu3 %vm463_vm1, %v1382_v20  ;;  %v1493_v14 = vrot.slane %v1454_v35, 4  ;;  %v1383_v18 = vrot.slane %v1370_v25, 4  ;;  %v1474_v15 = vsel %vm1051_vm2, %v9444_v39, %v1473_v19  ;;  %v1346_v6 = vperm.slane %v1338_v9, %v8285_v42  ;;  %12391 = vst [vmem:[#allocation68_spill] sm:$0xff] %v9522_v23 }
 0x24d   : > { %5036 = vmatpush.msrb.mxu3 %v9485_v28  ;;  %v1492_v32 = vsel %vm1051_vm2, %v1491_v37, %v1454_v35  ;;  %v1482_v8 = vperm.slane %v1474_v15, %v8285_v42  ;;  %v1450_v47 = vsel %vm1051_vm2, %v9437_v24, %v1449_v0  ;;  %v9532_v36 = vunpack.i.l.bf16 %v12393_v34 }
 0x24e   : > { %7356 = vmatmul.msk.f32.vlgmr.msrb.gmra.mxu2 %vm463_vm1, %v1380_v56  ;;  %v1494_v33 = vsel %vm1051_vm2, %v1478_v12, %v1493_v14  ;;  %v1384_v10 = vsel %vm1051_vm2, %v1383_v18, %v1346_v6  ;;  %v1385_v39 = vrot.slane %v1346_v6, 4  ;;  %v1458_v31 = vperm.slane %v1450_v47, %v8285_v42 }
 0x24f   : > { %5001 = vmatpush.msrb.mxu2 %v9490_v55  ;;  %5037 = vmatpush.msrb.mxu3 %v12387_v46  ;;  %v1495_v21 = vrot.slane %v1482_v8, 4  ;;  %12394 = vst [vmem:[#allocation67_spill] sm:$0xff] %v9532_v36  ;;  %v205_v51 = vlaneseq }
 0x250   : > { %v1386_v5 = vsel %vm1051_vm2, %v1370_v25, %v1385_v39  ;;  %v1497_v62 = vrot.slane %v1458_v31, 4 }
 0x251   : > { %5002 = vmatpush.msrb.mxu2 %v12388_v27  ;;  %7353 = vmatmul.msk.f32.gmra.mxu1 %vm463_vm1, %v1490_v54  ;;  %v1496_v24 = vsel %vm1051_vm2, %v1495_v21, %v1458_v31  ;;  %v9555_v50 = vshrl.u32 %v205_v51, 7  ;;  %v9574_v46 = vand.u32 127, %v205_v51 }
 0x252   : > { %v1498_v2 = vsel %vm1051_vm2, %v1482_v8, %v1497_v62 }
 0x253   : > { %v9512_v45 = vpop.f32.mrf.mxu1  ;;  %7532 = vset.pattern.permute.xlu0 %v9555_v50  ;;  %v9565_v12 = vadd.s32 8, %v9555_v50  ;;  %vm9582_vm4 = vcmp.eq.s32.totalorder %v9555_v50, %v9574_v46 }
 0x254   : > { %7361 = vmatmul.msk.f32.gmra.mxu3 %vm463_vm1, %v1494_v33  ;;  %12389 = vst [vmem:[#allocation74_spill] sm:$0xff] %v9512_v45  ;;  %v2644_v49 = vsel %vm2571_vm3, %v9512_v45, -inf }
 0x255   : > { %2645 = vmax.xlane.f32.xlu1 %v2644_v49  ;;  %vm9598_vm5 = vcmp.eq.s32.totalorder %v9565_v12, %v9574_v46 }
 0x256   : > { %7357 = vmatmul.msk.f32.gmra.mxu2 %vm463_vm1, %v1492_v32  ;;  %7533 = vset.pattern.permute.xlu1 %v9565_v12 }
 0x259   : > { %7364 = vmatmul.msk.f32.vlgmr.msra.gmra.mxu1 %vm463_vm1, %v1384_v10 }
 0x25a   : > { %5071 = vmatpush.msra.mxu1 %v9522_v23 }
 0x25b   : > { %v9534_v57 = vpop.f32.mrf.mxu1 }
 0x25c   : > { %5072 = vmatpush.msra.mxu1 %v12392_v40  ;;  %12395 = vst [vmem:[#allocation72_spill] sm:$0xff] %v9534_v57  ;;  %v2647_v58 = vsel %vm2571_vm3, %v9534_v57, -inf }
 0x25d   : > { %2648 = vmax.xlane.f32.xlu2 %v2647_v58 }
 0x25e   : > { %7368 = vmatmul.msk.f32.vlgmr.msra.gmra.mxu2 %vm463_vm1, %v1386_v5 }
 0x25f   : > { %5106 = vmatpush.msra.mxu2 %v9532_v36 }
 0x261   : > { %5107 = vmatpush.msra.mxu2 %v12396_v29  ;;  %7365 = vmatmul.msk.f32.gmra.mxu1 %vm463_vm1, %v1496_v24 }
 0x266   : > { %7369 = vmatmul.msk.f32.gmra.mxu2 %vm463_vm1, %v1498_v2  ;;  %v9638_v2 = vpop.xlane.xlu2 %2573 }
 0x269   : > { %v9547_v1 = vpop.f32.mrf.mxu2 }
 0x26a   : > { %12397 = vst [vmem:[#allocation63_spill] sm:$0xff] %v9547_v1  ;;  %v2650_v7 = vsel %vm2571_vm3, %v9547_v1, -inf }
 0x26b   : > { %2651 = vmax.xlane.f32.xlu0 %v2650_v7 }
 0x26f   : > { %v9551_v17 = vpop.f32.mrf.mxu3 }
 0x270   : > { %12398 = vst [vmem:[#allocation73_spill] sm:$0xff] %v9551_v17  ;;  %v2656_v53 = vsel %vm2571_vm3, %v9551_v17, -inf }
 0x271   : > { %2657 = vmax.xlane.f32.xlu2 %v2656_v53  ;;  %v9557_v16 = vpop.f32.mrf.mxu2 }
 0x272   : > { %12399 = vst [vmem:[#allocation70_spill] sm:$0xff] %v9557_v16  ;;  %v2653_v20 = vsel %vm2571_vm3, %v9557_v16, -inf }
 0x273   : > { %2654 = vmax.xlane.f32.xlu1 %v2653_v20 }
 0x277   : > { %v9562_v56 = vpop.f32.mrf.mxu3 }
 0x278   : > { %12400 = vst [vmem:[#allocation64_spill] sm:$0xff] %v9562_v56  ;;  %v2659_v44 = vsel %vm2571_vm3, %v9562_v56, -inf }
 0x279   : > { %2660 = vmax.xlane.f32.xlu0 %v2659_v44 }
 0x283   : > { %v9570_v4 = vpop.f32.mrf.mxu1 }
 0x284   : > { %12401 = vst [vmem:[#allocation69_spill] sm:$0xff] %v9570_v4  ;;  %v2662_v35 = vsel %vm2571_vm3, %v9570_v4, -inf  ;;  %v9851_v4 = vadd.s32 4294967288, %v9574_v46 }
 0x285   : > { %2663 = vmax.xlane.f32.xlu1 %v2662_v35 }
 0x28b   : > { %v9576_v54 = vpop.f32.mrf.mxu1 }
 0x28c   : > { %12402 = vst [vmem:[#allocation28_spill] sm:$0xff] %v9576_v54  ;;  %v2043_v25 = vpop.f32.mrf.mxu3  ;;  %v2665_v27 = vsel %vm2571_vm3, %v9576_v54, -inf }
 0x28d   : > { %2666 = vmax.xlane.f32.xlu2 %v2665_v27  ;;  %v9594_v19 = vsel %vm9582_vm4, -inf, %v2043_v25  ;;  %v9654_v27 = vpop.permute.xlu0 %7528 }
 0x28e   : > { %12406 = vst [vmem:[#allocation35_spill] sm:$0xff] %v9594_v19  ;;  %v2674_v15 = vsel %vm2571_vm3, %v9594_v19, -inf }
 0x290   : > { %v2008_v37 = vpop.f32.mrf.mxu2 }
 0x291   : > { %v9588_v14 = vsel %vm9582_vm4, -inf, %v2008_v37 }
 0x292   : > { %12405 = vst [vmem:[#allocation18_spill] sm:$0xff] %v9588_v14  ;;  %v2668_v9 = vsel %vm2571_vm3, %v9588_v14, -inf }
 0x293   : > { %2669 = vmax.xlane.f32.xlu0 %v2668_v9 }
 0x294   : > { %v2078_v18 = vpop.f32.mrf.mxu1 }
 0x295   : > { %v9606_v49 = vsel %vm9582_vm4, -inf, %v2078_v18  ;;  %2675 = vmax.xlane.f32.xlu2 %v2674_v15 }
 0x296   : > { %12409 = vst [vmem:[#allocation12_spill] sm:$0xff] %v9606_v49  ;;  %v2680_v6 = vsel %vm2571_vm3, %v9606_v49, -inf }
 0x297   : > { %v2046_v32 = vpop.f32.mrf.mxu3  ;;  %2681 = vmax.xlane.f32.xlu1 %v2680_v6 }
 0x298   : > { %v2011_v38 = vpop.f32.mrf.mxu2  ;;  %v9612_v10 = vsel %vm9598_vm5, -inf, %v2046_v32 }
 0x299   : > { %12410 = vst [vmem:[#allocation10_spill] sm:$0xff] %v9612_v10  ;;  %v2677_v8 = vsel %vm2571_vm3, %v9612_v10, -inf  ;;  %v9618_v0 = vsel %vm9598_vm5, -inf, %v2011_v38 }
 0x29a   : > { %12411 = vst [vmem:[#allocation21_spill] sm:$0xff] %v9618_v0  ;;  %v2671_v5 = vsel %vm2571_vm3, %v9618_v0, -inf }
 0x29b   : > { %2678 = vmax.xlane.f32.xlu0 %v2677_v8  ;;  %v9668_v8 = vpop.xlane.xlu2 %2582 }
 0x29e   : > { %v2081_v39 = vpop.f32.mrf.mxu1 }
 0x29f   : > { %v2148_v47 = vpop.f32.mrf.mxu3  ;;  %v9622_v40 = vsel %vm9598_vm5, -inf, %v2081_v39  ;;  %2672 = vmax.xlane.f32.xlu1 %v2671_v5 }
 0x2a0   : > { %12412 = vst [vmem:[#allocation4_spill] sm:$0xff] %v9622_v40  ;;  %v2683_v21 = vsel %vm2571_vm3, %v9622_v40, -inf  ;;  %v2113_v58 = vpop.f32.mrf.mxu2  ;;  %v9636_v29 = vsel %vm9582_vm4, -inf, %v2148_v47 }
 0x2a1   : > { %2684 = vmax.xlane.f32.xlu2 %v2683_v21  ;;  %v9630_v31 = vsel %vm9582_vm4, -inf, %v2113_v58  ;;  %12414 = vst [vmem:[#allocation3_spill] sm:$0xff] %v9636_v29  ;;  %v2692_v53 = vsel %vm2571_vm3, %v9636_v29, -inf  ;;  %v9676_v21 = vpop.xlane.xlu0 %2576 }
 0x2a2   : > { %12413 = vst [vmem:[#allocation9_spill] sm:$0xff] %v9630_v31  ;;  %v2686_v24 = vsel %vm2571_vm3, %v9630_v31, -inf }
 0x2a3   : > { %2687 = vmax.xlane.f32.xlu0 %v2686_v24 }
 0x2a6   : > { %v2183_v62 = vpop.f32.mrf.mxu1 }
 0x2a7   : > { %v2151_v7 = vpop.f32.mrf.mxu3  ;;  %v9642_v51 = vsel %vm9582_vm4, -inf, %v2183_v62 }
 0x2a8   : > { %12415 = vst [vmem:[#allocation8_spill] sm:$0xff] %v9642_v51  ;;  %v2698_v20 = vsel %vm2571_vm3, %v9642_v51, -inf  ;;  %v2116_v44 = vpop.f32.mrf.mxu2  ;;  %v9650_v35 = vsel %vm9598_vm5, -inf, %v2151_v7 }
 0x2a9   : > { %12416 = vst [vmem:[#allocation6_spill] sm:$0xff] %v9650_v35  ;;  %2693 = vmax.xlane.f32.xlu2 %v2692_v53  ;;  %2699 = vmax.xlane.f32.xlu1 %v2698_v20  ;;  %v2695_v25 = vsel %vm2571_vm3, %v9650_v35, -inf  ;;  %v9658_v37 = vsel %vm9598_vm5, -inf, %v2116_v44 }
 0x2aa   : > { %12417 = vst [vmem:[#allocation5_spill] sm:$0xff] %v9658_v37  ;;  %v2689_v6 = vsel %vm2571_vm3, %v9658_v37, -inf }
 0x2ab   : > { %2696 = vmax.xlane.f32.xlu0 %v2695_v25 }
 0x2ae   : > { %v2186_v9 = vpop.f32.mrf.mxu1 }
 0x2af   : > { %v2253_v18 = vpop.f32.mrf.mxu3  ;;  %v9662_v32 = vsel %vm9598_vm5, -inf, %v2186_v9  ;;  %v9696_v9 = vpop.xlane.xlu2 %2585 }
 0x2b0   : > { %12418 = vst [vmem:[#allocation65_spill] sm:$0xff] %v9662_v32  ;;  %v2701_v15 = vsel %vm2571_vm3, %v9662_v32, -inf  ;;  %v2218_v38 = vpop.f32.mrf.mxu2  ;;  %v9680_v5 = vsel %vm9582_vm4, -inf, %v2253_v18  ;;  %v9698_v18 = vpop.xlane.xlu1 %2579 }
 0x2b1   : > { %2702 = vmax.xlane.f32.xlu2 %v2701_v15  ;;  %2690 = vmax.xlane.f32.xlu1 %v2689_v6  ;;  %v9672_v39 = vsel %vm9582_vm4, -inf, %v2218_v38  ;;  %12420 = vst [vmem:[#allocation7_spill] sm:$0xff] %v9680_v5  ;;  %v2710_v7 = vsel %vm2571_vm3, %v9680_v5, -inf  ;;  %v9704_v6 = vpop.xlane.xlu0 %2588 }
 0x2b2   : > { %12419 = vst [vmem:[#allocation13_spill] sm:$0xff] %v9672_v39  ;;  %v2704_v47 = vsel %vm2571_vm3, %v9672_v39, -inf }
 0x2b3   : > { %2705 = vmax.xlane.f32.xlu0 %v2704_v47 }
 0x2b6   : > { %v2288_v58 = vpop.f32.mrf.mxu1 }
 0x2b7   : > { %v9684_v24 = vsel %vm9582_vm4, -inf, %v2288_v58  ;;  %v2256_v62 = vpop.f32.mrf.mxu3 }
 0x2b8   : > { %12421 = vst [vmem:[#allocation11_spill] sm:$0xff] %v9684_v24  ;;  %v2716_v53 = vsel %vm2571_vm3, %v9684_v24, -inf  ;;  %v2221_v20 = vpop.f32.mrf.mxu2  ;;  %v9692_v44 = vsel %vm9598_vm5, -inf, %v2256_v62 }
 0x2b9   : > { %12422 = vst [vmem:[#allocation15_spill] sm:$0xff] %v9692_v44  ;;  %2711 = vmax.xlane.f32.xlu2 %v2710_v7  ;;  %2717 = vmax.xlane.f32.xlu1 %v2716_v53  ;;  %v2713_v25 = vsel %vm2571_vm3, %v9692_v44, -inf  ;;  %v9702_v15 = vsel %vm9598_vm5, -inf, %v2221_v20  ;;  %v9722_v44 = vpop.xlane.xlu1 %2591 }
 0x2ba   : > { %12423 = vst [vmem:[#allocation17_spill] sm:$0xff] %v9702_v15  ;;  %v2707_v7 = vsel %vm2571_vm3, %v9702_v15, -inf  ;;  %v9728_v15 = vpop.xlane.xlu0 %2597 }
 0x2bb   : > { %2714 = vmax.xlane.f32.xlu0 %v2713_v25  ;;  %v9718_v25 = vpop.xlane.xlu2 %2594 }
 0x2be   : > { %v2291_v38 = vpop.f32.mrf.mxu1 }
 0x2bf   : > { %v9708_v47 = vsel %vm9598_vm5, -inf, %v2291_v38  ;;  %v2358_v58 = vpop.f32.mrf.mxu3 }
 0x2c0   : > { %12424 = vst [vmem:[#allocation14_spill] sm:$0xff] %v9708_v47  ;;  %v2719_v62 = vsel %vm2571_vm3, %v9708_v47, -inf  ;;  %v9726_v47 = vsel %vm9582_vm4, -inf, %v2358_v58 }
 0x2c1   : > { %2720 = vmax.xlane.f32.xlu2 %v2719_v62  ;;  %2708 = vmax.xlane.f32.xlu1 %v2707_v7  ;;  %v2323_v53 = vpop.f32.mrf.mxu2  ;;  %12426 = vst [vmem:[#allocation27_spill] sm:$0xff] %v9726_v47  ;;  %v9746_v5 = vpop.xlane.xlu1 %2600 }
 0x2c2   : > { %v9716_v20 = vsel %vm9582_vm4, -inf, %v2323_v53  ;;  %v9752_v32 = vpop.xlane.xlu0 %2606 }
 0x2c3   : > { %12425 = vst [vmem:[#allocation20_spill] sm:$0xff] %v9716_v20  ;;  %v2722_v38 = vsel %vm2571_vm3, %v9716_v20, -inf  ;;  %v2728_v20 = vsel %vm2571_vm3, %v9726_v47, -inf  ;;  %v9742_v51 = vpop.xlane.xlu2 %2603 }
 0x2c4   : > { %2723 = vmax.xlane.f32.xlu0 %v2722_v38 }
 0x2c6   : > { %v2393_v62 = vpop.f32.mrf.mxu1 }
 0x2c7   : > { %v9732_v7 = vsel %vm9582_vm4, -inf, %v2393_v62  ;;  %v2361_v53 = vpop.f32.mrf.mxu3 }
 0x2c8   : > { %12427 = vst [vmem:[#allocation38_spill] sm:$0xff] %v9732_v7  ;;  %v9736_v24 = vsel %vm9598_vm5, -inf, %v2361_v53  ;;  %v2734_v38 = vsel %vm2571_vm3, %v9732_v7, -inf }
 0x2c9   : > { %12428 = vst [vmem:[#allocation23_spill] sm:$0xff] %v9736_v24  ;;  %2729 = vmax.xlane.f32.xlu2 %v2728_v20  ;;  %2735 = vmax.xlane.f32.xlu1 %v2734_v38  ;;  %v2326_v58 = vpop.f32.mrf.mxu2  ;;  %v2731_v62 = vsel %vm2571_vm3, %v9736_v24, -inf  ;;  %v9770_v29 = vpop.xlane.xlu1 %2609 }
 0x2ca   : > { %v9750_v53 = vsel %vm9598_vm5, -inf, %v2326_v58 }
 0x2cb   : > { %12429 = vst [vmem:[#allocation90_spill] sm:$0xff] %v9750_v53  ;;  %v2725_v24 = vsel %vm2571_vm3, %v9750_v53, -inf  ;;  %v9766_v35 = vpop.xlane.xlu2 %2612  ;;  %v9776_v53 = vpop.xlane.xlu0 %2615 }
 0x2cc   : > { %2732 = vmax.xlane.f32.xlu0 %v2731_v62 }
 0x2ce   : > { %v2396_v47 = vpop.f32.mrf.mxu1 }
 0x2cf   : > { %v9756_v20 = vsel %vm9598_vm5, -inf, %v2396_v47  ;;  %v2463_v38 = vpop.f32.mrf.mxu3 }
 0x2d0   : > { %12430 = vst [vmem:[#allocation91_spill] sm:$0xff] %v9756_v20  ;;  %v2737_v7 = vsel %vm2571_vm3, %v9756_v20, -inf  ;;  %v9774_v20 = vsel %vm9582_vm4, -inf, %v2463_v38 }
 0x2d1   : > { %2738 = vmax.xlane.f32.xlu2 %v2737_v7  ;;  %2726 = vmax.xlane.f32.xlu1 %v2725_v24  ;;  %v2428_v62 = vpop.f32.mrf.mxu2  ;;  %12432 = vst [vmem:[#allocation93_spill] sm:$0xff] %v9774_v20  ;;  %v2746_v39 = vsel %vm2571_vm3, %v9774_v20, -inf  ;;  %v9794_v31 = vpop.xlane.xlu1 %2618 }
 0x2d2   : > { %v9764_v58 = vsel %vm9582_vm4, -inf, %v2428_v62 }
 0x2d3   : > { %12431 = vst [vmem:[#allocation92_spill] sm:$0xff] %v9764_v58  ;;  %v2740_v47 = vsel %vm2571_vm3, %v9764_v58, -inf  ;;  %v9790_v37 = vpop.xlane.xlu2 %2621 }
 0x2d4   : > { %2741 = vmax.xlane.f32.xlu0 %v2740_v47 }
 0x2d6   : > { %v2498_v24 = vpop.f32.mrf.mxu1 }
 0x2d7   : > { %v9780_v7 = vsel %vm9582_vm4, -inf, %v2498_v24  ;;  %v2466_v62 = vpop.f32.mrf.mxu3 }
 0x2d8   : > { %12433 = vst [vmem:[#allocation94_spill] sm:$0xff] %v9780_v7  ;;  %v2752_v58 = vsel %vm2571_vm3, %v9780_v7, -inf  ;;  %v9788_v47 = vsel %vm9598_vm5, -inf, %v2466_v62  ;;  %v9800_v7 = vpop.xlane.xlu0 %2624 }
 0x2d9   : > { %12434 = vst [vmem:[#allocation95_spill] sm:$0xff] %v9788_v47  ;;  %2747 = vmax.xlane.f32.xlu2 %v2746_v39  ;;  %2753 = vmax.xlane.f32.xlu1 %v2752_v58  ;;  %v2431_v38 = vpop.f32.mrf.mxu2  ;;  %v2749_v24 = vsel %vm2571_vm3, %v9788_v47, -inf }
 0x2da   : > { %v9798_v20 = vsel %vm9598_vm5, -inf, %v2431_v38 }
 0x2db   : > { %12435 = vst [vmem:[#allocation96_spill] sm:$0xff] %v9798_v20  ;;  %v2743_v62 = vsel %vm2571_vm3, %v9798_v20, -inf  ;;  %v9814_v47 = vpop.xlane.xlu2 %2630 }
 0x2dc   : > { %2750 = vmax.xlane.f32.xlu0 %v2749_v24 }
 0x2de   : > { %v2501_v49 = vpop.f32.mrf.mxu1 }
 0x2df   : > { %v9804_v39 = vsel %vm9598_vm5, -inf, %v2501_v49  ;;  %v9818_v49 = vpop.xlane.xlu1 %2627 }
 0x2e0   : > { %12436 = vst [vmem:[#allocation97_spill] sm:$0xff] %v9804_v39  ;;  %v2755_v58 = vsel %vm2571_vm3, %v9804_v39, -inf  ;;  %v9820_v40 = vpop.xlane.xlu0 %2633 }
 0x2e1   : > { %2756 = vmax.xlane.f32.xlu2 %v2755_v58  ;;  %2744 = vmax.xlane.f32.xlu1 %v2743_v62  ;;  %v2533_v24 = vpop.f32.mrf.mxu2 }
 0x2e2   : > { %v9812_v38 = vsel %vm9582_vm4, -inf, %v2533_v24 }
 0x2e3   : > { %12437 = vst [vmem:[#allocation98_spill] sm:$0xff] %v9812_v38  ;;  %v2758_v10 = vsel %vm2571_vm3, %v9812_v38, -inf  ;;  %v9826_v62 = vpop.xlane.xlu2 %2639 }
 0x2e4   : > { %2759 = vmax.xlane.f32.xlu0 %v2758_v10 }
 0x2e7   : > { %v9830_v24 = vpop.xlane.xlu1 %2636 }
 0x2e8   : > { %v9832_v20 = vpop.xlane.xlu0 %2642 }
 0x2e9   : > { %v2536_v39 = vpop.f32.mrf.mxu2 }
 0x2ea   : > { %v9824_v58 = vsel %vm9598_vm5, -inf, %v2536_v39 }
 0x2eb   : > { %12438 = vst [vmem:[#allocation99_spill] sm:$0xff] %v9824_v58  ;;  %v2761_v3 = vsel %vm2571_vm3, %v9824_v58, -inf  ;;  %v9834_v38 = vpop.xlane.xlu2 %2648 }
 0x2ec   : > { %2762 = vmax.xlane.f32.xlu1 %v2761_v3 }
 0x2ef   : > { %v9836_v10 = vpop.xlane.xlu1 %2645 }
 0x2f0   : > { %v9838_v19 = vpop.xlane.xlu0 %2651 }
 0x2f3   : > { %v9840_v42 = vpop.xlane.xlu2 %2657 }
 0x2f7   : > { %v9842_v33 = vpop.xlane.xlu1 %2654 }
 0x2f8   : > { %v9844_v39 = vpop.xlane.xlu0 %2660 }
 0x2ff   : > { %v9848_v58 = vpop.xlane.xlu1 %2663 }
 0x300   : > { %v9846_v0 = vpop.xlane.xlu2 %2666 }
 0x306   : > { %v2670_v11 = vpop.xlane.xlu0 %2669 }
 0x307   : > { %v2796_v59 = vperm.slane %v2670_v11, %v9574_v46 }
 0x308   : > { %v2676_v3 = vpop.xlane.xlu2 %2675 }
 0x309   : > { %v2801_v43 = vperm.slane %v2676_v3, %v9574_v46 }
 0x30a   : > { %v2682_v14 = vpop.xlane.xlu1 %2681 }
 0x30b   : > { %v2804_v61 = vperm.slane %v2682_v14, %v9574_v46 }
 0x30e   : > { %v2679_v55 = vpop.xlane.xlu0 %2678 }
 0x30f   : > { %v2802_v57 = vperm.slane %v2679_v55, %v9851_v4 }
 0x311   : > { %v2803_v60 = vsel %vm2799_vm6, %v2802_v57, %v2801_v43 }
 0x312   : > { %v2673_v23 = vpop.xlane.xlu1 %2672 }
 0x313   : > { %v2798_v16 = vperm.slane %v2673_v23, %v9851_v4 }
 0x314   : > { %v2685_v52 = vpop.xlane.xlu2 %2684 }
 0x315   : > { %v2805_v45 = vperm.slane %v2685_v52, %v9851_v4  ;;  %v2800_v13 = vsel %vm2799_vm6, %v2798_v16, %v2796_v59 }
 0x316   : > { %v2688_v28 = vpop.xlane.xlu0 %2687  ;;  %v2847_v41 = vsel %vm2846_vm7, %v2803_v60, %v2800_v13 }
 0x317   : > { %v2807_v23 = vperm.slane %v2688_v28, %v9574_v46  ;;  %v2806_v55 = vsel %vm2799_vm6, %v2805_v45, %v2804_v61 }
 0x31c   : > { %v2694_v63 = vpop.xlane.xlu2 %2693  ;;  %v2700_v36 = vpop.xlane.xlu1 %2699 }
 0x31d   : > { %v2810_v16 = vperm.slane %v2694_v63, %v9574_v46  ;;  %v2813_v60 = vperm.slane %v2700_v36, %v9574_v46 }
 0x31e   : > { %v2697_v54 = vpop.xlane.xlu0 %2696 }
 0x31f   : > { %v2811_v59 = vperm.slane %v2697_v54, %v9851_v4 }
 0x321   : > { %v2812_v61 = vsel %vm2799_vm6, %v2811_v59, %v2810_v16 }
 0x324   : > { %v2703_v56 = vpop.xlane.xlu2 %2702  ;;  %v2691_v1 = vpop.xlane.xlu1 %2690 }
 0x325   : > { %v2808_v26 = vperm.slane %v2691_v1, %v9851_v4  ;;  %v2849_v1 = vsel %vm2848_vm8, %v2806_v55, %v2847_v41  ;;  %v2814_v28 = vperm.slane %v2703_v56, %v9851_v4 }
 0x326   : > { %v2706_v17 = vpop.xlane.xlu0 %2705 }
 0x327   : > { %v2809_v52 = vsel %vm2799_vm6, %v2808_v26, %v2807_v23  ;;  %v2816_v41 = vperm.slane %v2706_v17, %v9574_v46  ;;  %v2815_v54 = vsel %vm2799_vm6, %v2814_v28, %v2813_v60 }
 0x328   : > { %v2851_v43 = vsel %vm2850_vm9, %v2809_v52, %v2849_v1 }
 0x329   : > { %v2853_v57 = vsel %vm2852_vm10, %v2812_v61, %v2851_v43 }
 0x32a   : > { %v2855_v23 = vsel %vm2854_vm11, %v2815_v54, %v2853_v57 }
 0x32c   : > { %v2712_v30 = vpop.xlane.xlu2 %2711  ;;  %v2718_v11 = vpop.xlane.xlu1 %2717 }
 0x32d   : > { %v2819_v56 = vperm.slane %v2712_v30, %v9574_v46 }
 0x32e   : > { %v2715_v3 = vpop.xlane.xlu0 %2714 }
 0x32f   : > { %v2820_v13 = vperm.slane %v2715_v3, %v9851_v4 }
 0x331   : > { %v2821_v55 = vsel %vm2799_vm6, %v2820_v13, %v2819_v56  ;;  %v2822_v13 = vperm.slane %v2718_v11, %v9574_v46 }
 0x334   : > { %v2721_v45 = vpop.xlane.xlu2 %2720  ;;  %v2709_v26 = vpop.xlane.xlu1 %2708 }
 0x335   : > { %v2817_v63 = vperm.slane %v2709_v26, %v9851_v4  ;;  %v2823_v60 = vperm.slane %v2721_v45, %v9851_v4 }
 0x337   : > { %v2724_v14 = vpop.xlane.xlu0 %2723  ;;  %v2818_v36 = vsel %vm2799_vm6, %v2817_v63, %v2816_v41  ;;  %v2824_v56 = vsel %vm2799_vm6, %v2823_v60, %v2822_v13 }
 0x338   : > { %v2857_v52 = vsel %vm2856_vm12, %v2818_v36, %v2855_v23  ;;  %v2825_v26 = vperm.slane %v2724_v14, %v9574_v46 }
 0x339   : > { %v2859_v3 = vsel %vm2858_vm13, %v2821_v55, %v2857_v52 }
 0x33a   : > { %2869 = vxpose.xlu2.b32.start [1/2] (short) (narrow) %v2859_v3, 16 }
 0x33c   : > { %v2730_v17 = vpop.xlane.xlu2 %2729  ;;  %v2736_v59 = vpop.xlane.xlu1 %2735 }
 0x33d   : > { %v2828_v23 = vperm.slane %v2730_v17, %v9574_v46  ;;  %v2831_v3 = vperm.slane %v2736_v59, %v9574_v46 }
 0x33f   : > { %v2733_v1 = vpop.xlane.xlu0 %2732 }
 0x340   : > { %v2829_v63 = vperm.slane %v2733_v1, %v9851_v4 }
 0x342   : > { %v2830_v14 = vsel %vm2799_vm6, %v2829_v63, %v2828_v23 }
 0x344   : > { %v2727_v16 = vpop.xlane.xlu1 %2726  ;;  %v2739_v43 = vpop.xlane.xlu2 %2738 }
 0x345   : > { %v2826_v61 = vperm.slane %v2727_v16, %v9851_v4  ;;  %v2832_v45 = vperm.slane %v2739_v43, %v9851_v4 }
 0x347   : > { %v2742_v28 = vpop.xlane.xlu0 %2741  ;;  %v2827_v41 = vsel %vm2799_vm6, %v2826_v61, %v2825_v26  ;;  %v2833_v61 = vsel %vm2799_vm6, %v2832_v45, %v2831_v3 }
 0x348   : > { %v2860_v55 = vsel %vm2846_vm7, %v2827_v41, %v2824_v56  ;;  %v2834_v11 = vperm.slane %v2742_v28, %v9574_v46 }
 0x349   : > { %v2861_v1 = vsel %vm2848_vm8, %v2830_v14, %v2860_v55 }
 0x34a   : > { %v2862_v26 = vsel %vm2850_vm9, %v2833_v61, %v2861_v1 }
 0x34c   : > { %v2754_v30 = vpop.xlane.xlu1 %2753  ;;  %v2748_v57 = vpop.xlane.xlu2 %2747 }
 0x34d   : > { %v2837_v13 = vperm.slane %v2748_v57, %v9574_v46  ;;  %v2840_v63 = vperm.slane %v2754_v30, %v9574_v46 }
 0x34f   : > { %v2751_v54 = vpop.xlane.xlu0 %2750 }
 0x350   : > { %v2838_v17 = vperm.slane %v2751_v54, %v9851_v4 }
 0x352   : > { %v2839_v59 = vsel %vm2799_vm6, %v2838_v17, %v2837_v13 }
 0x354   : > { %v2745_v36 = vpop.xlane.xlu1 %2744  ;;  %v2757_v60 = vpop.xlane.xlu2 %2756 }
 0x355   : > { %v2835_v52 = vperm.slane %v2745_v36, %v9851_v4  ;;  %v2841_v41 = vperm.slane %v2757_v60, %v9851_v4 }
 0x357   : > { %v2836_v16 = vsel %vm2799_vm6, %v2835_v52, %v2834_v11  ;;  %v2760_v28 = vpop.xlane.xlu0 %2759  ;;  %v2842_v55 = vsel %vm2799_vm6, %v2841_v41, %v2840_v63 }
 0x358   : > { %v2863_v43 = vsel %vm2852_vm10, %v2836_v16, %v2862_v26  ;;  %v2843_v23 = vperm.slane %v2760_v28, %v9574_v46 }
 0x359   : > { %v2864_v36 = vsel %vm2854_vm11, %v2839_v59, %v2863_v43  ;;  %v12221_v59 = vmov 0  }
 0x35a   : > { %v2865_v52 = vsel %vm2856_vm12, %v2842_v55, %v2864_v36 }
 0x35f   : > { %v2763_v56 = vpop.xlane.xlu1 %2762 }
 0x360   : > { %v2844_v54 = vperm.slane %v2763_v56, %v9851_v4 }
 0x362   : > { %v2845_v57 = vsel %vm2799_vm6, %v2844_v54, %v2843_v23 }
 0x363   : > { %v2866_v45 = vsel %vm2858_vm13, %v2845_v57, %v2865_v52 }
 0x364   : > { %2870 = vxpose.xlu2.b32.end [2/2] (short) (narrow) %v2866_v45, 16 }
 0x3c6   : > { %7536 = vset.pattern.permute.xlu2 %v9565_v12 }
 0x3f5   : > { %v2885_v14 = vpop.trf.xlu2 }
 0x3f6   : > { %v2942_v30 = vperm.slane %v2885_v14, 3  ;;  %v2903_v11 = vperm.slane %v2885_v14, 0  ;;  %v2929_v16 = vperm.slane %v2885_v14, 2  ;;  %v2916_v17 = vperm.slane %v2885_v14, 1 }
 0x3f7   : > { %v2955_v60 = vperm.slane %v2885_v14, 4  ;;  %v2981_v26 = vperm.slane %v2885_v14, 6  ;;  %v2968_v13 = vperm.slane %v2885_v14, 5  ;;  %v2994_v43 = vperm.slane %v2885_v14, 7 }
 0x3f8   : > { %2953 = vperm.xlu2 %7536, %v2942_v30   ;;  %2914 = vperm.xlu1 %7533, %v2903_v11  }
 0x3f9   : > { %2908 = vperm.xlu0 %7532, %v2903_v11  }
 0x3fd   : > { %v9916_v3 = vpop.trf.xlu2 }
 0x3fe   : > { %v3085_v1 = vperm.slane %v9916_v3, 6  ;;  %v3098_v61 = vperm.slane %v9916_v3, 7  ;;  %v3020_v41 = vperm.slane %v9916_v3, 1  ;;  %v3033_v28 = vperm.slane %v9916_v3, 2 }
 0x3ff   : > { %v3007_v63 = vperm.slane %v9916_v3, 0  ;;  %v3059_v56 = vperm.slane %v9916_v3, 4  ;;  %v3072_v54 = vperm.slane %v9916_v3, 5 }
 0x400   : > { %7534 = vset.pattern.permute.xlu1 %v9555_v50  ;;  %3096 = vperm.xlu2 %7536, %v3085_v1  }
 0x401   : > { %2934 = vperm.xlu0 %7532, %v2929_v16  }
 0x408   : > { %2921 = vperm.xlu1 %7534, %v2916_v17   ;;  %3109 = vperm.xlu2 %7536, %v3098_v61  }
 0x409   : > { %2947 = vperm.xlu0 %7532, %v2942_v30  }
 0x410   : > { %7535 = vset.pattern.permute.xlu1 %v9565_v12  ;;  %7553 = vset.pattern.permute.xlu2 %v12221_v59 }
 0x411   : > { %7538 = vset.pattern.permute.xlu0 %v9565_v12 }
 0x418   : > { %2927 = vperm.xlu1 %7535, %v2916_v17  }
 0x419   : > { %2966 = vperm.xlu0 %7538, %v2955_v60  }
 0x420   : > { %2940 = vperm.xlu1 %7535, %v2929_v16  }
 0x421   : > { %7540 = vset.pattern.permute.xlu0 %v9555_v50 }
 0x428   : > { %7537 = vset.pattern.permute.xlu1 %v9555_v50 }
 0x429   : > { %2986 = vperm.xlu0 %7540, %v2981_v26  }
 0x430   : > { %2960 = vperm.xlu1 %7537, %v2955_v60  }
 0x431   : > { %7542 = vset.pattern.permute.xlu0 %v9565_v12 }
 0x438   : > { %2973 = vperm.xlu1 %7537, %v2968_v13  }
 0x439   : > { %3005 = vperm.xlu0 %7542, %v2994_v43  }
 0x440   : > { %7539 = vset.pattern.permute.xlu1 %v9565_v12 }
 0x441   : > { %7544 = vset.pattern.permute.xlu0 %v9555_v50 }
 0x448   : > { %2979 = vperm.xlu1 %7539, %v2968_v13  }
 0x449   : > { %3025 = vperm.xlu0 %7544, %v3020_v41  }
 0x450   : > { %2992 = vperm.xlu1 %7539, %v2981_v26  }
 0x451   : > { %7546 = vset.pattern.permute.xlu0 %v9565_v12 }
 0x452   : > { %v2954_v30 = vpop.permute.xlu2 %2953 }
 0x453   : > { %v3150_v16 = vmax.f32 %v9718_v25, %v2954_v30 }
 0x458   : > { %7541 = vset.pattern.permute.xlu1 %v9555_v50 }
 0x459   : > { %3044 = vperm.xlu0 %7546, %v3033_v28  }
 0x460   : > { %2999 = vperm.xlu1 %7541, %v2994_v43  }
 0x461   : > { %7548 = vset.pattern.permute.xlu0 %v9555_v50 }
 0x468   : > { %3012 = vperm.xlu1 %7541, %v3007_v63  }
 0x469   : > { %3064 = vperm.xlu0 %7548, %v3059_v56  }
 0x46a   : > { %v2915_v36 = vpop.permute.xlu1 %2914 }
 0x46b   : > { %v2909_v23 = vpop.permute.xlu0 %2908 }
 0x46c   : > { %v3143_v52 = vmax.f32 %v9638_v2, %v2909_v23  ;;  %v3046_v2 = vperm.slane %v9916_v3, 3  ;;  %v9957_v23 = vpop.permute.xlu2 %3096 }
 0x470   : > { %7543 = vset.pattern.permute.xlu1 %v9565_v12 }
 0x471   : > { %7550 = vset.pattern.permute.xlu0 %v9565_v12 }
 0x473   : > { %v2935_v45 = vpop.permute.xlu0 %2934 }
 0x474   : > { %v3147_v14 = vmax.f32 %v9696_v9, %v2935_v45 }
 0x478   : > { %3018 = vperm.xlu1 %7543, %v3007_v63  }
 0x479   : > { %3083 = vperm.xlu0 %7550, %v3072_v54  }
 0x47a   : > { %v2922_v55 = vpop.permute.xlu1 %2921 }
 0x47b   : > { %v3145_v57 = vmax.f32 %v9698_v18, %v2922_v55  ;;  %v2948_v25 = vpop.permute.xlu0 %2947 }
 0x47d   : > { %3187 = vperm.xlu2 %7553, %v3145_v57  }
 0x480   : > { %3031 = vperm.xlu1 %7543, %v3020_v41  }
 0x481   : > { %7551 = vset.pattern.permute.xlu0 %v12221_v59 }
 0x482   : > { %3177 = vperm.xlu0 %7551, %v3143_v52   ;;  %v12439_v52 = vld [vmem:[#allocation51_spill] sm:$0xff] }
 0x485   : > { %3197 = vperm.xlu2 %7553, %v3147_v14  }
 0x488   : > { %7545 = vset.pattern.permute.xlu1 %v9555_v50 }
 0x48a   : > { %v2928_v11 = vpop.permute.xlu1 %2927 }
 0x48b   : > { %v2967_v43 = vpop.permute.xlu0 %2966 }
 0x48d   : > { %3212 = vperm.xlu2 %7553, %v3150_v16  }
 0x490   : > { %3038 = vperm.xlu1 %7545, %v3033_v28  }
 0x492   : > { %v2941_v18 = vpop.permute.xlu1 %2940 }
 0x493   : > { %v3148_v17 = vmax.f32 %v9704_v6, %v2941_v18  ;;  %v12441_v18 = vld [vmem:[#allocation24_spill] sm:$0xff] }
 0x495   : > { %3202 = vperm.xlu0 %7551, %v3148_v17   ;;  %v9983_v17 = vunpack.i.l.bf16 %v12441_v18  ;;  %v12448_v18 = vld [vmem:[#allocation80_spill] sm:$0xff] }
 0x498   : > { %3051 = vperm.xlu1 %7545, %v3046_v2  }
 0x49b   : > { %v2987_v63 = vpop.permute.xlu0 %2986 }
 0x4a0   : > { %7547 = vset.pattern.permute.xlu1 %v9565_v12 }
 0x4a2   : > { %v2961_v60 = vpop.permute.xlu1 %2960 }
 0x4a3   : > { %v3151_v9 = vmax.f32 %v9728_v15, %v2961_v60 }
 0x4a5   : > { %3217 = vperm.xlu0 %7551, %v3151_v9   ;;  %v12443_v9 = vld [vmem:[#allocation48_spill] sm:$0xff] }
 0x4a8   : > { %3057 = vperm.xlu1 %7547, %v3046_v2  }
 0x4aa   : > { %v2974_v26 = vpop.permute.xlu1 %2973 }
 0x4ab   : > { %v3153_v13 = vmax.f32 %v9742_v51, %v2974_v26  ;;  %v3006_v51 = vpop.permute.xlu0 %3005  ;;  %v9993_v26 = vunpack.i.l.bf16 %v12443_v9 }
 0x4ad   : > { %3227 = vperm.xlu2 %7553, %v3153_v13  }
 0x4b0   : > { %3070 = vperm.xlu1 %7547, %v3059_v56   ;;  %v9961_v56 = vpop.permute.xlu2 %3109 }
 0x4b8   : > { %7549 = vset.pattern.permute.xlu1 %v9555_v50 }
 0x4ba   : > { %v2980_v6 = vpop.permute.xlu1 %2979 }
 0x4bb   : > { %v3154_v41 = vmax.f32 %v9752_v32, %v2980_v6  ;;  %v9965_v32 = vpop.permute.xlu0 %3025 }
 0x4bd   : > { %3232 = vperm.xlu0 %7551, %v3154_v41  }
 0x4c0   : > { %3077 = vperm.xlu1 %7549, %v3072_v54  }
 0x4c2   : > { %v2993_v28 = vpop.permute.xlu1 %2992 }
 0x4c3   : > { %v3156_v15 = vmax.f32 %v9766_v35, %v2993_v28  ;;  %v3144_v35 = vmax.f32 %v9676_v21, %v2915_v36  ;;  %v12440_v21 = vld [vmem:[#allocation59_spill] sm:$0xff]  ;;  %v12444_v28 = vld [vmem:[#allocation53_spill] sm:$0xff] }
 0x4c5   : > { %3242 = vperm.xlu2 %7553, %v3156_v15  }
 0x4c8   : > { %3090 = vperm.xlu1 %7549, %v3085_v1  }
 0x4cb   : > { %v3045_v3 = vpop.permute.xlu0 %3044 }
 0x4d0   : > { %3103 = vperm.xlu1 %7549, %v3098_v61  }
 0x4d2   : > { %v3000_v55 = vpop.permute.xlu1 %2999 }
 0x4d3   : > { %v3157_v54 = vmax.f32 %v9776_v53, %v3000_v55  ;;  %v3146_v53 = vmax.f32 %v9668_v8, %v2928_v11  ;;  %v3149_v8 = vmax.f32 %v9722_v44, %v2948_v25  ;;  %v3152_v44 = vmax.f32 %v9746_v5, %v2967_v43 }
 0x4d4   : > { %v3158_v5 = vmax.f32 %v9794_v31, %v3006_v51  ;;  %v12447_v31 = vld [vmem:[#allocation62_spill] sm:$0xff] }
 0x4d5   : > { %3247 = vperm.xlu0 %7551, %v3157_v54   ;;  %v12445_v54 = vld [vmem:[#allocation52_spill] sm:$0xff] }
 0x4d7   : > { %v9969_v57 = vpop.permute.xlu2 %3187 }
 0x4d8   : > { %v3337_v45 = vsub.f32 %v12439_v52, %v9969_v57  ;;  %7552 = vset.pattern.permute.xlu1 %v12221_v59 }
 0x4d9   : > { %3182 = vperm.xlu1 %7552, %v3144_v35  }
 0x4da   : > { %v3371_v1 = vmul.f32 1.442695, %v3337_v45  ;;  %v3013_v14 = vpop.permute.xlu1 %3012 }
 0x4db   : > { %v3159_v61 = vmax.f32 %v9790_v37, %v3013_v14  ;;  %v3065_v60 = vpop.permute.xlu0 %3064  ;;  %v12442_v37 = vld [vmem:[#allocation26_spill] sm:$0xff] }
 0x4dc   : > { %7572 = vpow2.f32 %v3371_v1  ;;  %v10010_v1 = vunpack.i.h.bf16 %v12393_v34  ;;  %v3161_v34 = vmax.f32 %v9818_v49, %v9965_v32 }
 0x4dd   : > { %3257 = vperm.xlu2 %7553, %v3159_v61  }
 0x4df   : > { %v9976_v30 = vpop.permute.xlu2 %3197 }
 0x4e0   : > { %v3339_v36 = vsub.f32 %v12440_v21, %v9976_v30 }
 0x4e1   : > { %3192 = vperm.xlu1 %7552, %v3146_v53  }
 0x4e2   : > { %v9980_v16 = vpop.eup %7572  ;;  %v3375_v2 = vmul.f32 1.442695, %v3339_v36 }
 0x4e3   : > { %7372 = vmatmul.msk.f32.vlgmr.msrb.gmra.mxu1 %vm2571_vm3, %v9980_v16 }
 0x4e4   : > { %7574 = vpow2.f32 %v3375_v2  ;;  %5176 = vmatpush.msrb.mxu1 %v9983_v17  ;;  %v3164_v2 = vmax.f32 %v9830_v24, %v3045_v3  ;;  %v12450_v24 = vld [vmem:[#allocation56_spill] sm:$0xff] }
 0x4e6   : > { %5177 = vmatpush.msrb.mxu1 %v12442_v37  ;;  %v3167_v37 = vmax.f32 %v9836_v10, %v3065_v60 }
 0x4e9   : > { %3207 = vperm.xlu1 %7552, %v3149_v8  }
 0x4ea   : > { %v9990_v11 = vpop.eup %7574  ;;  %v3019_v13 = vpop.permute.xlu1 %3018 }
 0x4eb   : > { %v3084_v6 = vpop.permute.xlu0 %3083  ;;  %v3160_v41 = vmax.f32 %v9800_v7, %v3019_v13  ;;  %7374 = vmatmul.msk.f32.vlgmr.msrb.gmra.mxu2 %vm2571_vm3, %v9990_v11  ;;  %v3155_v7 = vmax.f32 %v9770_v29, %v2987_v63  ;;  %v12446_v29 = vld [vmem:[#allocation25_spill] sm:$0xff] }
 0x4ec   : > { %5211 = vmatpush.msrb.mxu2 %v9993_v26  ;;  %v3170_v3 = vmax.f32 %v9842_v33, %v3084_v6 }
 0x4ed   : > { %3262 = vperm.xlu0 %7551, %v3160_v41  }
 0x4ee   : > { %5212 = vmatpush.msrb.mxu2 %v12444_v28 }
 0x4f1   : > { %3222 = vperm.xlu1 %7552, %v3152_v44  }
 0x4f2   : > { %v3032_v25 = vpop.permute.xlu1 %3031 }
 0x4f3   : > { %v3162_v15 = vmax.f32 %v9814_v47, %v3032_v25  ;;  %v10015_v47 = vpop.permute.xlu2 %3212 }
 0x4f4   : > { %v10002_v55 = vpop.permute.xlu0 %3177 }
 0x4f5   : > { %v3335_v35 = vsub.f32 %v12445_v54, %v10002_v55  ;;  %3272 = vperm.xlu2 %7553, %v3162_v15   ;;  %v12451_v15 = vld [vmem:[#allocation22_spill] sm:$0xff] }
 0x4f7   : > { %v3367_v52 = vmul.f32 1.442695, %v3335_v35 }
 0x4f9   : > { %7576 = vpow2.f32 %v3367_v52  ;;  %3237 = vperm.xlu1 %7552, %v3155_v7  }
 0x4ff   : > { %v10007_v45 = vpop.eup %7576 }
 0x500   : > { %7370 = vmatmul.msk.f32.vlgmr.msra.gmra.mxu3 %vm2571_vm3, %v10007_v45 }
 0x501   : > { %5141 = vmatpush.msra.mxu3 %v10010_v1  ;;  %3252 = vperm.xlu1 %7552, %v3158_v5  }
 0x502   : > { %v3039_v43 = vpop.permute.xlu1 %3038 }
 0x503   : > { %5142 = vmatpush.msra.mxu3 %v12446_v29  ;;  %v3163_v63 = vmax.f32 %v9820_v40, %v3039_v43  ;;  %v3172_v29 = vmax.f32 %v9844_v39, %v9957_v23  ;;  %v12453_v23 = vld [vmem:[#allocation61_spill] sm:$0xff] }
 0x505   : > { %3277 = vperm.xlu0 %7551, %v3163_v63  }
 0x507   : > { %v10022_v14 = vpop.permute.xlu0 %3202  ;;  %v10026_v61 = vpop.permute.xlu2 %3227 }
 0x508   : > { %v3340_v51 = vsub.f32 %v12447_v31, %v10022_v14  ;;  %v3345_v40 = vsub.f32 %v12448_v18, %v10026_v61  ;;  %v3174_v31 = vmax.f32 %v9846_v0, %v9961_v56  ;;  %v3431_v18 = vperm.slane %v10002_v55, %v9574_v46 }
 0x509   : > { %3267 = vperm.xlu1 %7552, %v3161_v34   ;;  %v10072_v34 = vunpack.i.l.bf16 %v9654_v27 }
 0x50a   : > { %v3377_v53 = vmul.f32 1.442695, %v3340_v51  ;;  %v3052_v21 = vpop.permute.xlu1 %3051  ;;  %v3387_v49 = vmul.f32 1.442695, %v3345_v40  ;;  %v12454_v40 = vld [vmem:[#allocation60_spill] sm:$0xff] }
 0x50b   : > { %v3165_v36 = vmax.f32 %v9826_v62, %v3052_v21  ;;  %v12449_v62 = vld [vmem:[#allocation75_spill] sm:$0xff] }
 0x50c   : > { %7578 = vpow2.f32 %v3377_v53  ;;  %v10040_v13 = vunpack.i.l.bf16 %v12449_v62 }
 0x50d   : > { %3287 = vperm.xlu2 %7553, %v3165_v36   ;;  %7580 = vpow2.f32 %v3387_v49  ;;  %v3434_v36 = vperm.slane %v9969_v57, %v9574_v46  ;;  %v12455_v57 = vld [vmem:[#allocation76_spill] sm:$0xff] }
 0x511   : > { %3282 = vperm.xlu1 %7552, %v3164_v2  }
 0x512   : > { %v10032_v32 = vpop.eup %7578 }
 0x513   : > { %7375 = vmatmul.msk.f32.gmra.mxu2 %vm2571_vm3, %v10032_v32  ;;  %v10037_v8 = vpop.eup %7580 }
 0x517   : > { %v10049_v44 = vpop.permute.xlu0 %3217 }
 0x519   : > { %3297 = vperm.xlu1 %7552, %v3167_v37   ;;  %v3437_v37 = vperm.slane %v9976_v30, %v9574_v46 }
 0x51a   : > { %v3058_v41 = vpop.permute.xlu1 %3057 }
 0x51b   : > { %v3166_v28 = vmax.f32 %v9832_v20, %v3058_v41  ;;  %7380 = vmatmul.msk.f32.vlgmr.msra.gmra.mxu2 %vm2571_vm3, %v10037_v8 }
 0x51c   : > { %5316 = vmatpush.msra.mxu2 %v10040_v13 }
 0x51d   : > { %3292 = vperm.xlu0 %7551, %v3166_v28  }
 0x51e   : > { %5317 = vmatpush.msra.mxu2 %v12450_v24 }
 0x51f   : > { %v10051_v25 = vpop.permute.xlu2 %3242 }
 0x521   : > { %3312 = vperm.xlu1 %7552, %v3170_v3  }
 0x522   : > { %v3071_v10 = vpop.permute.xlu1 %3070 }
 0x523   : > { %v3168_v60 = vmax.f32 %v9834_v38, %v3071_v10  ;;  %v3343_v10 = vsub.f32 %v12455_v57, %v10049_v44  ;;  %v12461_v57 = vld [vmem:[#allocation49_spill] sm:$0xff] }
 0x525   : > { %3302 = vperm.xlu2 %7553, %v3168_v60  }
 0x52f   : > { %v10053_v20 = vpop.permute.xlu0 %3232 }
 0x530   : > { %v3346_v54 = vsub.f32 %v12451_v15, %v10053_v20  ;;  %v3383_v15 = vmul.f32 1.442695, %v3343_v10 }
 0x532   : > { %v3389_v35 = vmul.f32 1.442695, %v3346_v54  ;;  %v3078_v7 = vpop.permute.xlu1 %3077 }
 0x533   : > { %v3169_v52 = vmax.f32 %v9838_v19, %v3078_v7 }
 0x534   : > { %7582 = vpow2.f32 %v3389_v35  ;;  %v12456_v35 = vld [vmem:[#allocation66_spill] sm:$0xff] }
 0x535   : > { %3307 = vperm.xlu0 %7551, %v3169_v52  }
 0x537   : > { %v10058_v33 = vpop.permute.xlu2 %3257 }
 0x538   : > { %v3351_v38 = vsub.f32 %v9067_v48, %v10058_v33 }
 0x53a   : > { %v10062_v6 = vpop.eup %7582  ;;  %v3399_v5 = vmul.f32 1.442695, %v3351_v38  ;;  %v3091_v43 = vpop.permute.xlu1 %3090 }
 0x53b   : > { %v3171_v63 = vmax.f32 %v9840_v42, %v3091_v43  ;;  %7381 = vmatmul.msk.f32.gmra.mxu2 %vm2571_vm3, %v10062_v6  ;;  %v12452_v42 = vld [vmem:[#allocation84_spill] sm:$0xff] }
 0x53c   : > { %7584 = vpow2.f32 %v3399_v5  ;;  %v12457_v5 = vld [vmem:[#allocation71_spill] sm:$0xff] }
 0x53d   : > { %3317 = vperm.xlu2 %7553, %v3171_v63   ;;  %3322 = vperm.xlu0 %7551, %v3172_v29   ;;  %v3342_v43 = vsub.f32 %v12457_v5, %v10015_v47 }
 0x542   : > { %v10069_v19 = vpop.eup %7584  ;;  %v3104_v48 = vpop.permute.xlu1 %3103 }
 0x543   : > { %v3173_v51 = vmax.f32 %v9848_v58, %v3104_v48  ;;  %7386 = vmatmul.msk.f32.vlgmr.msrb.gmra.mxu2 %vm2571_vm3, %v10069_v19  ;;  %v3438_v58 = vperm.slane %v10022_v14, %v9851_v4 }
 0x544   : > { %5421 = vmatpush.msrb.mxu2 %v10072_v34 }
 0x545   : > { %3327 = vperm.xlu1 %7552, %v3173_v51   ;;  %3332 = vperm.xlu2 %7553, %v3174_v31   ;;  %v3439_v3 = vsel %vm2799_vm6, %v3438_v58, %v3437_v37  ;;  %v3441_v51 = vperm.slane %v10015_v47, %v9851_v4  ;;  %v12458_v58 = vld [vmem:[#allocation85_spill] sm:$0xff]  ;;  %v10134_v47 = vunpack.i.h.bf16 %v12443_v9 }
 0x546   : > { %5422 = vmatpush.msrb.mxu2 %v12452_v42 }
 0x547   : > { %v10102_v55 = vpop.permute.xlu0 %3247 }
 0x54b   : > { %v3183_v39 = vpop.permute.xlu1 %3182 }
 0x54c   : > { %v3336_v53 = vsub.f32 %v12453_v23, %v3183_v39  ;;  %v3432_v0 = vperm.slane %v3183_v39, %v9851_v4  ;;  %v3381_v39 = vmul.f32 1.442695, %v3342_v43  ;;  %v3447_v23 = vperm.slane %v10053_v20, %v9851_v4 }
 0x54d   : > { %7554 = vset.pattern.permute.xlu1 %v9555_v50  ;;  %7555 = vset.pattern.permute.xlu2 %v9565_v12 }
 0x54e   : > { %v3369_v21 = vmul.f32 1.442695, %v3336_v53  ;;  %v3433_v28 = vsel %vm2799_vm6, %v3432_v0, %v3431_v18  ;;  %v3443_v0 = vperm.slane %v10049_v44, %v9574_v46  ;;  %v3446_v18 = vperm.slane %v10026_v61, %v9574_v46 }
 0x54f   : > { %v10113_v29 = vpop.permute.xlu2 %3272 }
 0x550   : > { %7586 = vpow2.f32 %v3369_v21  ;;  %v3448_v9 = vsel %vm2799_vm6, %v3447_v23, %v3446_v18  ;;  %v12466_v18 = vld [vmem:[#allocation19_spill] sm:$0xff] }
 0x553   : > { %v3193_v56 = vpop.permute.xlu1 %3192 }
 0x554   : > { %v3338_v2 = vsub.f32 %v12454_v40, %v3193_v56  ;;  %v3435_v49 = vperm.slane %v3193_v56, %v9851_v4  ;;  %v12459_v40 = vld [vmem:[#allocation55_spill] sm:$0xff] }
 0x556   : > { %v10095_v41 = vpop.eup %7586  ;;  %v3373_v24 = vmul.f32 1.442695, %v3338_v2  ;;  %v3436_v14 = vsel %vm2799_vm6, %v3435_v49, %v3434_v36  ;;  %v10141_v2 = vunpack.i.l.bf16 %v12459_v40 }
 0x557   : > { %v3479_v60 = vsel %vm2846_vm7, %v3436_v14, %v3433_v28  ;;  %7371 = vmatmul.msk.f32.gmra.mxu3 %vm2571_vm3, %v10095_v41  ;;  %v12460_v28 = vld [vmem:[#allocation45_spill] sm:$0xff] }
 0x558   : > { %7588 = vpow2.f32 %v3373_v24  ;;  %v3480_v30 = vsel %vm2848_vm8, %v3439_v3, %v3479_v60  ;;  %v3348_v24 = vsub.f32 %v12460_v28, %v10051_v25  ;;  %v3837_v3 = vsel %vm2571_vm3, %v9980_v16, 0.0  ;;  %v12465_v16 = vld [vmem:[#allocation33_spill] sm:$0xff] }
 0x559   : > { %7590 = vpow2.f32 %v3383_v15 }
 0x55a   : > { %v3393_v5 = vmul.f32 1.442695, %v3348_v24 }
 0x55b   : > { %v3208_v54 = vpop.permute.xlu1 %3207 }
 0x55c   : > { %v3341_v7 = vsub.f32 %v12456_v35, %v3208_v54  ;;  %v3440_v63 = vperm.slane %v3208_v54, %v9574_v46 }
 0x55e   : > { %v10109_v52 = vpop.eup %7588  ;;  %v3379_v38 = vmul.f32 1.442695, %v3341_v7  ;;  %v3442_v53 = vsel %vm2799_vm6, %v3441_v51, %v3440_v63  ;;  %v12463_v7 = vld [vmem:[#allocation58_spill] sm:$0xff] }
 0x55f   : > { %v10116_v48 = vpop.permute.xlu0 %3262  ;;  %7373 = vmatmul.msk.f32.gmra.mxu1 %vm2571_vm3, %v10109_v52  ;;  %v3481_v44 = vsel %vm2850_vm9, %v3442_v53, %v3480_v30  ;;  %v12462_v30 = vld [vmem:[#allocation34_spill] sm:$0xff]  ;;  %v3834_v53 = vsel %vm2571_vm3, %v10095_v41, 0.0 }
 0x560   : > { %7592 = vpow2.f32 %v3379_v38  ;;  %v3352_v31 = vsub.f32 %v9140_v22, %v10116_v48  ;;  %v10131_v22 = vpop.eup %7590  ;;  %v3349_v15 = vsub.f32 %v12462_v30, %v10102_v55  ;;  %v12464_v38 = vld [vmem:[#allocation57_spill] sm:$0xff] }
 0x562   : > { %v3401_v42 = vmul.f32 1.442695, %v3352_v31  ;;  %v3395_v51 = vmul.f32 1.442695, %v3349_v15 }
 0x563   : > { %v3223_v21 = vpop.permute.xlu1 %3222 }
 0x564   : > { %7594 = vpow2.f32 %v3401_v42  ;;  %v3344_v56 = vsub.f32 %v12458_v58, %v3223_v21  ;;  %v3444_v36 = vperm.slane %v3223_v21, %v9851_v4  ;;  %v3831_v42 = vsel %vm2571_vm3, %v10007_v45, 0.0 }
 0x565   : > { %7596 = vpow2.f32 %v3381_v39  ;;  %v3861_v45 = vsel %vm2571_vm3, %v10037_v8, 0.0 }
 0x566   : > { %v10138_v20 = vpop.eup %7592  ;;  %v3385_v49 = vmul.f32 1.442695, %v3344_v56  ;;  %v3445_v37 = vsel %vm2799_vm6, %v3444_v36, %v3443_v0  ;;  %v3450_v0 = vperm.slane %v10051_v25, %v9851_v4  ;;  %v3452_v36 = vperm.slane %v10102_v55, %v9574_v46 }
 0x567   : > { %7376 = vmatmul.msk.f32.vlgmr.msrb.gmra.mxu3 %vm2571_vm3, %v10138_v20  ;;  %7378 = vmatmul.msk.f32.vlgmr.msra.gmra.mxu1 %vm2571_vm3, %v10131_v22  ;;  %v10152_v61 = vpop.permute.xlu2 %3287  ;;  %v3482_v14 = vsel %vm2852_vm10, %v3445_v37, %v3481_v44  ;;  %v12467_v44 = vld [vmem:[#allocation88_spill] sm:$0xff]  ;;  %v3840_v37 = vsel %vm2571_vm3, %v10109_v52, 0.0  ;;  %v3846_v55 = vsel %vm2571_vm3, %v10032_v32, 0.0 }
 0x568   : > { %7598 = vpow2.f32 %v3385_v49  ;;  %5246 = vmatpush.msrb.mxu3 %v10134_v47  ;;  %5281 = vmatpush.msra.mxu1 %v10141_v2  ;;  %v3357_v10 = vsub.f32 %v12461_v57, %v10152_v61  ;;  %v3483_v60 = vsel %vm2854_vm11, %v3448_v9, %v3482_v14  ;;  %v10196_v49 = vunpack.i.h.bf16 %v12449_v62  ;;  %v12468_v9 = vld [vmem:[#allocation42_spill] sm:$0xff]  ;;  %v12469_v62 = vld [vmem:[#allocation81_spill] sm:$0xff] }
 0x569   : > { %3838 = vadd.xlane.f32.xlu0 %v3837_v3 }
 0x56a   : > { %v10164_v54 = vpop.eup %7594  ;;  %v3411_v35 = vmul.f32 1.442695, %v3357_v10  ;;  %5247 = vmatpush.msrb.mxu3 %v12463_v7  ;;  %5282 = vmatpush.msra.mxu1 %v12464_v38  ;;  %v10210_v10 = vunpack.i.l.bf16 %v12469_v62  ;;  %v12472_v7 = vld [vmem:[#allocation82_spill] sm:$0xff] }
 0x56b   : > { %v3238_v43 = vpop.permute.xlu1 %3237  ;;  %7387 = vmatmul.msk.f32.gmra.mxu2 %vm2571_vm3, %v10164_v54  ;;  %v7597_v31 = vpop.eup %7596 }
 0x56c   : > { %7600 = vpow2.f32 %v3411_v35  ;;  %v3347_v63 = vsub.f32 %v12465_v16, %v3238_v43  ;;  %v3449_v21 = vperm.slane %v3238_v43, %v9574_v46  ;;  %v12471_v35 = vld [vmem:[#allocation79_spill] sm:$0xff] }
 0x56d   : > { %7602 = vpow2.f32 %v3393_v5  ;;  %v12473_v5 = vld [vmem:[#allocation43_spill] sm:$0xff] }
 0x56e   : > { %v10173_v39 = vpop.eup %7598  ;;  %v3391_v23 = vmul.f32 1.442695, %v3347_v63  ;;  %3832 = vadd.xlane.f32.xlu2 %v3831_v42  ;;  %v3451_v56 = vsel %vm2799_vm6, %v3450_v0, %v3449_v21  ;;  %v3843_v63 = vsel %vm2571_vm3, %v9990_v11, 0.0  ;;  %v12475_v11 = vld [vmem:[#allocation32_spill] sm:$0xff] }
 0x56f   : > { %3835 = vadd.xlane.f32.xlu1 %v3834_v53  ;;  %7377 = vmatmul.msk.f32.gmra.mxu3 %vm2571_vm3, %v7597_v31  ;;  %v3484_v3 = vsel %vm2856_vm12, %v3451_v56, %v3483_v60  ;;  %v12470_v60 = vld [vmem:[#allocation54_spill] sm:$0xff]  ;;  %v12474_v53 = vld [vmem:[#allocation39_spill] sm:$0xff]  ;;  %v3849_v56 = vsel %vm2571_vm3, %v10138_v20, 0.0 }
 0x570   : > { %7604 = vpow2.f32 %v3391_v23  ;;  %7379 = vmatmul.msk.f32.gmra.mxu1 %vm2571_vm3, %v10173_v39  ;;  %v3852_v23 = vsel %vm2571_vm3, %v7597_v31, 0.0  ;;  %v3354_v21 = vsub.f32 %v12474_v53, %v10113_v29  ;;  %v12476_v20 = vld [vmem:[#allocation30_spill] sm:$0xff] }
 0x571   : > { %7606 = vpow2.f32 %v3395_v51  ;;  %3862 = vadd.xlane.f32.xlu0 %v3861_v45 }
 0x572   : > { %v10185_v58 = vpop.eup %7600  ;;  %v3405_v45 = vmul.f32 1.442695, %v3354_v21 }
 0x573   : > { %v3253_v41 = vpop.permute.xlu1 %3252  ;;  %7392 = vmatmul.msk.f32.vlgmr.msra.gmra.mxu2 %vm2571_vm3, %v10185_v58  ;;  %v7603_v25 = vpop.eup %7602 }
 0x574   : > { %v3350_v40 = vsub.f32 %v12466_v18, %v3253_v41  ;;  %v3453_v8 = vperm.slane %v3253_v41, %v9851_v4  ;;  %5991 = vmatpush.msra.mxu2 %v12467_v44  ;;  %v3870_v32 = vsel %vm2571_vm3, %v7603_v25, 0.0  ;;  %v12478_v44 = vld [vmem:[#allocation37_spill] sm:$0xff] }
 0x576   : > { %v10200_v28 = vpop.eup %7604  ;;  %v3397_v24 = vmul.f32 1.442695, %v3350_v40  ;;  %5992 = vmatpush.msra.mxu2 %v12468_v9  ;;  %3841 = vadd.xlane.f32.xlu2 %v3840_v37  ;;  %v3454_v14 = vsel %vm2799_vm6, %v3453_v8, %v3452_v36  ;;  %v10246_v36 = vunpack.i.h.bf16 %v9654_v27  ;;  %v3858_v40 = vsel %vm2571_vm3, %v10173_v39, 0.0  ;;  %v12477_v27 = vld [vmem:[#allocation83_spill] sm:$0xff]  ;;  %v12479_v39 = vld [vmem:[#allocation74_spill] sm:$0xff] }
 0x577   : > { %v10207_v57 = vpop.eup %7606  ;;  %v10212_v30 = vpop.permute.xlu0 %3277  ;;  %3847 = vadd.xlane.f32.xlu1 %v3846_v55  ;;  %7382 = vmatmul.msk.f32.vlgmr.msra.gmra.mxu3 %vm2571_vm3, %v10200_v28  ;;  %v10217_v52 = vsel %vm2858_vm13, %v3454_v14, %v3484_v3  ;;  %v3855_v55 = vsel %vm2571_vm3, %v10131_v22, 0.0  ;;  %v3867_v62 = vsel %vm2571_vm3, %v10200_v28, 0.0  ;;  %v3864_v28 = vsel %vm2571_vm3, %v10062_v6, 0.0 }
 0x578   : > { %7608 = vpow2.f32 %v3397_v24  ;;  %7384 = vmatmul.msk.f32.vlgmr.msrb.gmra.mxu1 %vm2571_vm3, %v10207_v57  ;;  %5351 = vmatpush.msra.mxu3 %v10196_v49  ;;  %v3355_v15 = vsub.f32 %v12470_v60, %v10212_v30  ;;  %v12480_v60 = vld [vmem:[#allocation72_spill] sm:$0xff]  ;;  %v3873_v6 = vsel %vm2571_vm3, %v10207_v57, 0.0  ;;  %v12486_v57 = vld [vmem:[#allocation70_spill] sm:$0xff] }
 0x579   : > { %5386 = vmatpush.msrb.mxu1 %v10210_v10  ;;  %3871 = vadd.xlane.f32.xlu0 %v3870_v32 }
 0x57a   : > { %5352 = vmatpush.msra.mxu3 %v12471_v35  ;;  %v3407_v16 = vmul.f32 1.442695, %v3355_v15  ;;  %v12481_v35 = vld [vmem:[#allocation77_spill] sm:$0xff] }
 0x57b   : > { %5387 = vmatpush.msrb.mxu1 %v12472_v7  ;;  %v10228_v38 = vpop.permute.xlu1 %3267 }
 0x57c   : > { %v3353_v43 = vsub.f32 %v12473_v5, %v10228_v38 }
 0x57e   : > { %v7609_v51 = vpop.eup %7608  ;;  %v3403_v42 = vmul.f32 1.442695, %v3353_v43  ;;  %3844 = vadd.xlane.f32.xlu2 %v3843_v63 }
 0x57f   : > { %3853 = vadd.xlane.f32.xlu1 %v3852_v23  ;;  %7383 = vmatmul.msk.f32.gmra.mxu3 %vm2571_vm3, %v7603_v25  ;;  %v10265_v9 = vpop.permute.xlu2 %3302  ;;  %v12483_v23 = vld [vmem:[#allocation73_spill] sm:$0xff] }
 0x580   : > { %7610 = vpow2.f32 %v3403_v42  ;;  %7385 = vmatmul.msk.f32.gmra.mxu1 %vm2571_vm3, %v7609_v51  ;;  %v3360_v15 = vsub.f32 %v12480_v60, %v10265_v9  ;;  %v12482_v42 = vld [vmem:[#allocation86_spill] sm:$0xff] }
 0x581   : > { %7612 = vpow2.f32 %v3407_v16  ;;  %v3876_v16 = vsel %vm2571_vm3, %v7609_v51, 0.0 }
 0x582   : > { %7614 = vpow2.f32 %v3405_v45  ;;  %v3417_v5 = vmul.f32 1.442695, %v3360_v15  ;;  %v3456_v15 = vperm.slane %v10116_v48, %v9851_v4  ;;  %v12489_v48 = vld [vmem:[#allocation64_spill] sm:$0xff] }
 0x583   : > { %v10239_v0 = vpop.permute.xlu1 %3282 }
 0x584   : > { %v3356_v41 = vsub.f32 %v12475_v11, %v10239_v0  ;;  %v12484_v11 = vld [vmem:[#allocation41_spill] sm:$0xff]  ;;  %v3462_v60 = vperm.slane %v10239_v0, %v9851_v4 }
 0x586   : > { %v7611_v31 = vpop.eup %7610  ;;  %v3409_v18 = vmul.f32 1.442695, %v3356_v41  ;;  %3850 = vadd.xlane.f32.xlu2 %v3849_v56 }
 0x587   : > { %v10250_v8 = vpop.eup %7612  ;;  %3859 = vadd.xlane.f32.xlu1 %v3858_v40  ;;  %7388 = vmatmul.msk.f32.vlgmr.msrb.gmra.mxu3 %vm2571_vm3, %v7611_v31  ;;  %v3885_v41 = vsel %vm2571_vm3, %v7611_v31, 0.0  ;;  %v12485_v40 = vld [vmem:[#allocation36_spill] sm:$0xff]  ;;  %v12487_v31 = vld [vmem:[#allocation47_spill] sm:$0xff] }
 0x588   : > { %7616 = vpow2.f32 %v3409_v18  ;;  %7390 = vmatmul.msk.f32.vlgmr.msra.gmra.mxu1 %vm2571_vm3, %v10250_v8  ;;  %5456 = vmatpush.msrb.mxu3 %v10246_v36  ;;  %v10263_v24 = vpop.eup %7614 }
 0x589   : > { %5962 = vmatpush.msra.mxu1 %v12476_v20 }
 0x58a   : > { %5457 = vmatpush.msrb.mxu3 %v12477_v27  ;;  %v3882_v27 = vsel %vm2571_vm3, %v10164_v54, 0.0  ;;  %v3891_v54 = vsel %vm2571_vm3, %v10250_v8, 0.0  ;;  %v3455_v8 = vperm.slane %v10058_v33, %v9574_v46 }
 0x58b   : > { %5963 = vmatpush.msra.mxu1 %v12478_v44  ;;  %v10259_v25 = vpop.permute.xlu1 %3297 }
 0x58c   : > { %v3359_v37 = vsub.f32 %v12479_v39, %v10259_v25 }
 0x58e   : > { %v7617_v14 = vpop.eup %7616  ;;  %v3415_v3 = vmul.f32 1.442695, %v3359_v37  ;;  %3856 = vadd.xlane.f32.xlu2 %v3855_v55  ;;  %v12488_v37 = vld [vmem:[#allocation63_spill] sm:$0xff] }
 0x58f   : > { %v10271_v32 = vpop.permute.xlu0 %3292  ;;  %3868 = vadd.xlane.f32.xlu1 %v3867_v62  ;;  %7389 = vmatmul.msk.f32.gmra.mxu3 %vm2571_vm3, %v10263_v24  ;;  %v3894_v44 = vsel %vm2571_vm3, %v7617_v14, 0.0  ;;  %v3458_v62 = vperm.slane %v10228_v38, %v9574_v46 }
 0x590   : > { %7618 = vpow2.f32 %v3415_v3  ;;  %v3358_v7 = vsub.f32 %v12481_v35, %v10271_v32  ;;  %7391 = vmatmul.msk.f32.gmra.mxu1 %vm2571_vm3, %v7617_v14  ;;  %v3459_v14 = vperm.slane %v10113_v29, %v9851_v4  ;;  %v3465_v35 = vperm.slane %v10271_v32, %v9851_v4 }
 0x591   : > { %v3464_v29 = vperm.slane %v10152_v61, %v9574_v46  ;;  %v3467_v61 = vperm.slane %v10259_v25, %v9574_v46 }
 0x592   : > { %v3413_v22 = vmul.f32 1.442695, %v3358_v7  ;;  %v3461_v7 = vperm.slane %v10212_v30, %v9574_v46 }
 0x593   : > { %v3313_v18 = vpop.permute.xlu1 %3312 }
 0x594   : > { %7620 = vpow2.f32 %v3413_v22  ;;  %v3362_v20 = vsub.f32 %v12486_v57, %v3313_v18  ;;  %v3460_v22 = vsel %vm2799_vm6, %v3459_v14, %v3458_v62  ;;  %v3463_v32 = vsel %vm2799_vm6, %v3462_v60, %v3461_v7 }
 0x595   : > { %7622 = vpow2.f32 %v3417_v5 }
 0x596   : > { %v7619_v43 = vpop.eup %7618  ;;  %3865 = vadd.xlane.f32.xlu2 %v3864_v28 }
 0x597   : > { %3877 = vadd.xlane.f32.xlu1 %v3876_v16  ;;  %7394 = vmatmul.msk.f32.vlgmr.msra.gmra.mxu3 %vm2571_vm3, %v7619_v43  ;;  %v10284_v63 = vpop.permute.xlu2 %3317  ;;  %v3903_v38 = vsel %vm2571_vm3, %v7619_v43, 0.0  ;;  %v3457_v43 = vsel %vm2799_vm6, %v3456_v15, %v3455_v8  ;;  %v3466_v16 = vsel %vm2799_vm6, %v3465_v35, %v3464_v29  ;;  %v12493_v35 = vld [vmem:[#allocation28_spill] sm:$0xff] }
 0x598   : > { %6020 = vmatpush.msra.mxu3 %v12482_v42  ;;  %v3363_v53 = vsub.f32 %v12483_v23, %v10284_v63  ;;  %v3486_v33 = vsel %vm2846_vm7, %v3460_v22, %v3457_v43  ;;  %v3473_v57 = vperm.slane %v10284_v63, %v9574_v46  ;;  %v12494_v22 = vld [vmem:[#allocation89_spill] sm:$0xff]  ;;  %v3888_v43 = vsel %vm2571_vm3, %v10263_v24, 0.0 }
 0x59a   : > { %v7621_v21 = vpop.eup %7620  ;;  %v3423_v45 = vmul.f32 1.442695, %v3363_v53  ;;  %6021 = vmatpush.msra.mxu3 %v12484_v11  ;;  %v3471_v11 = vperm.slane %v3313_v18, %v9851_v4 }
 0x59b   : > { %7393 = vmatmul.msk.f32.gmra.mxu2 %vm2571_vm3, %v7621_v21  ;;  %v10293_v51 = vpop.eup %7622 }
 0x59c   : > { %7624 = vpow2.f32 %v3423_v45  ;;  %v3487_v45 = vsel %vm2848_vm8, %v3463_v32, %v3486_v33 }
 0x59e   : > { %3874 = vadd.xlane.f32.xlu2 %v3873_v6  ;;  %v12490_v6 = vld [vmem:[#allocation87_spill] sm:$0xff] }
 0x59f   : > { %3886 = vadd.xlane.f32.xlu1 %v3885_v41  ;;  %7395 = vmatmul.msk.f32.gmra.mxu3 %vm2571_vm3, %v10293_v51  ;;  %v3468_v41 = vperm.slane %v10265_v9, %v9851_v4  ;;  %v3333_v25 = vpop.permute.xlu2 %3332 }
 0x5a2   : > { %v10298_v56 = vpop.eup %7624  ;;  %3495 = vxpose.xlu0.b32.start [1/2] (short) (narrow) %v10217_v52, 16  ;;  %v3421_v52 = vmul.f32 1.442695, %v3362_v20  ;;  %v3900_v20 = vsel %vm2571_vm3, %v7621_v21, 0.0 }
 0x5a3   : > { %7398 = vmatmul.msk.f32.vlgmr.msrb.gmra.mxu2 %vm2571_vm3, %v10298_v56  ;;  %v3915_v24 = vsel %vm2571_vm3, %v10298_v56, 0.0 }
 0x5a4   : > { %6107 = vmatpush.msrb.mxu2 %v12485_v40  ;;  %v3488_v40 = vsel %vm2850_vm9, %v3466_v16, %v3487_v45 }
 0x5a6   : > { %6108 = vmatpush.msrb.mxu2 %v12487_v31  ;;  %3883 = vadd.xlane.f32.xlu2 %v3882_v27  ;;  %v12491_v31 = vld [vmem:[#allocation40_spill] sm:$0xff] }
 0x5a7   : > { %v3308_v39 = vpop.permute.xlu0 %3307  ;;  %3895 = vadd.xlane.f32.xlu1 %v3894_v44  ;;  %v3469_v44 = vsel %vm2799_vm6, %v3468_v41, %v3467_v61 }
 0x5a8   : > { %v3361_v55 = vsub.f32 %v12488_v37, %v3308_v39  ;;  %v3470_v30 = vperm.slane %v3308_v39, %v9574_v46  ;;  %v3477_v37 = vperm.slane %v3333_v25, %v9851_v4  ;;  %v3489_v21 = vsel %vm2852_vm10, %v3469_v44, %v3488_v40 }
 0x5aa   : > { %v3419_v3 = vmul.f32 1.442695, %v3361_v55  ;;  %v3472_v27 = vsel %vm2799_vm6, %v3471_v11, %v3470_v30  ;;  %v12492_v55 = vld [vmem:[#allocation69_spill] sm:$0xff]  ;;  %v3897_v30 = vsel %vm2571_vm3, %v10185_v58, 0.0 }
 0x5ac   : > { %7626 = vpow2.f32 %v3419_v3  ;;  %v3490_v3 = vsel %vm2854_vm11, %v3472_v27, %v3489_v21 }
 0x5ad   : > { %7628 = vpow2.f32 %v3421_v52 }
 0x5ae   : > { %3892 = vadd.xlane.f32.xlu2 %v3891_v54 }
 0x5af   : > { %v3323_v0 = vpop.permute.xlu0 %3322  ;;  %3904 = vadd.xlane.f32.xlu1 %v3903_v38  ;;  %v3366_v38 = vsub.f32 %v12493_v35, %v3333_v25 }
 0x5b0   : > { %v3364_v5 = vsub.f32 %v12489_v48, %v3323_v0  ;;  %v3474_v53 = vperm.slane %v3323_v0, %v9851_v4 }
 0x5b1   : > { %v3429_v0 = vmul.f32 1.442695, %v3366_v38 }
 0x5b2   : > { %v7627_v28 = vpop.eup %7626  ;;  %v3425_v42 = vmul.f32 1.442695, %v3364_v5  ;;  %v3475_v39 = vsel %vm2799_vm6, %v3474_v53, %v3473_v57  ;;  %v12495_v5 = vld [vmem:[#allocation44_spill] sm:$0xff] }
 0x5b3   : > { %v7629_v23 = vpop.eup %7628  ;;  %7396 = vmatmul.msk.f32.vlgmr.msrb.gmra.mxu1 %vm2571_vm3, %v7627_v28  ;;  %v3491_v14 = vsel %vm2856_vm12, %v3475_v39, %v3490_v3  ;;  %v3909_v7 = vsel %vm2571_vm3, %v7627_v28, 0.0  ;;  %v3879_v28 = vsel %vm2571_vm3, %v10069_v19, 0.0 }
 0x5b4   : > { %7630 = vpow2.f32 %v3425_v42  ;;  %6078 = vmatpush.msrb.mxu1 %v12490_v6  ;;  %v3912_v18 = vsel %vm2571_vm3, %v7629_v23, 0.0 }
 0x5b6   : > { %6079 = vmatpush.msrb.mxu1 %v12491_v31  ;;  %3901 = vadd.xlane.f32.xlu2 %v3900_v20 }
 0x5b7   : > { %v3328_v9 = vpop.permute.xlu1 %3327  ;;  %3913 = vadd.xlane.f32.xlu1 %v3912_v18 }
 0x5b8   : > { %v3365_v63 = vsub.f32 %v12492_v55, %v3328_v9  ;;  %v3476_v52 = vperm.slane %v3328_v9, %v9574_v46 }
 0x5ba   : > { %v7631_v62 = vpop.eup %7630  ;;  %v3427_v60 = vmul.f32 1.442695, %v3365_v63  ;;  %v3478_v54 = vsel %vm2799_vm6, %v3477_v37, %v3476_v52 }
 0x5bb   : > { %7397 = vmatmul.msk.f32.gmra.mxu1 %vm2571_vm3, %v7629_v23  ;;  %7399 = vmatmul.msk.f32.gmra.mxu2 %vm2571_vm3, %v7631_v62  ;;  %v3492_v15 = vsel %vm2858_vm13, %v3478_v54, %v3491_v14  ;;  %v3918_v48 = vsel %vm2571_vm3, %v7631_v62, 0.0  ;;  %v3906_v23 = vsel %vm2571_vm3, %v10293_v51, 0.0 }
 0x5bc   : > { %7632 = vpow2.f32 %v3427_v60  ;;  %3496 = vxpose.xlu0.b32.end [2/2] (short) (narrow) %v3492_v15, 16 }
 0x5bd   : > { %7634 = vpow2.f32 %v3429_v0 }
 0x5be   : > { %3910 = vadd.xlane.f32.xlu2 %v3909_v7 }
 0x5c2   : > { %v7633_v8 = vpop.eup %7632 }
 0x5c3   : > { %7400 = vmatmul.msk.f32.vlgmr.msrb.gmra.mxu3 %vm2571_vm3, %v7633_v8  ;;  %v3921_v29 = vsel %vm2571_vm3, %v7633_v8, 0.0  ;;  %v7635_v32 = vpop.eup %7634 }
 0x5c4   : > { %6136 = vmatpush.msrb.mxu3 %v12494_v22  ;;  %3922 = vadd.xlane.f32.xlu1 %v3921_v29  ;;  %v3924_v58 = vsel %vm2571_vm3, %v7635_v32, 0.0 }
 0x5c6   : > { %6137 = vmatpush.msrb.mxu3 %v12495_v5  ;;  %3919 = vadd.xlane.f32.xlu2 %v3918_v48 }
 0x5cb   : > { %7401 = vmatmul.msk.f32.gmra.mxu3 %vm2571_vm3, %v7635_v32 }
 0x5dc   : > { %v10377_v16 = vpop.xlane.xlu0 %3838 }
 0x5e1   : > { %v10381_v42 = vpop.xlane.xlu2 %3832 }
 0x5e2   : > { %v10398_v41 = vpop.xlane.xlu1 %3835 }
 0x5e4   : > { %v10385_v33 = vpop.xlane.xlu0 %3862 }
 0x5e5   : > { %12496 = vst [vmem:[#allocation51_spill] sm:$0xff] %v10385_v33  ;;  %v12527_v33 = vld [vmem:[#allocation4_spill] sm:$0xff] }
 0x5e9   : > { %v10387_v19 = vpop.xlane.xlu2 %3841 }
 0x5ea   : > { %v10402_v25 = vpop.xlane.xlu1 %3847 }
 0x5ec   : > { %v10391_v61 = vpop.xlane.xlu0 %3871 }
 0x5ed   : > { %12497 = vst [vmem:[#allocation59_spill] sm:$0xff] %v10391_v61 }
 0x5f1   : > { %v10393_v53 = vpop.xlane.xlu2 %3844 }
 0x5f2   : > { %v10406_v31 = vpop.xlane.xlu1 %3853 }
 0x5f9   : > { %v10396_v51 = vpop.xlane.xlu2 %3850 }
 0x5fa   : > { %v10410_v39 = vpop.xlane.xlu1 %3859 }
 0x601   : > { %v10400_v56 = vpop.xlane.xlu2 %3856 }
 0x602   : > { %v10414_v55 = vpop.xlane.xlu1 %3868 }
 0x603   : > { %12500 = vst [vmem:[#allocation48_spill] sm:$0xff] %v10414_v55 }
 0x609   : > { %v10404_v20 = vpop.xlane.xlu2 %3865 }
 0x60a   : > { %v10422_v3 = vpop.xlane.xlu1 %3877 }
 0x60b   : > { %12502 = vst [vmem:[#allocation52_spill] sm:$0xff] %v10422_v3 }
 0x611   : > { %v10408_v44 = vpop.xlane.xlu2 %3874 }
 0x612   : > { %12498 = vst [vmem:[#allocation24_spill] sm:$0xff] %v10408_v44  ;;  %v10427_v54 = vpop.xlane.xlu1 %3886 }
 0x613   : > { %12504 = vst [vmem:[#allocation62_spill] sm:$0xff] %v10427_v54 }
 0x619   : > { %v10412_v37 = vpop.xlane.xlu2 %3883 }
 0x61a   : > { %12499 = vst [vmem:[#allocation26_spill] sm:$0xff] %v10412_v37  ;;  %v10432_v35 = vpop.xlane.xlu1 %3895 }
 0x61b   : > { %12506 = vst [vmem:[#allocation75_spill] sm:$0xff] %v10432_v35 }
 0x621   : > { %v10418_v63 = vpop.xlane.xlu2 %3892 }
 0x622   : > { %12501 = vst [vmem:[#allocation53_spill] sm:$0xff] %v10418_v63  ;;  %v10440_v29 = vpop.xlane.xlu1 %3904 }
 0x623   : > { %7556 = vset.pattern.permute.xlu0 %v9555_v50  ;;  %12509 = vst [vmem:[#allocation84_spill] sm:$0xff] %v10440_v29 }
 0x629   : > { %v10425_v60 = vpop.xlane.xlu2 %3901 }
 0x62a   : > { %12503 = vst [vmem:[#allocation25_spill] sm:$0xff] %v10425_v60  ;;  %v10445_v32 = vpop.xlane.xlu1 %3913  ;;  %v5801_v60 = vrot.slane %v10141_v2, 4 }
 0x62b   : > { %12511 = vst [vmem:[#allocation60_spill] sm:$0xff] %v10445_v32 }
 0x62c   : > { %v5802_v35 = vsel %vm1051_vm2, %v5801_v60, %v9993_v26 }
 0x62d   : > { %3880 = vadd.xlane.f32.xlu0 %v3879_v28 }
 0x631   : > { %v10430_v15 = vpop.xlane.xlu2 %3910 }
 0x632   : > { %12505 = vst [vmem:[#allocation80_spill] sm:$0xff] %v10430_v15  ;;  %v12518_v15 = vld [vmem:[#allocation46_spill] sm:$0xff] }
 0x635   : > { %3889 = vadd.xlane.f32.xlu0 %v3888_v43  ;;  %v5837_v43 = vrot.slane %v10246_v36, 4 }
 0x639   : > { %v10435_v7 = vpop.xlane.xlu2 %3919 }
 0x63a   : > { %12507 = vst [vmem:[#allocation56_spill] sm:$0xff] %v10435_v7 }
 0x63d   : > { %3898 = vadd.xlane.f32.xlu0 %v3897_v30 }
 0x645   : > { %3907 = vadd.xlane.f32.xlu0 %v3906_v23 }
 0x64d   : > { %3916 = vadd.xlane.f32.xlu0 %v3915_v24  ;;  %v5725_v24 = vrot.slane %v9983_v17, 4 }
 0x655   : > { %3925 = vadd.xlane.f32.xlu0 %v3924_v58  ;;  %v5838_v58 = vsel %vm1051_vm2, %v5837_v43, %v10210_v10 }
 0x658   : > { %v3511_v45 = vpop.trf.xlu0 }
 0x659   : > { %v3527_v11 = vperm.slane %v3511_v45, 0  ;;  %v3540_v6 = vperm.slane %v3511_v45, 1  ;;  %v3605_v40 = vperm.slane %v3511_v45, 6  ;;  %v3553_v57 = vperm.slane %v3511_v45, 2 }
 0x65a   : > { %v3566_v27 = vperm.slane %v3511_v45, 3  ;;  %v3579_v18 = vperm.slane %v3511_v45, 4  ;;  %v3592_v9 = vperm.slane %v3511_v45, 5  ;;  %v3618_v52 = vperm.slane %v3511_v45, 7 }
 0x65b   : > { %3538 = vperm.xlu2 %7555, %v3527_v11   ;;  %3532 = vperm.xlu1 %7554, %v3527_v11   ;;  %v5713_v45 = vrot.slane %v10010_v1, 4  ;;  %v12513_v11 = vld [vmem:[#allocation67_spill] sm:$0xff] }
 0x660   : > { %v10420_v21 = vpop.trf.xlu0 }
 0x661   : > { %v3631_v62 = vperm.slane %v10420_v21, 0  ;;  %v3644_v14 = vperm.slane %v10420_v21, 1  ;;  %v3657_v38 = vperm.slane %v10420_v21, 2  ;;  %v3670_v8 = vperm.slane %v10420_v21, 3 }
 0x662   : > { %v3683_v5 = vperm.slane %v10420_v21, 4  ;;  %v3696_v30 = vperm.slane %v10420_v21, 5  ;;  %v3709_v59 = vperm.slane %v10420_v21, 6 }
 0x663   : > { %3551 = vperm.xlu2 %7555, %v3540_v6   ;;  %3545 = vperm.xlu1 %7554, %v3540_v6   ;;  %v5726_v6 = vsel %vm1051_vm2, %v5725_v24, %v12513_v11 }
 0x669   : > { %3610 = vperm.xlu0 %7556, %v3605_v40  }
 0x66b   : > { %3564 = vperm.xlu2 %7555, %v3553_v57   ;;  %3558 = vperm.xlu1 %7554, %v3553_v57   ;;  %v5825_v57 = vrot.slane %v10072_v34, 4 }
 0x66d   : > { %v5826_v24 = vsel %vm1051_vm2, %v5825_v57, %v10196_v49 }
 0x673   : > { %3577 = vperm.xlu2 %7555, %v3566_v27   ;;  %3571 = vperm.xlu1 %7554, %v3566_v27   ;;  %v10461_v27 = vpop.xlane.xlu1 %3922 }
 0x674   : > { %12514 = vst [vmem:[#allocation66_spill] sm:$0xff] %v10461_v27 }
 0x67b   : > { %3590 = vperm.xlu2 %7555, %v3579_v18   ;;  %3584 = vperm.xlu1 %7554, %v3579_v18   ;;  %v12515_v18 = vld [vmem:[#allocation16_spill] sm:$0xff] }
 0x67c   : > { %v5832_v57 = vperm.slane %v5826_v24, %v12515_v18  ;;  %v10510_v60 = vperm.slane %v5802_v35, %v12515_v18 }
 0x683   : > { %3603 = vperm.xlu2 %7555, %v3592_v9   ;;  %3597 = vperm.xlu1 %7554, %v3592_v9   ;;  %v10464_v9 = vperm.slane %v5838_v58, %v12515_v18 }
 0x685   : > { %v5873_v58 = vrot.slane %v10464_v9, 4 }
 0x68b   : > { %7558 = vset.pattern.permute.xlu2 %v9555_v50  ;;  %7557 = vset.pattern.permute.xlu1 %v9565_v12 }
 0x693   : > { %3623 = vperm.xlu2 %7558, %v3618_v52   ;;  %3616 = vperm.xlu1 %7557, %v3605_v40   ;;  %v5813_v40 = vrot.slane %v10040_v13, 4 }
 0x695   : > { %v5814_v43 = vsel %vm1051_vm2, %v5813_v40, %v10134_v47 }
 0x696   : > { %v10486_v40 = vperm.slane %v5814_v43, %v12515_v18 }
 0x698   : > { %v5849_v43 = vrot.slane %v10486_v40, 4 }
 0x69b   : > { %3629 = vperm.xlu1 %7557, %v3618_v52   ;;  %3636 = vperm.xlu2 %7558, %v3631_v62   ;;  %v12516_v52 = vld [vmem:[#allocation78_spill] sm:$0xff] }
 0x6a0   : > { %v10437_v0 = vpop.xlane.xlu0 %3880 }
 0x6a1   : > { %12508 = vst [vmem:[#allocation22_spill] sm:$0xff] %v10437_v0 }
 0x6a3   : > { %3642 = vperm.xlu1 %7557, %v3631_v62   ;;  %3649 = vperm.xlu2 %7558, %v3644_v14   ;;  %v5701_v62 = vrot.slane %v12516_v52, 4 }
 0x6a5   : > { %v5702_v7 = vsel %vm1051_vm2, %v5701_v62, %v12518_v15 }
 0x6a6   : > { %v10493_v62 = vperm.slane %v5702_v7, %v12515_v18 }
 0x6a8   : > { %v10442_v48 = vpop.xlane.xlu0 %3889 }
 0x6a9   : > { %12510 = vst [vmem:[#allocation61_spill] sm:$0xff] %v10442_v48  ;;  %v12523_v48 = vld [vmem:[#allocation21_spill] sm:$0xff] }
 0x6ab   : > { %3655 = vperm.xlu1 %7557, %v3644_v14   ;;  %3662 = vperm.xlu2 %7558, %v3657_v38  }
 0x6b0   : > { %v10451_v23 = vpop.xlane.xlu0 %3898 }
 0x6b1   : > { %12512 = vst [vmem:[#allocation76_spill] sm:$0xff] %v10451_v23  ;;  %v12520_v23 = vld [vmem:[#allocation29_spill] sm:$0xff] }
 0x6b2   : > { %v5689_v32 = vrot.slane %v12520_v23, 4 }
 0x6b3   : > { %3668 = vperm.xlu1 %7557, %v3657_v38   ;;  %3675 = vperm.xlu2 %7558, %v3670_v8   ;;  %v10468_v38 = vperm.slane %v5726_v6, %v12515_v18 }
 0x6b5   : > { %v3539_v22 = vpop.permute.xlu2 %3538 }
 0x6b6   : > { %v3736_v44 = vsub.f32 %v12523_v48, %v3539_v22 }
 0x6b8   : > { %v10489_v27 = vpop.xlane.xlu0 %3907  ;;  %v3769_v48 = vmul.f32 1.442695, %v3736_v44  ;;  %v12528_v44 = vld [vmem:[#allocation10_spill] sm:$0xff] }
 0x6b9   : > { %12519 = vst [vmem:[#allocation71_spill] sm:$0xff] %v10489_v27  ;;  %v12522_v27 = vld [vmem:[#allocation50_spill] sm:$0xff] }
 0x6ba   : > { %v5690_v29 = vsel %vm1051_vm2, %v5689_v32, %v12522_v27  ;;  %v5850_v32 = vsel %vm1051_vm2, %v5849_v43, %v10510_v60 }
 0x6bb   : > { %3681 = vperm.xlu1 %7557, %v3670_v8   ;;  %3688 = vperm.xlu2 %7558, %v3683_v5   ;;  %v12517_v8 = vld [vmem:[#allocation68_spill] sm:$0xff]  ;;  %v10517_v22 = vperm.slane %v5690_v29, %v12515_v18 }
 0x6bd   : > { %v10447_v28 = vpop.permute.xlu2 %3551 }
 0x6be   : > { %v3738_v29 = vsub.f32 %v12528_v44, %v10447_v28 }
 0x6c0   : > { %v3773_v28 = vmul.f32 1.442695, %v3738_v29 }
 0x6c3   : > { %3694 = vperm.xlu1 %7557, %v3683_v5   ;;  %3701 = vperm.xlu2 %7558, %v3696_v30   ;;  %v5714_v5 = vsel %vm1051_vm2, %v5713_v45, %v12517_v8  ;;  %v5761_v45 = vrot.slane %v10468_v38, 4 }
 0x6c4   : > { %v10482_v6 = vperm.slane %v5714_v5, %v12515_v18  ;;  %v5874_v5 = vsel %vm1051_vm2, %v5873_v58, %v5832_v57 }
 0x6c5   : > { %v3565_v14 = vpop.permute.xlu2 %3564 }
 0x6c6   : > { %v5762_v24 = vsel %vm1051_vm2, %v5761_v45, %v10482_v6  ;;  %v3740_v43 = vsub.f32 %v12527_v33, %v3565_v14  ;;  %v5763_v14 = vrot.slane %v10482_v6, 4  ;;  %v5839_v6 = vrot.slane %v10210_v10, 4 }
 0x6c7   : > { %v5703_v10 = vrot.slane %v12518_v15, 4  ;;  %v5691_v15 = vrot.slane %v12522_v27, 4 }
 0x6c8   : > { %v3777_v33 = vmul.f32 1.442695, %v3740_v43 }
 0x6cb   : > { %3707 = vperm.xlu1 %7557, %v3696_v30   ;;  %3714 = vperm.xlu2 %7558, %v3709_v59   ;;  %v12521_v30 = vld [vmem:[#allocation18_spill] sm:$0xff] }
 0x6cd   : > { %v3533_v63 = vpop.permute.xlu1 %3532  ;;  %v10505_v7 = vpop.permute.xlu2 %3577 }
 0x6ce   : > { %v3735_v54 = vsub.f32 %v12521_v30, %v3533_v63  ;;  %v3722_v63 = vperm.slane %v10420_v21, 7  ;;  %v12524_v30 = vld [vmem:[#allocation31_spill] sm:$0xff] }
 0x6cf   : > { %v5880_v58 = vperm.slane %v5874_v5, %v12524_v30  ;;  %v5768_v45 = vperm.slane %v5762_v24, %v12524_v30  ;;  %v10519_v5 = vpop.xlane.xlu0 %3916 }
 0x6d0   : > { %v3767_v0 = vmul.f32 1.442695, %v3735_v54  ;;  %v5737_v54 = vrot.slane %v10493_v62, 4  ;;  %12525 = vst [vmem:[#allocation85_spill] sm:$0xff] %v10519_v5 }
 0x6d1   : > { %v5897_v37 = vrot.slane %v5880_v58, 4  ;;  %v5785_v3 = vrot.slane %v5768_v45, 4 }
 0x6d2   : > { %7636 = vpow2.f32 %v3767_v0  ;;  %v12526_v0 = vld [vmem:[#allocation35_spill] sm:$0xff]  ;;  %v5738_v55 = vsel %vm1051_vm2, %v5737_v54, %v10517_v22  ;;  %v5875_v54 = vrot.slane %v5832_v57, 4  ;;  %v5715_v57 = vrot.slane %v12517_v8, 4 }
 0x6d3   : > { %3720 = vperm.xlu1 %7557, %v3709_v59   ;;  %3727 = vperm.xlu2 %7558, %v3722_v63   ;;  %v5856_v59 = vperm.slane %v5850_v32, %v12524_v30  ;;  %7638 = vpow2.f32 %v3769_v48 }
 0x6d5   : > { %v3546_v21 = vpop.permute.xlu1 %3545  ;;  %v10534_v32 = vpop.permute.xlu2 %3590 }
 0x6d6   : > { %v3737_v35 = vsub.f32 %v12526_v0, %v3546_v21  ;;  %v5898_v21 = vsel %vm1051_vm2, %v5897_v37, %v5856_v59  ;;  %v5744_v0 = vperm.slane %v5738_v55, %v12524_v30  ;;  %v5876_v37 = vsel %vm1051_vm2, %v10464_v9, %v5875_v54 }
 0x6d7   : > { %v10547_v29 = vpop.xlane.xlu0 %3925  ;;  %v5764_v9 = vsel %vm1051_vm2, %v10468_v38, %v5763_v14  ;;  %v5851_v38 = vrot.slane %v10510_v60, 4 }
 0x6d8   : > { %v10525_v24 = vpop.eup %7636  ;;  %v3771_v61 = vmul.f32 1.442695, %v3737_v35  ;;  %v5786_v5 = vsel %vm1051_vm2, %v5785_v3, %v5744_v0  ;;  %v12529_v35 = vld [vmem:[#allocation12_spill] sm:$0xff]  ;;  %v5727_v3 = vrot.slane %v12513_v11, 4  ;;  %v5787_v43 = vrot.slane %v5744_v0, 4  ;;  %12530 = vst [vmem:[#allocation55_spill] sm:$0xff] %v10547_v29 }
 0x6d9   : > { %7402 = vmatmul.msk.f32.vlgmr.msrb.gmra.mxu0 %vm2571_vm3, %v10525_v24  ;;  %v10542_v55 = vpop.eup %7638  ;;  %v5716_v0 = vsel %vm1051_vm2, %v10010_v1, %v5715_v57  ;;  %v5852_v60 = vsel %vm1051_vm2, %v10486_v40, %v5851_v38  ;;  %v5704_v1 = vsel %vm1051_vm2, %v12516_v52, %v5703_v10  ;;  %v12531_v52 = vld [vmem:[#allocation9_spill] sm:$0xff] }
 0x6da   : > { %7640 = vpow2.f32 %v3771_v61  ;;  %6165 = vmatpush.msrb.mxu0 %v5898_v21  ;;  %v5739_v61 = vrot.slane %v10517_v22, 4  ;;  %v10557_v22 = vperm.slane %v5876_v37, %v12524_v30  ;;  %v5788_v54 = vsel %vm1051_vm2, %v5768_v45, %v5787_v43 }
 0x6db   : > { %3733 = vperm.xlu1 %7557, %v3722_v63   ;;  %v5899_v63 = vrot.slane %v5856_v59, 4  ;;  %7642 = vpow2.f32 %v3777_v33  ;;  %v5827_v59 = vrot.slane %v10196_v49, 4  ;;  %v10568_v33 = vperm.slane %v5764_v9, %v12524_v30 }
 0x6dc   : > { %6166 = vmatpush.msrb.mxu0 %v5786_v5  ;;  %7644 = vpow2.f32 %v3773_v28  ;;  %v5901_v28 = vrot.slane %v10557_v22, 4  ;;  %v5740_v27 = vsel %vm1051_vm2, %v10493_v62, %v5739_v61  ;;  %v5724_v40 = vperm.slane %v5716_v0, %v12515_v18  ;;  %v12533_v0 = vld [vmem:[#allocation13_spill] sm:$0xff] }
 0x6dd   : > { %v3559_v48 = vpop.permute.xlu1 %3558  ;;  %v5900_v11 = vsel %vm1051_vm2, %v5880_v58, %v5899_v63  ;;  %v5840_v58 = vsel %vm1051_vm2, %v10246_v36, %v5839_v6  ;;  %v5828_v49 = vsel %vm1051_vm2, %v10072_v34, %v5827_v59  ;;  %v5728_v36 = vsel %vm1051_vm2, %v9983_v17, %v5727_v3  ;;  %v10579_v14 = vpop.permute.xlu2 %3603 }
 0x6de   : > { %v3739_v44 = vsub.f32 %v12529_v35, %v3559_v48  ;;  %v5692_v34 = vsel %vm1051_vm2, %v12520_v23, %v5691_v15  ;;  %v5848_v35 = vperm.slane %v5840_v58, %v12515_v18  ;;  %v5815_v17 = vrot.slane %v10134_v47, 4 }
 0x6df   : > { %v5836_v57 = vperm.slane %v5828_v49, %v12515_v18  ;;  %v5860_v3 = vperm.slane %v5852_v60, %v12524_v30  ;;  %v5789_v62 = vrot.slane %v10568_v33, 4  ;;  %v10598_v23 = vperm.slane %v5704_v1, %v12515_v18  ;;  %v3611_v43 = vpop.permute.xlu0 %3610 }
 0x6e0   : > { %v7641_v5 = vpop.eup %7640  ;;  %v3775_v21 = vmul.f32 1.442695, %v3739_v44  ;;  %v5736_v63 = vperm.slane %v5728_v36, %v12515_v18  ;;  %v5748_v6 = vperm.slane %v5740_v27, %v12524_v30  ;;  %v5816_v47 = vsel %vm1051_vm2, %v10040_v13, %v5815_v17 }
 0x6e1   : > { %7403 = vmatmul.msk.f32.gmra.mxu0 %vm2571_vm3, %v10542_v55  ;;  %7404 = vmatmul.msk.f32.vlgmr.msra.gmra.mxu1 %vm2571_vm3, %v7641_v5  ;;  %v3933_v8 = vsel %vm2571_vm3, %v7641_v5, 0.0  ;;  %v7643_v48 = vpop.eup %7642  ;;  %v5775_v10 = vrot.slane %v5724_v40, 4  ;;  %v5803_v59 = vrot.slane %v9993_v26, 4  ;;  %v5885_v38 = vrot.slane %v5848_v35, 4 }
 0x6e2   : > { %7646 = vpow2.f32 %v3775_v21  ;;  %6194 = vmatpush.msra.mxu1 %v5900_v11  ;;  %3934 = vadd.xlane.f32.xlu0 %v3933_v8  ;;  %v10589_v37 = vpop.eup %7644  ;;  %v12532_v21 = vld [vmem:[#allocation5_spill] sm:$0xff]  ;;  %v5902_v11 = vsel %vm1051_vm2, %v5901_v28, %v5860_v3  ;;  %v3942_v8 = vsel %vm2571_vm3, %v7643_v48, 0.0  ;;  %v5887_v13 = vrot.slane %v5836_v57, 4  ;;  %v12534_v28 = vld [vmem:[#allocation3_spill] sm:$0xff] }
 0x6e3   : > { %v3742_v9 = vsub.f32 %v12532_v21, %v10505_v7  ;;  %v3747_v7 = vsub.f32 %v12533_v0, %v3611_v43  ;;  %v5790_v58 = vsel %vm1051_vm2, %v5789_v62, %v5748_v6  ;;  %v5824_v15 = vperm.slane %v5816_v47, %v12515_v18  ;;  %v12535_v21 = vld [vmem:[#allocation6_spill] sm:$0xff] }
 0x6e4   : > { %6195 = vmatpush.msra.mxu1 %v5788_v54  ;;  %v5804_v54 = vsel %vm1051_vm2, %v10141_v2, %v5803_v59  ;;  %v5773_v49 = vrot.slane %v5736_v63, 4  ;;  %v5700_v60 = vperm.slane %v5692_v34, %v12515_v18  ;;  %v5749_v26 = vrot.slane %v10598_v23, 4 }
 0x6e5   : > { %v3572_v45 = vpop.permute.xlu1 %3571  ;;  %v3781_v1 = vmul.f32 1.442695, %v3742_v9  ;;  %v5776_v17 = vsel %vm1051_vm2, %v5736_v63, %v5775_v10  ;;  %v5812_v2 = vperm.slane %v5804_v54, %v12515_v18  ;;  %v3791_v62 = vmul.f32 1.442695, %v3747_v7 }
 0x6e6   : > { %v3741_v44 = vsub.f32 %v12531_v52, %v3572_v45  ;;  %v5791_v52 = vrot.slane %v5748_v6, 4  ;;  %v5903_v43 = vrot.slane %v5860_v3, 4  ;;  %v5861_v34 = vrot.slane %v5824_v15, 4 }
 0x6e7   : > { %v3744_v9 = vsub.f32 %v12535_v21, %v10534_v32  ;;  %v5751_v63 = vrot.slane %v5700_v60, 4 }
 0x6e8   : > { %v10595_v61 = vpop.eup %7646  ;;  %v3779_v5 = vmul.f32 1.442695, %v3741_v44  ;;  %v5886_v44 = vsel %vm1051_vm2, %v5885_v38, %v5836_v57  ;;  %v12536_v57 = vld [vmem:[#allocation65_spill] sm:$0xff]  ;;  %v5792_v32 = vsel %vm1051_vm2, %v10568_v33, %v5791_v52  ;;  %v5862_v38 = vsel %vm1051_vm2, %v5861_v34, %v5812_v2  ;;  %v12539_v34 = vld [vmem:[#allocation11_spill] sm:$0xff] }
 0x6e9   : > { %7405 = vmatmul.msk.f32.gmra.mxu1 %vm2571_vm3, %v10589_v37  ;;  %7406 = vmatmul.msk.f32.vlgmr.msra.gmra.mxu2 %vm2571_vm3, %v10595_v61  ;;  %v3746_v6 = vsub.f32 %v12536_v57, %v10579_v14  ;;  %v10638_v3 = vperm.slane %v5886_v44, %v12524_v30  ;;  %v5863_v14 = vrot.slane %v5812_v2, 4  ;;  %v5868_v52 = vperm.slane %v5862_v38, %v12524_v30 }
 0x6ea   : > { %7648 = vpow2.f32 %v3779_v5  ;;  %6223 = vmatpush.msra.mxu2 %v5902_v11  ;;  %3943 = vadd.xlane.f32.xlu0 %v3942_v8  ;;  %v5888_v5 = vsel %vm1051_vm2, %v5848_v35, %v5887_v13  ;;  %v5774_v8 = vsel %vm1051_vm2, %v5773_v49, %v5724_v40  ;;  %v5904_v35 = vsel %vm1051_vm2, %v10557_v22, %v5903_v43  ;;  %v12538_v49 = vld [vmem:[#allocation8_spill] sm:$0xff] }
 0x6eb   : > { %7650 = vpow2.f32 %v3781_v1  ;;  %v10643_v40 = vperm.slane %v5888_v5, %v12524_v30  ;;  %v10647_v59 = vperm.slane %v5774_v8, %v12524_v30  ;;  %v3785_v22 = vmul.f32 1.442695, %v3744_v9 }
 0x6ec   : > { %6224 = vmatpush.msra.mxu2 %v5790_v58  ;;  %v10651_v13 = vperm.slane %v5776_v17, %v12524_v30  ;;  %v3789_v0 = vmul.f32 1.442695, %v3746_v6  ;;  %v5905_v58 = vrot.slane %v10638_v3, 4  ;;  %v5864_v54 = vsel %vm1051_vm2, %v5824_v15, %v5863_v14 }
 0x6ed   : > { %v3585_v36 = vpop.permute.xlu1 %3584  ;;  %v3624_v45 = vpop.permute.xlu2 %3623  ;;  %v5793_v44 = vrot.slane %v10647_v59, 4  ;;  %v5752_v17 = vsel %vm1051_vm2, %v10598_v23, %v5751_v63  ;;  %v5872_v15 = vperm.slane %v5864_v54, %v12524_v30  ;;  %v3927_v57 = vsel %vm2571_vm3, %v10525_v24, 0.0 }
 0x6ee   : > { %v3743_v27 = vsub.f32 %v12534_v28, %v3585_v36  ;;  %v5909_v36 = vrot.slane %v10643_v40, 4  ;;  %v5797_v43 = vrot.slane %v10651_v13, 4 }
 0x6f0   : > { %v10625_v47 = vpop.eup %7648  ;;  %v3783_v11 = vmul.f32 1.442695, %v3743_v27  ;;  %v5910_v9 = vsel %vm1051_vm2, %v5909_v36, %v5872_v15  ;;  %v3936_v36 = vsel %vm2571_vm3, %v10589_v37, 0.0 }
 0x6f1   : > { %7407 = vmatmul.msk.f32.gmra.mxu2 %vm2571_vm3, %v7643_v48  ;;  %7408 = vmatmul.msk.f32.vlgmr.msra.gmra.mxu3 %vm2571_vm3, %v10625_v47  ;;  %v12537_v48 = vld [vmem:[#allocation7_spill] sm:$0xff]  ;;  %v10658_v28 = vpop.eup %7650 }
 0x6f2   : > { %7652 = vpow2.f32 %v3783_v11  ;;  %6252 = vmatpush.msra.mxu3 %v5904_v35  ;;  %v3749_v10 = vsub.f32 %v12537_v48, %v3624_v45  ;;  %v5750_v45 = vsel %vm1051_vm2, %v5749_v26, %v5700_v60  ;;  %v5906_v60 = vsel %vm1051_vm2, %v5905_v58, %v5868_v52 }
 0x6f3   : > { %7654 = vpow2.f32 %v3791_v62  ;;  %v5756_v23 = vperm.slane %v5750_v45, %v12524_v30  ;;  %v5760_v11 = vperm.slane %v5752_v17, %v12524_v30  ;;  %v5907_v48 = vrot.slane %v5868_v52, 4  ;;  %v12541_v17 = vld [vmem:[#allocation17_spill] sm:$0xff] }
 0x6f4   : > { %6253 = vmatpush.msra.mxu3 %v5792_v32  ;;  %v3795_v27 = vmul.f32 1.442695, %v3749_v10  ;;  %7656 = vpow2.f32 %v3785_v22  ;;  %v5911_v22 = vrot.slane %v5872_v15, 4 }
 0x6f5   : > { %v3598_v7 = vpop.permute.xlu1 %3597  ;;  %v3637_v33 = vpop.permute.xlu2 %3636  ;;  %7658 = vpow2.f32 %v3789_v0  ;;  %v5794_v8 = vsel %vm1051_vm2, %v5793_v44, %v5756_v23  ;;  %v5798_v6 = vsel %vm1051_vm2, %v5797_v43, %v5760_v11  ;;  %v12540_v0 = vld [vmem:[#allocation20_spill] sm:$0xff]  ;;  %v5908_v24 = vsel %vm1051_vm2, %v10638_v3, %v5907_v48 }
 0x6f6   : > { %v3745_v1 = vsub.f32 %v12538_v49, %v3598_v7  ;;  %v3751_v21 = vsub.f32 %v12539_v34, %v3637_v33  ;;  %v5795_v33 = vrot.slane %v5756_v23, 4  ;;  %v5912_v58 = vsel %vm1051_vm2, %v10643_v40, %v5911_v22  ;;  %v10699_v3 = vpop.f32.mrf.mxu3 }
 0x6f7   : > { %v5799_v49 = vrot.slane %v5760_v11, 4  ;;  %v3930_v40 = vsel %vm2571_vm3, %v10542_v55, 0.0  ;;  %v3948_v48 = vsel %vm2571_vm3, %v10658_v28, 0.0 }
 0x6f8   : > { %v7653_v2 = vpop.eup %7652  ;;  %v3787_v62 = vmul.f32 1.442695, %v3745_v1  ;;  %v3799_v32 = vmul.f32 1.442695, %v3751_v21  ;;  %v5796_v1 = vsel %vm1051_vm2, %v10647_v59, %v5795_v33  ;;  %v12544_v21 = vld [vmem:[#allocation15_spill] sm:$0xff] }
 0x6f9   : > { %v10666_v5 = vpop.eup %7654  ;;  %7409 = vmatmul.msk.f32.gmra.mxu3 %vm2571_vm3, %v10658_v28  ;;  %7410 = vmatmul.msk.f32.vlgmr.msra.gmra.mxu0 %vm2571_vm3, %v7653_v2  ;;  %v3951_v26 = vsel %vm2571_vm3, %v7653_v2, 0.0  ;;  %v5800_v45 = vsel %vm1051_vm2, %v10651_v13, %v5799_v49  ;;  %v3945_v13 = vsel %vm2571_vm3, %v10625_v47, 0.0  ;;  %v12545_v47 = vld [vmem:[#allocation38_spill] sm:$0xff] }
 0x6fa   : > { %7660 = vpow2.f32 %v3787_v62  ;;  %7414 = vmatmul.msk.f32.vlgmr.msrb.gmra.mxu2 %vm2571_vm3, %v10666_v5  ;;  %6281 = vmatpush.msra.mxu0 %v5906_v60  ;;  %v7657_v63 = vpop.eup %7656  ;;  %v12542_v62 = vld [vmem:[#allocation27_spill] sm:$0xff]  ;;  %v3939_v60 = vsel %vm2571_vm3, %v10595_v61, 0.0  ;;  %v3963_v28 = vsel %vm2571_vm3, %v10666_v5, 0.0  ;;  %v12552_v5 = vld [vmem:[#allocation93_spill] sm:$0xff] }
 0x6fb   : > { %7662 = vpow2.f32 %v3795_v27  ;;  %6339 = vmatpush.msrb.mxu2 %v5910_v9  ;;  %3952 = vadd.xlane.f32.xlu0 %v3951_v26  ;;  %v7659_v14 = vpop.eup %7658  ;;  %v3954_v61 = vsel %vm2571_vm3, %v7657_v63, 0.0 }
 0x6fc   : > { %6282 = vmatpush.msra.mxu0 %v5794_v8  ;;  %3928 = vadd.xlane.f32.xlu2 %v3927_v57  ;;  %7664 = vpow2.f32 %v3799_v32  ;;  %v3960_v54 = vsel %vm2571_vm3, %v7659_v14, 0.0  ;;  %v10722_v57 = vpop.f32.mrf.mxu1  ;;  %v10729_v32 = vpop.f32.mrf.mxu2 }
 0x6fd   : > { %6340 = vmatpush.msrb.mxu2 %v5798_v6  ;;  %v3650_v35 = vpop.permute.xlu2 %3649  ;;  %12546 = vst [vmem:[#allocation49_spill] sm:$0xff] %v10729_v32 }
 0x6fe   : > { %v3753_v7 = vsub.f32 %v12540_v0, %v3650_v35  ;;  %v10715_v43 = vpop.f32.mrf.mxu3 }
 0x6ff   : > { %12543 = vst [vmem:[#allocation45_spill] sm:$0xff] %v10715_v43 }
 0x700   : > { %v10683_v10 = vpop.eup %7660  ;;  %v3803_v27 = vmul.f32 1.442695, %v3753_v7  ;;  %v12548_v7 = vld [vmem:[#allocation14_spill] sm:$0xff] }
 0x701   : > { %v7663_v38 = vpop.eup %7662  ;;  %7411 = vmatmul.msk.f32.gmra.mxu0 %vm2571_vm3, %v7657_v63  ;;  %7412 = vmatmul.msk.f32.vlgmr.msrb.gmra.mxu1 %vm2571_vm3, %v10683_v10  ;;  %v12549_v63 = vld [vmem:[#allocation92_spill] sm:$0xff] }
 0x702   : > { %7416 = vmatmul.msk.f32.vlgmr.msrb.gmra.mxu3 %vm2571_vm3, %v7663_v38  ;;  %6310 = vmatpush.msrb.mxu1 %v5908_v24  ;;  %v10706_v2 = vpop.eup %7664  ;;  %7666 = vpow2.f32 %v3803_v27  ;;  %v3969_v55 = vsel %vm2571_vm3, %v7663_v38, 0.0 }
 0x703   : > { %6368 = vmatpush.msrb.mxu3 %v5912_v58  ;;  %3961 = vadd.xlane.f32.xlu0 %v3960_v54 }
 0x704   : > { %6311 = vmatpush.msrb.mxu1 %v5796_v1  ;;  %3937 = vadd.xlane.f32.xlu2 %v3936_v36  ;;  %v10736_v54 = vpop.f32.mrf.mxu1  ;;  %v10743_v36 = vpop.f32.mrf.mxu2 }
 0x705   : > { %6369 = vmatpush.msrb.mxu3 %v5800_v45  ;;  %v3617_v52 = vpop.permute.xlu1 %3616  ;;  %3931 = vadd.xlane.f32.xlu1 %v3930_v40  ;;  %v3663_v44 = vpop.permute.xlu2 %3662  ;;  %v3957_v45 = vsel %vm2571_vm3, %v10683_v10, 0.0 }
 0x706   : > { %v3748_v59 = vsub.f32 %v12541_v17, %v3617_v52  ;;  %v3755_v15 = vsub.f32 %v12542_v62, %v3663_v44  ;;  %v12551_v17 = vld [vmem:[#allocation90_spill] sm:$0xff] }
 0x708   : > { %v3793_v37 = vmul.f32 1.442695, %v3748_v59  ;;  %v3807_v26 = vmul.f32 1.442695, %v3755_v15  ;;  %v10720_v11 = vpop.eup %7666 }
 0x709   : > { %7413 = vmatmul.msk.f32.gmra.mxu1 %vm2571_vm3, %v7659_v14  ;;  %7418 = vmatmul.msk.f32.vlgmr.msrb.gmra.mxu0 %vm2571_vm3, %v10706_v2  ;;  %v10731_v14 = vpop.f32.mrf.mxu3 }
 0x70a   : > { %7668 = vpow2.f32 %v3793_v37  ;;  %12547 = vst [vmem:[#allocation34_spill] sm:$0xff] %v10731_v14 }
 0x70b   : > { %3970 = vadd.xlane.f32.xlu0 %v3969_v55  ;;  %7670 = vpow2.f32 %v3807_v26 }
 0x70c   : > { %3946 = vadd.xlane.f32.xlu2 %v3945_v13  ;;  %v10757_v13 = vpop.f32.mrf.mxu1 }
 0x70d   : > { %v3630_v23 = vpop.permute.xlu1 %3629  ;;  %3940 = vadd.xlane.f32.xlu1 %v3939_v60  ;;  %v3676_v34 = vpop.permute.xlu2 %3675 }
 0x70e   : > { %v3750_v9 = vsub.f32 %v12544_v21, %v3630_v23  ;;  %v3757_v35 = vsub.f32 %v12545_v47, %v3676_v34 }
 0x710   : > { %v7669_v8 = vpop.eup %7668  ;;  %v3797_v6 = vmul.f32 1.442695, %v3750_v9  ;;  %v3811_v22 = vmul.f32 1.442695, %v3757_v35  ;;  %v10761_v9 = vpop.f32.mrf.mxu2 }
 0x711   : > { %7415 = vmatmul.msk.f32.gmra.mxu2 %vm2571_vm3, %v7669_v8  ;;  %7420 = vmatmul.msk.f32.vlgmr.msra.gmra.mxu1 %vm2571_vm3, %v10720_v11  ;;  %v7671_v33 = vpop.eup %7670  ;;  %v10747_v44 = vpop.f32.mrf.mxu3  ;;  %v3966_v26 = vsel %vm2571_vm3, %v7669_v8, 0.0  ;;  %12553 = vst [vmem:[#allocation57_spill] sm:$0xff] %v10761_v9 }
 0x712   : > { %7672 = vpow2.f32 %v3797_v6  ;;  %12550 = vst [vmem:[#allocation58_spill] sm:$0xff] %v10747_v44  ;;  %v12554_v6 = vld [vmem:[#allocation23_spill] sm:$0xff]  ;;  %v3987_v8 = vsel %vm2571_vm3, %v7671_v33, 0.0 }
 0x713   : > { %7674 = vpow2.f32 %v3811_v22 }
 0x714   : > { %3955 = vadd.xlane.f32.xlu2 %v3954_v61 }
 0x715   : > { %v3643_v38 = vpop.permute.xlu1 %3642  ;;  %3949 = vadd.xlane.f32.xlu1 %v3948_v48  ;;  %v3689_v0 = vpop.permute.xlu2 %3688 }
 0x716   : > { %v3752_v24 = vsub.f32 %v12548_v7, %v3643_v38  ;;  %v3759_v1 = vsub.f32 %v12549_v63, %v3689_v0  ;;  %v12556_v38 = vld [vmem:[#allocation94_spill] sm:$0xff]  ;;  %v3981_v7 = vsel %vm2571_vm3, %v10720_v11, 0.0 }
 0x718   : > { %v7673_v58 = vpop.eup %7672  ;;  %v3801_v49 = vmul.f32 1.442695, %v3752_v24  ;;  %v3815_v40 = vmul.f32 1.442695, %v3759_v1  ;;  %v10772_v24 = vpop.f32.mrf.mxu1 }
 0x719   : > { %7417 = vmatmul.msk.f32.gmra.mxu3 %vm2571_vm3, %v7673_v58  ;;  %7422 = vmatmul.msk.f32.vlgmr.msra.gmra.mxu2 %vm2571_vm3, %v7671_v33  ;;  %v10750_v37 = vpop.eup %7674  ;;  %v3972_v60 = vsel %vm2571_vm3, %v7673_v58, 0.0  ;;  %v10764_v48 = vpop.f32.mrf.mxu3  ;;  %12557 = vst [vmem:[#allocation19_spill] sm:$0xff] %v10772_v24  ;;  %v3975_v58 = vsel %vm2571_vm3, %v10706_v2, 0.0 }
 0x71a   : > { %7676 = vpow2.f32 %v3801_v49  ;;  %12555 = vst [vmem:[#allocation33_spill] sm:$0xff] %v10764_v48  ;;  %v10776_v1 = vpop.f32.mrf.mxu2 }
 0x71b   : > { %7678 = vpow2.f32 %v3815_v40  ;;  %12558 = vst [vmem:[#allocation88_spill] sm:$0xff] %v10776_v1 }
 0x71c   : > { %3964 = vadd.xlane.f32.xlu2 %v3963_v28  ;;  %v12559_v28 = vld [vmem:[#allocation91_spill] sm:$0xff] }
 0x71d   : > { %v3656_v27 = vpop.permute.xlu1 %3655  ;;  %3958 = vadd.xlane.f32.xlu1 %v3957_v45  ;;  %v3702_v52 = vpop.permute.xlu2 %3701 }
 0x71e   : > { %v3754_v59 = vsub.f32 %v12551_v17, %v3656_v27  ;;  %v3761_v55 = vsub.f32 %v12552_v5, %v3702_v52  ;;  %v12560_v17 = vld [vmem:[#allocation98_spill] sm:$0xff] }
 0x720   : > { %v7677_v62 = vpop.eup %7676  ;;  %v3805_v15 = vmul.f32 1.442695, %v3754_v59  ;;  %v3819_v23 = vmul.f32 1.442695, %v3761_v55  ;;  %v10786_v55 = vpop.f32.mrf.mxu1 }
 0x721   : > { %7419 = vmatmul.msk.f32.gmra.mxu0 %vm2571_vm3, %v7677_v62  ;;  %7424 = vmatmul.msk.f32.vlgmr.msra.gmra.mxu3 %vm2571_vm3, %v10750_v37  ;;  %v3978_v10 = vsel %vm2571_vm3, %v7677_v62, 0.0  ;;  %v7679_v35 = vpop.eup %7678  ;;  %v10782_v59 = vpop.f32.mrf.mxu3  ;;  %12562 = vst [vmem:[#allocation81_spill] sm:$0xff] %v10786_v55 }
 0x722   : > { %7680 = vpow2.f32 %v3805_v15  ;;  %3979 = vadd.xlane.f32.xlu0 %v3978_v10  ;;  %12561 = vst [vmem:[#allocation42_spill] sm:$0xff] %v10782_v59  ;;  %v12563_v10 = vld [vmem:[#allocation96_spill] sm:$0xff] }
 0x723   : > { %7682 = vpow2.f32 %v3819_v23 }
 0x724   : > { %3973 = vadd.xlane.f32.xlu2 %v3972_v60 }
 0x725   : > { %v3669_v34 = vpop.permute.xlu1 %3668  ;;  %3967 = vadd.xlane.f32.xlu1 %v3966_v26  ;;  %v3715_v21 = vpop.permute.xlu2 %3714 }
 0x726   : > { %v3756_v47 = vsub.f32 %v12554_v6, %v3669_v34  ;;  %v3763_v0 = vsub.f32 %v12556_v38, %v3715_v21  ;;  %v10789_v34 = vpop.f32.mrf.mxu2 }
 0x727   : > { %12564 = vst [vmem:[#allocation54_spill] sm:$0xff] %v10789_v34 }
 0x728   : > { %v7681_v61 = vpop.eup %7680  ;;  %v3809_v22 = vmul.f32 1.442695, %v3756_v47  ;;  %v3823_v49 = vmul.f32 1.442695, %v3763_v0  ;;  %v3999_v47 = vsel %vm2571_vm3, %v7679_v35, 0.0  ;;  %v12566_v0 = vld [vmem:[#allocation95_spill] sm:$0xff] }
 0x729   : > { %7421 = vmatmul.msk.f32.gmra.mxu1 %vm2571_vm3, %v7681_v61  ;;  %7426 = vmatmul.msk.f32.vlgmr.msra.gmra.mxu0 %vm2571_vm3, %v7679_v35  ;;  %v7683_v33 = vpop.eup %7682  ;;  %v3984_v62 = vsel %vm2571_vm3, %v7681_v61, 0.0  ;;  %v10795_v61 = vpop.f32.mrf.mxu3 }
 0x72a   : > { %7684 = vpow2.f32 %v3809_v22  ;;  %3988 = vadd.xlane.f32.xlu0 %v3987_v8  ;;  %12565 = vst [vmem:[#allocation79_spill] sm:$0xff] %v10795_v61  ;;  %v3993_v22 = vsel %vm2571_vm3, %v10750_v37, 0.0  ;;  %v4005_v35 = vsel %vm2571_vm3, %v7683_v33, 0.0 }
 0x72b   : > { %7686 = vpow2.f32 %v3823_v49 }
 0x72c   : > { %3982 = vadd.xlane.f32.xlu2 %v3981_v7 }
 0x72d   : > { %v3682_v63 = vpop.permute.xlu1 %3681  ;;  %3976 = vadd.xlane.f32.xlu1 %v3975_v58  ;;  %v3728_v40 = vpop.permute.xlu2 %3727 }
 0x72e   : > { %v3758_v45 = vsub.f32 %v12559_v28, %v3682_v63  ;;  %v3765_v11 = vsub.f32 %v12560_v17, %v3728_v40  ;;  %v10800_v49 = vpop.f32.mrf.mxu2  ;;  %v10802_v63 = vpop.f32.mrf.mxu1 }
 0x72f   : > { %12567 = vst [vmem:[#allocation82_spill] sm:$0xff] %v10800_v49 }
 0x730   : > { %v7685_v27 = vpop.eup %7684  ;;  %v3813_v52 = vmul.f32 1.442695, %v3758_v45  ;;  %v3827_v15 = vmul.f32 1.442695, %v3765_v11  ;;  %12568 = vst [vmem:[#allocation43_spill] sm:$0xff] %v10802_v63 }
 0x731   : > { %7423 = vmatmul.msk.f32.gmra.mxu2 %vm2571_vm3, %v7685_v27  ;;  %7428 = vmatmul.msk.f32.vlgmr.msrb.gmra.mxu1 %vm2571_vm3, %v7683_v33  ;;  %v3990_v2 = vsel %vm2571_vm3, %v7685_v27, 0.0  ;;  %v7687_v26 = vpop.eup %7686  ;;  %v10808_v40 = vpop.f32.mrf.mxu3  ;;  %v12570_v27 = vld [vmem:[#allocation97_spill] sm:$0xff] }
 0x732   : > { %7688 = vpow2.f32 %v3813_v52  ;;  %12569 = vst [vmem:[#allocation39_spill] sm:$0xff] %v10808_v40  ;;  %v4011_v33 = vsel %vm2571_vm3, %v7687_v26, 0.0 }
 0x733   : > { %7690 = vpow2.f32 %v3827_v15 }
 0x734   : > { %3991 = vadd.xlane.f32.xlu2 %v3990_v2 }
 0x735   : > { %v3695_v5 = vpop.permute.xlu1 %3694  ;;  %3985 = vadd.xlane.f32.xlu1 %v3984_v62 }
 0x736   : > { %v3760_v60 = vsub.f32 %v12563_v10, %v3695_v5  ;;  %v10813_v62 = vpop.f32.mrf.mxu2  ;;  %v10815_v15 = vpop.f32.mrf.mxu1  ;;  %v12573_v10 = vld [vmem:[#allocation99_spill] sm:$0xff] }
 0x737   : > { %12571 = vst [vmem:[#allocation32_spill] sm:$0xff] %v10813_v62 }
 0x738   : > { %v7689_v23 = vpop.eup %7688  ;;  %v3817_v21 = vmul.f32 1.442695, %v3760_v60  ;;  %12572 = vst [vmem:[#allocation30_spill] sm:$0xff] %v10815_v15 }
 0x739   : > { %7425 = vmatmul.msk.f32.gmra.mxu3 %vm2571_vm3, %v7689_v23  ;;  %7430 = vmatmul.msk.f32.vlgmr.msrb.gmra.mxu2 %vm2571_vm3, %v7687_v26  ;;  %v3996_v6 = vsel %vm2571_vm3, %v7689_v23, 0.0  ;;  %v7691_v7 = vpop.eup %7690 }
 0x73a   : > { %7692 = vpow2.f32 %v3817_v21  ;;  %3997 = vadd.xlane.f32.xlu0 %v3996_v6  ;;  %v10819_v21 = vpop.f32.mrf.mxu3 }
 0x73b   : > { %12574 = vst [vmem:[#allocation83_spill] sm:$0xff] %v10819_v21 }
 0x73c   : > { %4000 = vadd.xlane.f32.xlu2 %v3999_v47 }
 0x73d   : > { %v3708_v38 = vpop.permute.xlu1 %3707  ;;  %3994 = vadd.xlane.f32.xlu1 %v3993_v22  ;;  %v4017_v22 = vsel %vm2571_vm3, %v7691_v7, 0.0 }
 0x73e   : > { %v3762_v8 = vsub.f32 %v12566_v0, %v3708_v38  ;;  %v10824_v38 = vpop.f32.mrf.mxu2  ;;  %v10826_v26 = vpop.f32.mrf.mxu1 }
 0x73f   : > { %12575 = vst [vmem:[#allocation37_spill] sm:$0xff] %v10824_v38 }
 0x740   : > { %v7693_v58 = vpop.eup %7692  ;;  %v3821_v28 = vmul.f32 1.442695, %v3762_v8  ;;  %12576 = vst [vmem:[#allocation74_spill] sm:$0xff] %v10826_v26 }
 0x741   : > { %7427 = vmatmul.msk.f32.gmra.mxu0 %vm2571_vm3, %v7693_v58  ;;  %7432 = vmatmul.msk.f32.vlgmr.msrb.gmra.mxu3 %vm2571_vm3, %v7691_v7  ;;  %v4002_v37 = vsel %vm2571_vm3, %v7693_v58, 0.0 }
 0x742   : > { %7694 = vpow2.f32 %v3821_v28  ;;  %4006 = vadd.xlane.f32.xlu0 %v4005_v35  ;;  %v10830_v58 = vpop.f32.mrf.mxu3 }
 0x743   : > { %12577 = vst [vmem:[#allocation72_spill] sm:$0xff] %v10830_v58 }
 0x745   : > { %v3721_v45 = vpop.permute.xlu1 %3720  ;;  %4003 = vadd.xlane.f32.xlu1 %v4002_v37 }
 0x746   : > { %v3764_v52 = vsub.f32 %v12570_v27, %v3721_v45  ;;  %v10832_v28 = vpop.f32.mrf.mxu2  ;;  %v10834_v35 = vpop.f32.mrf.mxu1 }
 0x747   : > { %12578 = vst [vmem:[#allocation77_spill] sm:$0xff] %v10832_v28 }
 0x748   : > { %v7695_v17 = vpop.eup %7694  ;;  %v3825_v11 = vmul.f32 1.442695, %v3764_v52  ;;  %12579 = vst [vmem:[#allocation86_spill] sm:$0xff] %v10834_v35 }
 0x749   : > { %7429 = vmatmul.msk.f32.gmra.mxu1 %vm2571_vm3, %v7695_v17  ;;  %v4008_v2 = vsel %vm2571_vm3, %v7695_v17, 0.0 }
 0x74a   : > { %7696 = vpow2.f32 %v3825_v11  ;;  %4009 = vadd.xlane.f32.xlu2 %v4008_v2  ;;  %v10836_v7 = vpop.f32.mrf.mxu3 }
 0x74b   : > { %12580 = vst [vmem:[#allocation73_spill] sm:$0xff] %v10836_v7 }
 0x74d   : > { %v3734_v5 = vpop.permute.xlu1 %3733  ;;  %4012 = vadd.xlane.f32.xlu1 %v4011_v33 }
 0x74e   : > { %v3766_v60 = vsub.f32 %v12573_v10, %v3734_v5  ;;  %v10838_v37 = vpop.f32.mrf.mxu2  ;;  %v10840_v45 = vpop.f32.mrf.mxu1 }
 0x74f   : > { %12581 = vst [vmem:[#allocation41_spill] sm:$0xff] %v10838_v37 }
 0x750   : > { %v7697_v23 = vpop.eup %7696  ;;  %v3829_v6 = vmul.f32 1.442695, %v3766_v60  ;;  %12582 = vst [vmem:[#allocation36_spill] sm:$0xff] %v10840_v45 }
 0x751   : > { %7431 = vmatmul.msk.f32.gmra.mxu2 %vm2571_vm3, %v7697_v23  ;;  %v4014_v47 = vsel %vm2571_vm3, %v7697_v23, 0.0 }
 0x752   : > { %7698 = vpow2.f32 %v3829_v6  ;;  %4015 = vadd.xlane.f32.xlu0 %v4014_v47  ;;  %4018 = vadd.xlane.f32.xlu2 %v4017_v22  ;;  %v10844_v52 = vpop.f32.mrf.mxu3 }
 0x753   : > { %12583 = vst [vmem:[#allocation70_spill] sm:$0xff] %v10844_v52 }
 0x755   : > { %v3935_v60 = vpop.xlane.xlu0 %3934 }
 0x756   : > { %v10842_v27 = vpop.f32.mrf.mxu0 }
 0x757   : > { %v6379_v11 = vrot.slane %v10842_v27, 4 }
 0x758   : > { %v7699_v0 = vpop.eup %7698 }
 0x759   : > { %7433 = vmatmul.msk.f32.gmra.mxu3 %vm2571_vm3, %v7699_v0  ;;  %v4020_v8 = vsel %vm2571_vm3, %v7699_v0, 0.0 }
 0x75a   : > { %4021 = vadd.xlane.f32.xlu1 %v4020_v8 }
 0x75e   : > { %v10849_v2 = vpop.f32.mrf.mxu1  ;;  %v5939_v5 = vpop.f32.mrf.mxu0 }
 0x75f   : > { %v6603_v23 = vrot.slane %v5939_v5, 4  ;;  %v6391_v6 = vrot.slane %v10849_v2, 4 }
 0x766   : > { %v5968_v45 = vpop.f32.mrf.mxu1 }
 0x76c   : > { %v10846_v17 = vpop.f32.mrf.mxu2 }
 0x76d   : > { %v6380_v10 = vsel %vm1051_vm2, %v10846_v17, %v6379_v11 }
 0x76e   : > { %v6388_v47 = vperm.slane %v6380_v10, %v12515_v18 }
 0x76f   : > { %v3929_v33 = vpop.xlane.xlu2 %3928 }
 0x770   : > { %v6439_v7 = vrot.slane %v6388_v47, 4 }
 0x774   : > { %v5997_v22 = vpop.f32.mrf.mxu2  ;;  %v10855_v0 = vpop.f32.mrf.mxu3 }
 0x775   : > { %v6601_v8 = vrot.slane %v5997_v22, 4  ;;  %v6604_v52 = vsel %vm1051_vm2, %v5997_v22, %v6603_v23  ;;  %v6392_v28 = vsel %vm1051_vm2, %v10855_v0, %v6391_v6  ;;  %v3944_v23 = vpop.xlane.xlu0 %3943  ;;  %v6615_v22 = vrot.slane %v5968_v45, 4 }
 0x776   : > { %v6400_v37 = vperm.slane %v6392_v28, %v12515_v18  ;;  %v6612_v21 = vperm.slane %v6604_v52, %v12515_v18  ;;  %v4062_v9 = vperm.slane %v3944_v23, %v9851_v4 }
 0x777   : > { %v6602_v11 = vsel %vm1051_vm2, %v6601_v8, %v5939_v5  ;;  %v3938_v58 = vpop.xlane.xlu2 %3937 }
 0x778   : > { %v6437_v35 = vrot.slane %v6400_v37, 4  ;;  %v3932_v62 = vpop.xlane.xlu1 %3931  ;;  %v10863_v10 = vsel %vm1051_vm2, %v6400_v37, %v6439_v7  ;;  %v6608_v28 = vperm.slane %v6602_v11, %v12515_v18  ;;  %v6663_v8 = vrot.slane %v6612_v21, 4 }
 0x779   : > { %12584 = vst [vmem:[#allocation47_spill] sm:$0xff] %v10863_v10  ;;  %v4056_v48 = vperm.slane %v3932_v62, %v9851_v4 }
 0x77a   : > { %v10867_v26 = vsel %vm1051_vm2, %v6437_v35, %v6388_v47  ;;  %v6651_v34 = vrot.slane %v6608_v28, 4 }
 0x77c   : > { %v6026_v6 = vpop.f32.mrf.mxu3 }
 0x77d   : > { %v6613_v38 = vrot.slane %v6026_v6, 4  ;;  %v6616_v5 = vsel %vm1051_vm2, %v6026_v6, %v6615_v22  ;;  %v3953_v15 = vpop.xlane.xlu0 %3952 }
 0x77e   : > { %v6624_v40 = vperm.slane %v6616_v5, %v12515_v18  ;;  %v10886_v5 = vpop.f32.mrf.mxu2  ;;  %v10890_v59 = vpop.f32.mrf.mxu1 }
 0x77f   : > { %v6614_v61 = vsel %vm1051_vm2, %v6613_v38, %v5968_v45  ;;  %v3947_v7 = vpop.xlane.xlu2 %3946  ;;  %v10884_v38 = vpop.f32.mrf.mxu0 }
 0x780   : > { %v6620_v37 = vperm.slane %v6614_v61, %v12515_v18  ;;  %v6661_v52 = vrot.slane %v6624_v40, 4  ;;  %v6664_v35 = vsel %vm1051_vm2, %v6624_v40, %v6663_v8  ;;  %v3941_v47 = vpop.xlane.xlu1 %3940  ;;  %v4059_v8 = vperm.slane %v3938_v58, %v9851_v4 }
 0x781   : > { %v4064_v62 = vperm.slane %v3947_v7, %v9574_v46 }
 0x782   : > { %v6649_v63 = vrot.slane %v6620_v37, 4  ;;  %v10876_v11 = vsel %vm1051_vm2, %v6620_v37, %v6651_v34  ;;  %v10879_v22 = vsel %vm1051_vm2, %v6661_v52, %v6612_v21  ;;  %v4061_v34 = vperm.slane %v3941_v47, %v9574_v46 }
 0x783   : > { %v4058_v37 = vperm.slane %v3935_v60, %v9574_v46 }
 0x784   : > { %v10882_v6 = vsel %vm1051_vm2, %v6649_v63, %v6608_v28  ;;  %v4055_v63 = vperm.slane %v3929_v33, %v9574_v46  ;;  %v4063_v47 = vsel %vm2799_vm6, %v4062_v9, %v4061_v34  ;;  %v4067_v9 = vperm.slane %v3953_v15, %v9574_v46 }
 0x785   : > { %v3962_v40 = vpop.xlane.xlu0 %3961  ;;  %v4060_v49 = vsel %vm2799_vm6, %v4059_v8, %v4058_v37  ;;  %v10901_v55 = vpop.f32.mrf.mxu3 }
 0x786   : > { %v4057_v58 = vsel %vm2799_vm6, %v4056_v48, %v4055_v63  ;;  %v4071_v48 = vperm.slane %v3962_v40, %v9851_v4 }
 0x787   : > { %v3956_v45 = vpop.xlane.xlu2 %3955  ;;  %v6055_v28 = vpop.f32.mrf.mxu0 }
 0x788   : > { %v3950_v61 = vpop.xlane.xlu1 %3949  ;;  %v6627_v14 = vrot.slane %v6055_v28, 4  ;;  %v4068_v23 = vperm.slane %v3956_v45, %v9851_v4 }
 0x789   : > { %v4065_v52 = vperm.slane %v3950_v61, %v9851_v4  ;;  %v4103_v61 = vsel %vm2846_vm7, %v4060_v49, %v4057_v58 }
 0x78a   : > { %v4104_v7 = vsel %vm2848_vm8, %v4063_v47, %v4103_v61  ;;  %v4069_v45 = vsel %vm2799_vm6, %v4068_v23, %v4067_v9  ;;  %v6672_v23 = vperm.slane %v6664_v35, %v12524_v30 }
 0x78b   : > { %v4066_v60 = vsel %vm2799_vm6, %v4065_v52, %v4064_v62  ;;  %v6084_v52 = vpop.f32.mrf.mxu1 }
 0x78c   : > { %v4105_v37 = vsel %vm2850_vm9, %v4066_v60, %v4104_v7 }
 0x78d   : > { %v3971_v34 = vpop.xlane.xlu0 %3970  ;;  %v4106_v15 = vsel %vm2852_vm10, %v4069_v45, %v4105_v37 }
 0x78e   : > { %v4076_v47 = vperm.slane %v3971_v34, %v9574_v46 }
 0x78f   : > { %v3965_v21 = vpop.xlane.xlu2 %3964 }
 0x790   : > { %v3959_v24 = vpop.xlane.xlu1 %3958 }
 0x791   : > { %v4070_v33 = vperm.slane %v3959_v24, %v9574_v46 }
 0x793   : > { %v4072_v49 = vsel %vm2799_vm6, %v4071_v48, %v4070_v33 }
 0x794   : > { %v6113_v32 = vpop.f32.mrf.mxu2 }
 0x795   : > { %v6625_v44 = vrot.slane %v6113_v32, 4  ;;  %v6628_v8 = vsel %vm1051_vm2, %v6113_v32, %v6627_v14  ;;  %v4073_v32 = vperm.slane %v3965_v21, %v9574_v46 }
 0x796   : > { %v6636_v62 = vperm.slane %v6628_v8, %v12515_v18 }
 0x797   : > { %v6626_v63 = vsel %vm1051_vm2, %v6625_v44, %v6055_v28  ;;  %v3974_v24 = vpop.xlane.xlu2 %3973  ;;  %v6639_v44 = vrot.slane %v6084_v52, 4  ;;  %v4107_v28 = vsel %vm2854_vm11, %v4072_v49, %v4106_v15  ;;  %v6668_v49 = vperm.slane %v10879_v22, %v12524_v30 }
 0x798   : > { %v3968_v58 = vpop.xlane.xlu1 %3967  ;;  %v4077_v14 = vperm.slane %v3974_v24, %v9851_v4  ;;  %v6632_v33 = vperm.slane %v6626_v63, %v12515_v18  ;;  %v6687_v8 = vrot.slane %v6636_v62, 4  ;;  %v6660_v63 = vperm.slane %v10876_v11, %v12524_v30 }
 0x799   : > { %v4074_v40 = vperm.slane %v3968_v58, %v9851_v4  ;;  %v6711_v15 = vrot.slane %v6672_v23, 4 }
 0x79a   : > { %v4078_v48 = vsel %vm2799_vm6, %v4077_v14, %v4076_v47  ;;  %v6675_v35 = vrot.slane %v6632_v33, 4  ;;  %v10940_v47 = vpop.xlane.xlu0 %3979 }
 0x79b   : > { %v4075_v60 = vsel %vm2799_vm6, %v4074_v40, %v4073_v32 }
 0x79c   : > { %v4108_v61 = vsel %vm2856_vm12, %v4075_v60, %v4107_v28  ;;  %v6142_v21 = vpop.f32.mrf.mxu3 }
 0x79d   : > { %v6637_v7 = vrot.slane %v6142_v21, 4  ;;  %v6640_v9 = vsel %vm1051_vm2, %v6142_v21, %v6639_v44  ;;  %v4109_v37 = vsel %vm2858_vm13, %v4078_v48, %v4108_v61  ;;  %v6703_v21 = vrot.slane %v6660_v63, 4 }
 0x79e   : > { %v6648_v34 = vperm.slane %v6640_v9, %v12515_v18  ;;  %4119 = vxpose.xlu0.b32.start [1/2] (short) (narrow) %v4109_v37, 16  ;;  %v6707_v48 = vrot.slane %v6668_v49, 4 }
 0x79f   : > { %v6638_v24 = vsel %vm1051_vm2, %v6637_v7, %v6084_v52  ;;  %v3983_v7 = vpop.xlane.xlu2 %3982 }
 0x7a0   : > { %v6644_v58 = vperm.slane %v6638_v24, %v12515_v18  ;;  %v6685_v45 = vrot.slane %v6648_v34, 4  ;;  %v6688_v32 = vsel %vm1051_vm2, %v6648_v34, %v6687_v8  ;;  %v10937_v14 = vpop.xlane.xlu1 %3976 }
 0x7a1   : > { %v6696_v40 = vperm.slane %v6688_v32, %v12524_v30 }
 0x7a2   : > { %v6673_v52 = vrot.slane %v6644_v58, 4  ;;  %v6686_v44 = vsel %vm1051_vm2, %v6685_v45, %v6636_v62  ;;  %v6676_v11 = vsel %vm1051_vm2, %v6644_v58, %v6675_v35  ;;  %v6656_v62 = vperm.slane %v10882_v6, %v12524_v30  ;;  %v10962_v35 = vpop.f32.mrf.mxu0 }
 0x7a3   : > { %v6684_v22 = vperm.slane %v6676_v11, %v12524_v30  ;;  %v6692_v28 = vperm.slane %v6686_v44, %v12524_v30  ;;  %v10947_v60 = vsel %vm1051_vm2, %v6696_v40, %v6711_v15  ;;  %v10964_v15 = vpop.f32.mrf.mxu2  ;;  %v6709_v11 = vrot.slane %v6696_v40, 4 }
 0x7a4   : > { %12585 = vst [vmem:[#allocation63_spill] sm:$0xff] %v10947_v60  ;;  %v6674_v61 = vsel %vm1051_vm2, %v6673_v52, %v6632_v33  ;;  %v6699_v45 = vrot.slane %v6656_v62, 4  ;;  %v3989_v52 = vpop.xlane.xlu0 %3988  ;;  %v10980_v60 = vpop.f32.mrf.mxu3 }
 0x7a5   : > { %v6701_v9 = vrot.slane %v6684_v22, 4  ;;  %v6680_v8 = vperm.slane %v6674_v61, %v12524_v30  ;;  %v10954_v34 = vsel %vm1051_vm2, %v6684_v22, %v6703_v21  ;;  %v10957_v37 = vsel %vm1051_vm2, %v6692_v28, %v6707_v48  ;;  %v10975_v61 = vpop.f32.mrf.mxu1 }
 0x7a6   : > { %12586 = vst [vmem:[#allocation64_spill] sm:$0xff] %v10954_v34  ;;  %v6705_v32 = vrot.slane %v6692_v28, 4  ;;  %v10978_v48 = vsel %vm1051_vm2, %v6709_v11, %v6672_v23 }
 0x7a7   : > { %12587 = vst [vmem:[#allocation87_spill] sm:$0xff] %v10957_v37  ;;  %v10960_v24 = vsel %vm1051_vm2, %v6701_v9, %v6660_v63  ;;  %v6697_v58 = vrot.slane %v6680_v8, 4  ;;  %v10970_v44 = vsel %vm1051_vm2, %v6680_v8, %v6699_v45  ;;  %v3992_v63 = vpop.xlane.xlu2 %3991 }
 0x7a8   : > { %12588 = vst [vmem:[#allocation40_spill] sm:$0xff] %v10960_v24  ;;  %v3986_v33 = vpop.xlane.xlu1 %3985  ;;  %v10973_v22 = vsel %vm1051_vm2, %v6705_v32, %v6668_v49 }
 0x7a9   : > { %v10967_v6 = vsel %vm1051_vm2, %v6697_v58, %v6656_v62  ;;  %12590 = vst [vmem:[#allocation28_spill] sm:$0xff] %v10970_v44  ;;  %v4083_v29 = vperm.slane %v3986_v33, %v9851_v4 }
 0x7aa   : > { %12589 = vst [vmem:[#allocation69_spill] sm:$0xff] %v10967_v6  ;;  %v6171_v21 = vpop.f32.mrf.mxu0 }
 0x7ab   : > { %12591 = vst [vmem:[#allocation89_spill] sm:$0xff] %v10973_v22  ;;  %v6715_v9 = vrot.slane %v6171_v21, 4 }
 0x7ac   : > { %12592 = vst [vmem:[#allocation44_spill] sm:$0xff] %v10978_v48 }
 0x7ad   : > { %v3998_v62 = vpop.xlane.xlu0 %3997  ;;  %v6200_v49 = vpop.f32.mrf.mxu1 }
 0x7ae   : > { %v6727_v34 = vrot.slane %v6200_v49, 4 }
 0x7af   : > { %v4001_v45 = vpop.xlane.xlu2 %4000 }
 0x7b0   : > { %v3995_v28 = vpop.xlane.xlu1 %3994 }
 0x7b4   : > { %v6229_v58 = vpop.f32.mrf.mxu2 }
 0x7b5   : > { %v6713_v37 = vrot.slane %v6229_v58, 4  ;;  %v6716_v8 = vsel %vm1051_vm2, %v6229_v58, %v6715_v9  ;;  %v4007_v24 = vpop.xlane.xlu0 %4006 }
 0x7b6   : > { %v6724_v32 = vperm.slane %v6716_v8, %v12515_v18 }
 0x7b7   : > { %v6714_v40 = vsel %vm1051_vm2, %v6713_v37, %v6171_v21 }
 0x7b8   : > { %v4004_v22 = vpop.xlane.xlu1 %4003  ;;  %v6720_v23 = vperm.slane %v6714_v40, %v12515_v18  ;;  %v6775_v6 = vrot.slane %v6724_v32, 4 }
 0x7ba   : > { %v6763_v8 = vrot.slane %v6720_v23, 4 }
 0x7bc   : > { %v6258_v44 = vpop.f32.mrf.mxu3 }
 0x7bd   : > { %v6725_v11 = vrot.slane %v6258_v44, 4  ;;  %v6728_v48 = vsel %vm1051_vm2, %v6258_v44, %v6727_v34  ;;  %v4010_v43 = vpop.xlane.xlu2 %4009  ;;  %v4082_v44 = vperm.slane %v3983_v7, %v9574_v46 }
 0x7be   : > { %v6736_v10 = vperm.slane %v6728_v48, %v12515_v18  ;;  %v4079_v48 = vperm.slane %v10937_v14, %v9574_v46  ;;  %v4089_v14 = vperm.slane %v3998_v62, %v9851_v4 }
 0x7bf   : > { %v6726_v9 = vsel %vm1051_vm2, %v6725_v11, %v6200_v49  ;;  %v4084_v33 = vsel %vm2799_vm6, %v4083_v29, %v4082_v44 }
 0x7c0   : > { %v6732_v37 = vperm.slane %v6726_v9, %v12515_v18  ;;  %v6773_v21 = vrot.slane %v6736_v10, 4  ;;  %v10991_v58 = vsel %vm1051_vm2, %v6736_v10, %v6775_v6  ;;  %v4013_v10 = vpop.xlane.xlu1 %4012  ;;  %v4080_v6 = vperm.slane %v10940_v47, %v9851_v4 }
 0x7c1   : > { %v4086_v9 = vperm.slane %v3992_v63, %v9851_v4  ;;  %v4091_v47 = vperm.slane %v4001_v45, %v9574_v46  ;;  %v4094_v63 = vperm.slane %v4007_v24, %v9574_v46  ;;  %v4097_v62 = vperm.slane %v4013_v10, %v9574_v46 }
 0x7c2   : > { %v6761_v40 = vrot.slane %v6732_v37, 4  ;;  %v10995_v1 = vsel %vm1051_vm2, %v6773_v21, %v6724_v32  ;;  %v10998_v34 = vsel %vm1051_vm2, %v6732_v37, %v6763_v8  ;;  %v4088_v32 = vperm.slane %v3995_v28, %v9574_v46 }
 0x7c3   : > { %v4092_v37 = vperm.slane %v4004_v22, %v9851_v4  ;;  %v4081_v7 = vsel %vm2799_vm6, %v4080_v6, %v4079_v48  ;;  %v4085_v21 = vperm.slane %v3989_v52, %v9574_v46 }
 0x7c4   : > { %v11004_v49 = vsel %vm1051_vm2, %v6761_v40, %v6720_v23  ;;  %v4095_v23 = vperm.slane %v4010_v43, %v9851_v4  ;;  %v4110_v8 = vsel %vm2846_vm7, %v4084_v33, %v4081_v7  ;;  %v4090_v28 = vsel %vm2799_vm6, %v4089_v14, %v4088_v32 }
 0x7c5   : > { %v4016_v11 = vpop.xlane.xlu0 %4015  ;;  %v4087_v22 = vsel %vm2799_vm6, %v4086_v9, %v4085_v21  ;;  %v4093_v40 = vsel %vm2799_vm6, %v4092_v37, %v4091_v47  ;;  %v4019_v44 = vpop.xlane.xlu2 %4018 }
 0x7c6   : > { %v4098_v29 = vperm.slane %v4016_v11, %v9851_v4  ;;  %v4111_v43 = vsel %vm2848_vm8, %v4087_v22, %v4110_v8  ;;  %v4096_v52 = vsel %vm2799_vm6, %v4095_v23, %v4094_v63  ;;  %v4100_v24 = vperm.slane %v4019_v44, %v9574_v46 }
 0x7c7   : > { %v4112_v48 = vsel %vm2850_vm9, %v4090_v28, %v4111_v43  ;;  %v12593_v63 = vmov 0  }
 0x7c8   : > { %v4099_v45 = vsel %vm2799_vm6, %v4098_v29, %v4097_v62  ;;  %v4113_v33 = vsel %vm2852_vm10, %v4093_v40, %v4112_v48 }
 0x7c9   : > { %v4114_v11 = vsel %vm2854_vm11, %v4096_v52, %v4113_v33 }
 0x7ca   : > { %v4115_v10 = vsel %vm2856_vm12, %v4099_v45, %v4114_v11 }
 0x7cd   : > { %v4022_v6 = vpop.xlane.xlu1 %4021 }
 0x7ce   : > { %v4101_v32 = vperm.slane %v4022_v6, %v9851_v4 }
 0x7d0   : > { %v4102_v9 = vsel %vm2799_vm6, %v4101_v32, %v4100_v24 }
 0x7d1   : > { %v4116_v37 = vsel %vm2858_vm13, %v4102_v9, %v4115_v10 }
 0x7d2   : > { %4120 = vxpose.xlu0.b32.end [2/2] (short) (narrow) %v4116_v37, 16 }
 0x839   : > { %7559 = vset.pattern.permute.xlu0 %v9565_v12 }
 0x86e   : > { %v4135_v7 = vpop.trf.xlu0 }
 0x86f   : > { %v4205_v14 = vperm.slane %v4135_v7, 4  ;;  %v4153_v23 = vperm.slane %v4135_v7, 0  ;;  %v4166_v46 = vperm.slane %v4135_v7, 1  ;;  %v4179_v8 = vperm.slane %v4135_v7, 2 }
 0x870   : > { %v4192_v47 = vperm.slane %v4135_v7, 3  ;;  %v4218_v28 = vperm.slane %v4135_v7, 5  ;;  %v4231_v22 = vperm.slane %v4135_v7, 6  ;;  %v4244_v40 = vperm.slane %v4135_v7, 7 }
 0x871   : > { %4216 = vperm.xlu0 %7559, %v4205_v14   ;;  %4164 = vperm.xlu1 %7557, %v4153_v23  }
 0x872   : > { %4158 = vperm.xlu2 %7558, %v4153_v23  }
 0x876   : > { %v11037_v4 = vpop.trf.xlu0 }
 0x877   : > { %v4309_v21 = vperm.slane %v11037_v4, 4  ;;  %v4335_v29 = vperm.slane %v11037_v4, 6  ;;  %v4257_v62 = vperm.slane %v11037_v4, 0  ;;  %v4270_v44 = vperm.slane %v11037_v4, 1 }
 0x878   : > { %v4283_v43 = vperm.slane %v11037_v4, 2  ;;  %v4296_v52 = vperm.slane %v11037_v4, 3  ;;  %v4322_v24 = vperm.slane %v11037_v4, 5 }
 0x879   : > { %7563 = vset.pattern.permute.xlu0 %v9555_v50  ;;  %4177 = vperm.xlu1 %7557, %v4166_v46  }
 0x87a   : > { %4171 = vperm.xlu2 %7558, %v4166_v46  }
 0x881   : > { %4190 = vperm.xlu1 %7557, %v4179_v8   ;;  %4314 = vperm.xlu0 %7563, %v4309_v21  }
 0x882   : > { %4184 = vperm.xlu2 %7558, %v4179_v8  }
 0x889   : > { %4203 = vperm.xlu1 %7557, %v4192_v47   ;;  %7565 = vset.pattern.permute.xlu0 %v9565_v12 }
 0x88a   : > { %4197 = vperm.xlu2 %7558, %v4192_v47  }
 0x891   : > { %7560 = vset.pattern.permute.xlu1 %v9555_v50  ;;  %4346 = vperm.xlu0 %7565, %v4335_v29  }
 0x892   : > { %4210 = vperm.xlu2 %7558, %v4205_v14  }
 0x899   : > { %4223 = vperm.xlu1 %7560, %v4218_v28   ;;  %7570 = vset.pattern.permute.xlu0 %v12593_v63 }
 0x89a   : > { %7561 = vset.pattern.permute.xlu2 %v9565_v12 }
 0x8a1   : > { %4236 = vperm.xlu1 %7560, %v4231_v22  }
 0x8a2   : > { %4229 = vperm.xlu2 %7561, %v4218_v28  }
 0x8a9   : > { %4249 = vperm.xlu1 %7560, %v4244_v40  }
 0x8aa   : > { %4242 = vperm.xlu2 %7561, %v4231_v22  }
 0x8b1   : > { %4262 = vperm.xlu1 %7560, %v4257_v62  }
 0x8b2   : > { %4255 = vperm.xlu2 %7561, %v4244_v40  }
 0x8b9   : > { %4275 = vperm.xlu1 %7560, %v4270_v44  }
 0x8ba   : > { %4268 = vperm.xlu2 %7561, %v4257_v62  }
 0x8c1   : > { %4288 = vperm.xlu1 %7560, %v4283_v43  }
 0x8c2   : > { %4281 = vperm.xlu2 %7561, %v4270_v44  }
 0x8c9   : > { %4301 = vperm.xlu1 %7560, %v4296_v52  }
 0x8ca   : > { %4294 = vperm.xlu2 %7561, %v4283_v43   ;;  %v4348_v43 = vperm.slane %v11037_v4, 7 }
 0x8cc   : > { %v4159_v48 = vpop.permute.xlu2 %4158 }
 0x8cd   : > { %v11053_v45 = vadd.f32 %v4159_v48, %v10381_v42 }
 0x8cf   : > { %7700 = vrcp.f32 %v11053_v45  ;;  %vm4430_vm5 = vweird.f32 %v11053_v45 }
 0x8d1   : > { %7562 = vset.pattern.permute.xlu1 %v9565_v12 }
 0x8d2   : > { %4320 = vperm.xlu2 %7561, %v4309_v21   ;;  %v6389_v21 = vrot.slane %v10855_v0, 4  ;;  %v6377_v0 = vrot.slane %v10846_v17, 4  ;;  %v4434_v17 = vand.u32 2147483647, %v11053_v45 }
 0x8d4   : > { %v4172_v6 = vpop.permute.xlu2 %4171  ;;  %vm4435_vm7 = vcmp.eq.f32.partialorder %v4434_v17, 8.507059e+37  ;;  %v6491_v17 = vrot.slane %v10962_v35, 4 }
 0x8d5   : > { %v4395_v33 = vadd.f32 %v4172_v6, %v10377_v16  ;;  %v7701_v32 = vpop.eup %7700  ;;  %v6413_v6 = vrot.slane %v10901_v55, 4 }
 0x8d6   : > { %v4426_v37 = vmul.f32 %v7701_v32, %v11053_v45  ;;  %vm4431_vm4 = vweird.f32 %v7701_v32 }
 0x8d7   : > { %7702 = vrcp.f32 %v4395_v33  ;;  %v4466_v42 = vand.u32 2147483648, %v4395_v33  ;;  %v4464_v14 = vand.u32 2147483647, %v4395_v33  ;;  %vm4460_vm15 = vweird.f32 %v4395_v33  ;;  %vm4432_vm6 = vmor %vm4430_vm5, %vm4431_vm4 }
 0x8d8   : > { %v4427_v23 = vsub.f32 1.0, %v4426_v37 }
 0x8d9   : > { %4307 = vperm.xlu1 %7562, %v4296_v52   ;;  %v4467_v28 = vor.u32 1.1754944e-38, %v4466_v42  ;;  %vm4465_vm3 = vcmp.eq.f32.partialorder %v4464_v14, 8.507059e+37  ;;  %v6414_v42 = vsel %vm1051_vm2, %v6413_v6, %v10890_v59  ;;  %v6401_v14 = vrot.slane %v10886_v5, 4 }
 0x8da   : > { %4333 = vperm.xlu2 %7561, %v4322_v24   ;;  %v4428_v44 = vmul.f32 %v7701_v32, %v4427_v23 }
 0x8dc   : > { %v4185_v11 = vpop.permute.xlu2 %4184  ;;  %v4429_v48 = vadd.f32 %v7701_v32, %v4428_v44 }
 0x8dd   : > { %v7703_v10 = vpop.eup %7702 }
 0x8de   : > { %v4456_v9 = vmul.f32 %v7703_v10, %v4395_v33  ;;  %vm4461_vm14 = vweird.f32 %v7703_v10 }
 0x8df   : > { %vm4462_vm1 = vmor %vm4460_vm15, %vm4461_vm14 }
 0x8e0   : > { %v4457_v7 = vsub.f32 1.0, %v4456_v9 }
 0x8e1   : > { %7564 = vset.pattern.permute.xlu1 %v9555_v50 }
 0x8e2   : > { %7566 = vset.pattern.permute.xlu2 %v9555_v50  ;;  %v4458_v16 = vmul.f32 %v7703_v10, %v4457_v7  ;;  %v6390_v50 = vsel %vm1051_vm2, %v6389_v21, %v10849_v2  ;;  %v4433_v7 = vsel %vm4432_vm6, %v7701_v32, %v4429_v48 }
 0x8e3   : > { %v4165_v46 = vpop.permute.xlu1 %4164  ;;  %v11072_v52 = vperm.slane %v6390_v50, %v12515_v18 }
 0x8e4   : > { %v4198_v8 = vpop.permute.xlu2 %4197  ;;  %v4459_v47 = vadd.f32 %v7703_v10, %v4458_v16  ;;  %v11063_v40 = vadd.f32 %v4165_v46, %v10398_v41 }
 0x8e5   : > { %v6425_v37 = vrot.slane %v11072_v52, 4 }
 0x8e6   : > { %v4463_v22 = vsel %vm4462_vm1, %v7703_v10, %v4459_v47  ;;  %7704 = vrcp.f32 %v11063_v40  ;;  %v6378_v10 = vsel %vm1051_vm2, %v6377_v0, %v10842_v27  ;;  %v6403_v47 = vrot.slane %v10884_v38, 4 }
 0x8e7   : > { %v4468_v62 = vsel %vm4465_vm3, %v4467_v28, %v4463_v22  ;;  %v11097_v27 = vperm.slane %v6378_v10, %v12515_v18  ;;  %v11122_v28 = vadd.f32 %v4198_v8, %v10396_v51  ;;  %vm4445_vm14 = vweird.f32 %v11063_v40 }
 0x8e8   : > { %6869 = vperm.xlu0 %7570, %v4468_v62  }
 0x8e9   : > { %4327 = vperm.xlu1 %7564, %v4322_v24   ;;  %v4436_v24 = vand.u32 2147483648, %v11053_v45 }
 0x8ea   : > { %4353 = vperm.xlu2 %7566, %v4348_v43  }
 0x8eb   : > { %v4178_v41 = vpop.permute.xlu1 %4177  ;;  %v4437_v16 = vor.u32 1.1754944e-38, %v4436_v24 }
 0x8ec   : > { %v11077_v2 = vadd.f32 %v4178_v41, %v10387_v19  ;;  %v4211_v33 = vpop.permute.xlu2 %4210  ;;  %v11090_v19 = vadd.f32 %v4185_v11, %v10393_v53  ;;  %v11094_v45 = vpop.eup %7704  ;;  %v11108_v11 = vperm.slane %v6414_v42, %v12515_v18 }
 0x8ed   : > { %v11086_v9 = vadd.f32 %v4211_v33, %v10400_v56  ;;  %v6415_v56 = vrot.slane %v10890_v59, 4  ;;  %v4438_v53 = vsel %vm4435_vm7, %v4437_v16, %v4433_v7  ;;  %v6426_v59 = vsel %vm1051_vm2, %v6425_v37, %v11097_v27  ;;  %v4217_v37 = vpop.permute.xlu0 %4216 }
 0x8ee   : > { %7706 = vrcp.f32 %v11077_v2  ;;  %v4441_v46 = vmul.f32 %v11094_v45, %v11063_v40  ;;  %v11130_v44 = vperm.slane %v6426_v59, %v12524_v30  ;;  %v6449_v50 = vrot.slane %v11108_v11, 4 }
 0x8ef   : > { %7708 = vrcp.f32 %v11086_v9  ;;  %v6416_v32 = vsel %vm1051_vm2, %v10901_v55, %v6415_v56  ;;  %v6402_v55 = vsel %vm1051_vm2, %v6401_v14, %v10884_v38  ;;  %v4481_v41 = vand.u32 2147483648, %v11077_v2 }
 0x8f0   : > { %7710 = vrcp.f32 %v11090_v19  ;;  %v11126_v62 = vperm.slane %v6416_v32, %v12515_v18  ;;  %v11138_v51 = vperm.slane %v6402_v55, %v12515_v18  ;;  %v4442_v8 = vsub.f32 1.0, %v4441_v46 }
 0x8f1   : > { %4340 = vperm.xlu1 %7564, %v4335_v29   ;;  %v6475_v10 = vrot.slane %v11130_v44, 4  ;;  %vm4475_vm9 = vweird.f32 %v11077_v2  ;;  %v11169_v55 = vadd.f32 %v4217_v37, %v10410_v39  ;;  %vm4446_vm12 = vweird.f32 %v11094_v45 }
 0x8f2   : > { %7568 = vset.pattern.permute.xlu2 %v12593_v63  ;;  %v6461_v24 = vrot.slane %v11126_v62, 4  ;;  %v4443_v59 = vmul.f32 %v11094_v45, %v4442_v8  ;;  %vm11197_vm1 = vmor %vm4445_vm14, %vm4446_vm12  ;;  %vm4490_vm5 = vweird.f32 %v11090_v19  ;;  %vm4550_vm7 = vweird.f32 %v11086_v9 }
 0x8f3   : > { %6859 = vperm.xlu2 %7568, %v4438_v53   ;;  %v4191_v23 = vpop.permute.xlu1 %4190 }
 0x8f4   : > { %v7707_v29 = vpop.eup %7706  ;;  %v11116_v21 = vadd.f32 %v4191_v23, %v10402_v25  ;;  %v6404_v25 = vsel %vm1051_vm2, %v10886_v5, %v6403_v47  ;;  %v4479_v5 = vand.u32 2147483647, %v11077_v2  ;;  %v4482_v23 = vor.u32 1.1754944e-38, %v4481_v41 }
 0x8f5   : > { %v4471_v22 = vmul.f32 %v7707_v29, %v11077_v2  ;;  %v11135_v38 = vpop.eup %7708  ;;  %vm4476_vm8 = vweird.f32 %v7707_v29  ;;  %v11147_v33 = vperm.slane %v6404_v25, %v12515_v18  ;;  %v4444_v39 = vadd.f32 %v11094_v45, %v4443_v59 }
 0x8f6   : > { %7712 = vrcp.f32 %v11116_v21  ;;  %v11141_v48 = vpop.eup %7710  ;;  %v4546_v7 = vmul.f32 %v11135_v38, %v11086_v9  ;;  %vm4477_vm10 = vmor %vm4475_vm9, %vm4476_vm8  ;;  %vm4480_vm11 = vcmp.eq.f32.partialorder %v4479_v5, 8.507059e+37  ;;  %v4509_v5 = vand.u32 2147483647, %v11116_v21 }
 0x8f7   : > { %v4472_v0 = vsub.f32 1.0, %v4471_v22  ;;  %7714 = vrcp.f32 %v11122_v28  ;;  %v4486_v56 = vmul.f32 %v11141_v48, %v11090_v19  ;;  %v4449_v22 = vand.u32 2147483647, %v11063_v40 }
 0x8f8   : > { %v11182_v41 = vsel %vm1051_vm2, %v6461_v24, %v11147_v33  ;;  %vm4505_vm15 = vweird.f32 %v11116_v21  ;;  %vm4510_vm6 = vcmp.eq.f32.partialorder %v4509_v5, 8.507059e+37  ;;  %vm4551_vm8 = vweird.f32 %v11135_v38 }
 0x8f9   : > { %7567 = vset.pattern.permute.xlu1 %v9565_v12  ;;  %v4473_v6 = vmul.f32 %v7707_v29, %v4472_v0  ;;  %v6450_v12 = vsel %vm1051_vm2, %v6449_v50, %v11138_v51  ;;  %v4547_v50 = vsub.f32 1.0, %v4546_v7  ;;  %v4487_v8 = vsub.f32 1.0, %v4486_v56 }
 0x8fa   : > { %v11194_v7 = vperm.slane %v6450_v12, %v12524_v30  ;;  %vm11201_vm3 = vcmp.eq.f32.partialorder %v4449_v22, 8.507059e+37  ;;  %v4448_v12 = vsel %vm11197_vm1, %v11094_v45, %v4444_v39  ;;  %v4556_v5 = vand.u32 2147483648, %v11086_v9 }
 0x8fb   : > { %v4204_v42 = vpop.permute.xlu1 %4203  ;;  %v4474_v16 = vadd.f32 %v7707_v29, %v4473_v6 }
 0x8fc   : > { %v7713_v14 = vpop.eup %7712  ;;  %v11160_v53 = vadd.f32 %v4204_v42, %v10406_v31  ;;  %v4230_v32 = vpop.permute.xlu2 %4229  ;;  %v4548_v42 = vmul.f32 %v11135_v38, %v4547_v50 }
 0x8fd   : > { %v4501_v46 = vmul.f32 %v7713_v14, %v11116_v21  ;;  %v11166_v2 = vadd.f32 %v4230_v32, %v10404_v20  ;;  %v4478_v47 = vsel %vm4477_vm10, %v7707_v29, %v4474_v16  ;;  %v11173_v25 = vpop.eup %7714  ;;  %v4451_v20 = vand.u32 2147483648, %v11063_v40  ;;  %vm11235_vm10 = vmor %vm4550_vm7, %vm4551_vm8 }
 0x8fe   : > { %7716 = vrcp.f32 %v11160_v53  ;;  %v4483_v31 = vsel %vm4480_vm11, %v4482_v23, %v4478_v47  ;;  %v4511_v29 = vand.u32 2147483648, %v11116_v21  ;;  %vm4506_vm13 = vweird.f32 %v7713_v14 }
 0x8ff   : > { %v4502_v0 = vsub.f32 1.0, %v4501_v46  ;;  %7718 = vrcp.f32 %v11166_v2  ;;  %6874 = vperm.xlu2 %7568, %v4483_v31   ;;  %v11189_v37 = vmul.f32 %v11173_v25, %v11122_v28  ;;  %vm4507_vm4 = vmor %vm4505_vm15, %vm4506_vm13  ;;  %v4452_v32 = vor.u32 1.1754944e-38, %v4451_v20  ;;  %v12598_v46 = vld [vmem:[#allocation59_spill] sm:$0xff] }
 0x900   : > { %7720 = vrcp.f32 %v11169_v55  ;;  %v4512_v40 = vor.u32 1.1754944e-38, %v4511_v29  ;;  %v4488_v21 = vmul.f32 %v11141_v48, %v4487_v8  ;;  %v4549_v20 = vadd.f32 %v11135_v38, %v4548_v42 }
 0x901   : > { %4359 = vperm.xlu1 %7567, %v4348_v43   ;;  %v4503_v6 = vmul.f32 %v7713_v14, %v4502_v0  ;;  %v4517_v22 = vsub.f32 1.0, %v11189_v37  ;;  %v4554_v8 = vand.u32 2147483647, %v11086_v9  ;;  %v4453_v39 = vsel %vm11201_vm3, %v4452_v32, %v4448_v12 }
 0x902   : > { %v4489_v43 = vadd.f32 %v11141_v48, %v4488_v21  ;;  %vm4491_vm11 = vweird.f32 %v11141_v48  ;;  %v4494_v42 = vand.u32 2147483647, %v11090_v19  ;;  %vm4535_vm12 = vweird.f32 %v11160_v53  ;;  %v12601_v21 = vld [vmem:[#allocation51_spill] sm:$0xff] }
 0x903   : > { %v4504_v24 = vadd.f32 %v7713_v14, %v4503_v6  ;;  %v4541_v6 = vand.u32 2147483648, %v11160_v53  ;;  %v4553_v9 = vsel %vm11235_vm10, %v11135_v38, %v4549_v20  ;;  %vm4555_vm15 = vcmp.eq.f32.partialorder %v4554_v8, 8.507059e+37  ;;  %vm11258_vm1 = vmor %vm4490_vm5, %vm4491_vm11  ;;  %v12604_v8 = vld [vmem:[#allocation52_spill] sm:$0xff]  ;;  %v12610_v38 = vld [vmem:[#allocation26_spill] sm:$0xff] }
 0x904   : > { %v7717_v16 = vpop.eup %7716  ;;  %v4243_v56 = vpop.permute.xlu2 %4242  ;;  %vm4521_vm5 = vweird.f32 %v11173_v25  ;;  %vm4520_vm8 = vweird.f32 %v11122_v28 }
 0x905   : > { %v11211_v23 = vpop.eup %7718  ;;  %v4531_v59 = vmul.f32 %v7717_v16, %v11160_v53  ;;  %v11215_v47 = vadd.f32 %v4243_v56, %v12598_v46  ;;  %v4508_v31 = vsel %vm4507_vm4, %v7713_v14, %v4504_v24  ;;  %vm4536_vm9 = vweird.f32 %v7717_v16 }
 0x906   : > { %v4591_v50 = vmul.f32 %v11211_v23, %v11166_v2  ;;  %v4513_v45 = vsel %vm4510_vm6, %v4512_v40, %v4508_v31  ;;  %v11224_v29 = vpop.eup %7720  ;;  %v4539_v24 = vand.u32 2147483647, %v11160_v53  ;;  %v4496_v56 = vand.u32 2147483648, %v11090_v19  ;;  %vm4537_vm13 = vmor %vm4535_vm12, %vm4536_vm9 }
 0x907   : > { %v4532_v0 = vsub.f32 1.0, %v4531_v59  ;;  %6884 = vperm.xlu2 %7568, %v4513_v45   ;;  %7722 = vrcp.f32 %v11215_v47  ;;  %v4561_v32 = vmul.f32 %v11224_v29, %v11169_v55  ;;  %v4542_v31 = vor.u32 1.1754944e-38, %v4541_v6  ;;  %vm11303_vm9 = vmor %vm4520_vm8, %vm4521_vm5 }
 0x908   : > { %v4592_v14 = vsub.f32 1.0, %v4591_v50  ;;  %v4557_v50 = vor.u32 1.1754944e-38, %v4556_v5  ;;  %vm4540_vm14 = vcmp.eq.f32.partialorder %v4539_v24, 8.507059e+37  ;;  %v4518_v53 = vmul.f32 %v11173_v25, %v4517_v22 }
 0x909   : > { %7569 = vset.pattern.permute.xlu1 %v12593_v63  ;;  %v4533_v37 = vmul.f32 %v7717_v16, %v4532_v0  ;;  %v4497_v19 = vor.u32 1.1754944e-38, %v4496_v56  ;;  %vm4596_vm3 = vweird.f32 %v11211_v23  ;;  %v4562_v22 = vsub.f32 1.0, %v4561_v32 }
 0x90a   : > { %6864 = vperm.xlu1 %7569, %v4453_v39   ;;  %v4593_v12 = vmul.f32 %v11211_v23, %v4592_v14  ;;  %v4558_v20 = vsel %vm4555_vm15, %v4557_v50, %v4553_v9  ;;  %vm4495_vm4 = vcmp.eq.f32.partialorder %v4494_v42, 8.507059e+37  ;;  %v4601_v5 = vand.u32 2147483648, %v11166_v2 }
 0x90b   : > { %v4224_v63 = vpop.permute.xlu1 %4223  ;;  %v4534_v40 = vadd.f32 %v7717_v16, %v4533_v37  ;;  %vm4595_vm6 = vweird.f32 %v11166_v2  ;;  %v4519_v24 = vadd.f32 %v11173_v25, %v4518_v53  ;;  %v4526_v42 = vand.u32 2147483648, %v11122_v28 }
 0x90c   : > { %v11251_v59 = vadd.f32 %v4224_v63, %v12601_v21  ;;  %v4256_v46 = vpop.permute.xlu2 %4255  ;;  %v4594_v6 = vadd.f32 %v11211_v23, %v4593_v12  ;;  %vm11281_vm7 = vmor %vm4595_vm6, %vm4596_vm3  ;;  %v6473_v56 = vrot.slane %v11194_v7, 4  ;;  %v11289_v63 = vperm.slane %v11182_v41, %v12524_v30  ;;  %v12607_v21 = vld [vmem:[#allocation48_spill] sm:$0xff] }
 0x90d   : > { %v4538_v45 = vsel %vm4537_vm13, %v7717_v16, %v4534_v40  ;;  %v4493_v16 = vsel %vm11258_vm1, %v11141_v48, %v4489_v43  ;;  %v11267_v14 = vpop.eup %7722  ;;  %v11270_v39 = vadd.f32 %v4256_v46, %v12604_v8  ;;  %v4599_v48 = vand.u32 2147483647, %v11166_v2 }
 0x90e   : > { %7724 = vrcp.f32 %v11251_v59  ;;  %v4543_v0 = vsel %vm4540_vm14, %v4542_v31, %v4538_v45  ;;  %v4498_v37 = vsel %vm4495_vm4, %v4497_v19, %v4493_v16  ;;  %v4621_v4 = vmul.f32 %v11267_v14, %v11215_v47 }
 0x90f   : > { %6894 = vperm.xlu0 %7570, %v4543_v0   ;;  %6899 = vperm.xlu2 %7568, %v4558_v20   ;;  %7726 = vrcp.f32 %v11270_v39  ;;  %v4598_v40 = vsel %vm11281_vm7, %v11211_v23, %v4594_v6  ;;  %v4524_v9 = vand.u32 2147483647, %v11122_v28  ;;  %v6489_v32 = vrot.slane %v10964_v15, 4 }
 0x910   : > { %v4602_v41 = vor.u32 1.1754944e-38, %v4601_v5  ;;  %v4563_v23 = vmul.f32 %v11224_v29, %v4562_v22  ;;  %vm4600_vm10 = vcmp.eq.f32.partialorder %v4599_v48, 8.507059e+37  ;;  %v4523_v53 = vsel %vm11303_vm9, %v11173_v25, %v4519_v24 }
 0x911   : > { %v4622_v0 = vsub.f32 1.0, %v4621_v4  ;;  %v4527_v16 = vor.u32 1.1754944e-38, %v4526_v42  ;;  %v6503_v8 = vrot.slane %v10975_v61, 4  ;;  %vm4525_vm11 = vcmp.eq.f32.partialorder %v4524_v9, 8.507059e+37 }
 0x912   : > { %6879 = vperm.xlu1 %7569, %v4498_v37   ;;  %v4603_v20 = vsel %vm4600_vm10, %v4602_v41, %v4598_v40  ;;  %v11321_v6 = vsel %vm1051_vm2, %v11194_v7, %v6475_v10  ;;  %v4586_v5 = vand.u32 2147483648, %v11251_v59  ;;  %v4564_v25 = vadd.f32 %v11224_v29, %v4563_v23  ;;  %v4315_v23 = vpop.permute.xlu0 %4314 }
 0x913   : > { %v4237_v2 = vpop.permute.xlu1 %4236  ;;  %v4528_v22 = vsel %vm4525_vm11, %v4527_v16, %v4523_v53  ;;  %vm4566_vm12 = vweird.f32 %v11224_v29  ;;  %v4584_v24 = vand.u32 2147483647, %v11251_v59  ;;  %v6490_v4 = vsel %vm1051_vm2, %v6489_v32, %v10962_v35 }
 0x914   : > { %v7725_v12 = vpop.eup %7724  ;;  %v11299_v46 = vadd.f32 %v4237_v2, %v12607_v21  ;;  %v4269_v31 = vpop.permute.xlu2 %4268  ;;  %vm4565_vm14 = vweird.f32 %v11169_v55  ;;  %v4623_v10 = vmul.f32 %v11267_v14, %v4622_v0  ;;  %v6474_v7 = vsel %vm1051_vm2, %v6473_v56, %v11130_v44 }
 0x915   : > { %v4576_v45 = vmul.f32 %v7725_v12, %v11251_v59  ;;  %v11310_v28 = vadd.f32 %v4269_v31, %v12610_v38  ;;  %v11326_v37 = vpop.eup %7726  ;;  %vm4581_vm13 = vweird.f32 %v7725_v12  ;;  %vm4580_vm15 = vweird.f32 %v11251_v59  ;;  %vm11337_vm1 = vmor %vm4565_vm14, %vm4566_vm12  ;;  %v12613_v31 = vld [vmem:[#allocation24_spill] sm:$0xff] }
 0x916   : > { %7728 = vrcp.f32 %v11299_v46  ;;  %v4569_v40 = vand.u32 2147483647, %v11169_v55  ;;  %v4571_v9 = vand.u32 2147483648, %v11169_v55  ;;  %v4651_v21 = vmul.f32 %v11326_v37, %v11270_v39  ;;  %vm4582_vm3 = vmor %vm4580_vm15, %vm4581_vm13 }
 0x917   : > { %v4577_v19 = vsub.f32 1.0, %v4576_v45  ;;  %6914 = vperm.xlu2 %7568, %v4603_v20   ;;  %7730 = vrcp.f32 %v11310_v28  ;;  %v4587_v59 = vor.u32 1.1754944e-38, %v4586_v5  ;;  %v4568_v56 = vsel %vm11337_vm1, %v11224_v29, %v4564_v25  ;;  %v12614_v45 = vld [vmem:[#allocation61_spill] sm:$0xff] }
 0x918   : > { %vm4585_vm4 = vcmp.eq.f32.partialorder %v4584_v24, 8.507059e+37  ;;  %vm4626_vm5 = vweird.f32 %v11267_v14  ;;  %v4624_v0 = vadd.f32 %v11267_v14, %v4623_v10  ;;  %v4572_v29 = vor.u32 1.1754944e-38, %v4571_v9 }
 0x919   : > { %v4578_v48 = vmul.f32 %v7725_v12, %v4577_v19  ;;  %v4629_v19 = vand.u32 2147483647, %v11215_v47  ;;  %v4652_v5 = vsub.f32 1.0, %v4651_v21  ;;  %vm4570_vm6 = vcmp.eq.f32.partialorder %v4569_v40, 8.507059e+37 }
 0x91a   : > { %6889 = vperm.xlu1 %7569, %v4528_v22   ;;  %v11367_v22 = vperm.slane %v6490_v4, %v12515_v18  ;;  %vm4625_vm7 = vweird.f32 %v11215_v47  ;;  %v6501_v25 = vrot.slane %v10980_v60, 4  ;;  %v4573_v10 = vsel %vm4570_vm6, %v4572_v29, %v4568_v56  ;;  %v12621_v29 = vld [vmem:[#allocation75_spill] sm:$0xff] }
 0x91b   : > { %v4250_v43 = vpop.permute.xlu1 %4249  ;;  %v4579_v42 = vadd.f32 %v7725_v12, %v4578_v48  ;;  %v12615_v48 = vld [vmem:[#allocation84_spill] sm:$0xff]  ;;  %vm11376_vm8 = vmor %vm4625_vm7, %vm4626_vm5  ;;  %vm4630_vm10 = vcmp.eq.f32.partialorder %v4629_v19, 8.507059e+37  ;;  %v4616_v21 = vand.u32 2147483648, %v11299_v46  ;;  %vm4610_vm11 = vweird.f32 %v11299_v46 }
 0x91c   : > { %v11343_v32 = vpop.eup %7728  ;;  %v11348_v41 = vadd.f32 %v4250_v43, %v12613_v31  ;;  %v4282_v44 = vpop.permute.xlu2 %4281  ;;  %v11372_v24 = vadd.f32 %v4315_v23, %v12615_v48  ;;  %vm4656_vm14 = vweird.f32 %v11326_v37  ;;  %vm4655_vm1 = vweird.f32 %v11270_v39 }
 0x91d   : > { %v4606_v50 = vmul.f32 %v11343_v32, %v11299_v46  ;;  %v4583_v55 = vsel %vm4582_vm3, %v7725_v12, %v4579_v42  ;;  %v11359_v38 = vadd.f32 %v4282_v44, %v12614_v45  ;;  %v11362_v20 = vpop.eup %7730  ;;  %v4631_v12 = vand.u32 2147483648, %v11215_v47 }
 0x91e   : > { %7732 = vrcp.f32 %v11348_v41  ;;  %v4588_v53 = vsel %vm4585_vm4, %v4587_v59, %v4583_v55  ;;  %v4681_v4 = vmul.f32 %v11362_v20, %v11310_v28  ;;  %v4628_v47 = vsel %vm11376_vm8, %v11267_v14, %v4624_v0  ;;  %v12618_v59 = vld [vmem:[#allocation22_spill] sm:$0xff]  ;;  %vm11430_vm4 = vmor %vm4655_vm1, %vm4656_vm14 }
 0x91f   : > { %v4607_v16 = vsub.f32 1.0, %v4606_v50  ;;  %6909 = vperm.xlu0 %7570, %v4588_v53   ;;  %7734 = vrcp.f32 %v11359_v38  ;;  %vm4611_vm9 = vweird.f32 %v11343_v32  ;;  %v4632_v40 = vor.u32 1.1754944e-38, %v4631_v12 }
 0x920   : > { %v4614_v50 = vand.u32 2147483647, %v11299_v46  ;;  %v4653_v14 = vmul.f32 %v11326_v37, %v4652_v5  ;;  %v6539_v55 = vrot.slane %v11367_v22, 4  ;;  %vm11400_vm12 = vmor %vm4610_vm11, %vm4611_vm9  ;;  %v11405_v0 = vadd.f32 %v6474_v7, %v10699_v3 }
 0x921   : > { %v4608_v42 = vmul.f32 %v11343_v32, %v4607_v16  ;;  %v4633_v45 = vsel %vm4630_vm10, %v4632_v40, %v4628_v47  ;;  %v4682_v16 = vsub.f32 1.0, %v4681_v4  ;;  %v6502_v12 = vsel %vm1051_vm2, %v6501_v25, %v10975_v61 }
 0x922   : > { %6904 = vperm.xlu1 %7569, %v4573_v10   ;;  %v4617_v48 = vor.u32 1.1754944e-38, %v4616_v21  ;;  %vm4615_vm13 = vcmp.eq.f32.partialorder %v4614_v50, 8.507059e+37  ;;  %v4646_v7 = vand.u32 2147483648, %v11348_v41  ;;  %v4654_v10 = vadd.f32 %v11326_v37, %v4653_v14 }
 0x923   : > { %v4263_v2 = vpop.permute.xlu1 %4262  ;;  %v4609_v9 = vadd.f32 %v11343_v32, %v4608_v42  ;;  %v4659_v25 = vand.u32 2147483647, %v11270_v39  ;;  %v4683_v4 = vmul.f32 %v11362_v20, %v4682_v16  ;;  %vm4640_vm3 = vweird.f32 %v11348_v41 }
 0x924   : > { %v7733_v31 = vpop.eup %7732  ;;  %v4295_v44 = vpop.permute.xlu2 %4294  ;;  %v11391_v56 = vadd.f32 %v4263_v2, %v12618_v59  ;;  %v4661_v21 = vand.u32 2147483648, %v11270_v39  ;;  %v11439_v59 = vsel %vm1051_vm2, %v10980_v60, %v6503_v8  ;;  %v11442_v50 = vperm.slane %v6502_v12, %v12515_v18 }
 0x925   : > { %v4636_v23 = vmul.f32 %v7733_v31, %v11348_v41  ;;  %v11408_v19 = vadd.f32 %v4295_v44, %v12621_v29  ;;  %v4613_v46 = vsel %vm11400_vm12, %v11343_v32, %v4609_v9  ;;  %v11417_v3 = vpop.eup %7734  ;;  %vm4641_vm15 = vweird.f32 %v7733_v31  ;;  %v11457_v29 = vpop.f32.mrf.mxu2 }
 0x926   : > { %7736 = vrcp.f32 %v11391_v56  ;;  %v4618_v43 = vsel %vm4615_vm13, %v4617_v48, %v4613_v46  ;;  %v4644_v32 = vand.u32 2147483647, %v11348_v41  ;;  %v4711_v47 = vmul.f32 %v11417_v3, %v11359_v38  ;;  %vm4642_vm5 = vmor %vm4640_vm3, %vm4641_vm15 }
 0x927   : > { %7738 = vrcp.f32 %v11372_v24  ;;  %v4637_v5 = vsub.f32 1.0, %v4636_v23  ;;  %6924 = vperm.xlu0 %7570, %v4633_v45   ;;  %v12624_v23 = vld [vmem:[#allocation62_spill] sm:$0xff]  ;;  %v4647_v41 = vor.u32 1.1754944e-38, %v4646_v7  ;;  %v4658_v60 = vsel %vm11430_vm4, %v11326_v37, %v4654_v10 }
 0x928   : > { %7740 = vrcp.f32 %v11408_v19  ;;  %vm4645_vm6 = vcmp.eq.f32.partialorder %v4644_v32, 8.507059e+37  ;;  %v4684_v8 = vadd.f32 %v11362_v20, %v4683_v4  ;;  %vm4686_vm7 = vweird.f32 %v11362_v20 }
 0x929   : > { %v4638_v42 = vmul.f32 %v7733_v31, %v4637_v5  ;;  %v4712_v46 = vsub.f32 1.0, %v4711_v47  ;;  %vm4660_vm8 = vcmp.eq.f32.partialorder %v4659_v25, 8.507059e+37  ;;  %v4662_v5 = vor.u32 1.1754944e-38, %v4661_v21 }
 0x92a   : > { %6919 = vperm.xlu1 %7569, %v4618_v43   ;;  %vm4685_vm9 = vweird.f32 %v11310_v28  ;;  %v4689_v37 = vand.u32 2147483647, %v11310_v28  ;;  %v4691_v48 = vand.u32 2147483648, %v11310_v28  ;;  %v4676_v7 = vand.u32 2147483648, %v11391_v56 }
 0x92b   : > { %v4276_v2 = vpop.permute.xlu1 %4275  ;;  %v4639_v40 = vadd.f32 %v7733_v31, %v4638_v42  ;;  %v4663_v10 = vsel %vm4660_vm8, %v4662_v5, %v4658_v60  ;;  %vm11465_vm10 = vmor %vm4685_vm9, %vm4686_vm7  ;;  %v4674_v32 = vand.u32 2147483647, %v11391_v56  ;;  %v6537_v25 = vrot.slane %v11442_v50, 4 }
 0x92c   : > { %v7737_v44 = vpop.eup %7736  ;;  %v4321_v14 = vpop.permute.xlu2 %4320  ;;  %v11445_v45 = vadd.f32 %v4276_v2, %v12624_v23  ;;  %v6513_v4 = vrot.slane %v11457_v29, 4  ;;  %v4688_v28 = vsel %vm11465_vm10, %v11362_v20, %v4684_v8  ;;  %vm4670_vm12 = vweird.f32 %v11391_v56  ;;  %v12628_v20 = vld [vmem:[#allocation71_spill] sm:$0xff] }
 0x92d   : > { %v11448_v53 = vpop.eup %7738  ;;  %v4666_v39 = vmul.f32 %v7737_v44, %v11391_v56  ;;  %v4643_v16 = vsel %vm4642_vm5, %v7733_v31, %v4639_v40  ;;  %vm4671_vm11 = vweird.f32 %v7737_v44  ;;  %v4713_v21 = vmul.f32 %v11417_v3, %v4712_v46  ;;  %v12629_v56 = vld [vmem:[#allocation60_spill] sm:$0xff] }
 0x92e   : > { %7742 = vrcp.f32 %v11445_v45  ;;  %v4648_v61 = vsel %vm4645_vm6, %v4647_v41, %v4643_v16  ;;  %v11459_v31 = vpop.eup %7740  ;;  %v11474_v47 = vmul.f32 %v11448_v53, %v11372_v24  ;;  %vm4690_vm13 = vcmp.eq.f32.partialorder %v4689_v37, 8.507059e+37  ;;  %vm4672_vm14 = vmor %vm4670_vm12, %vm4671_vm11 }
 0x92f   : > { %v4667_v12 = vsub.f32 1.0, %v4666_v39  ;;  %6929 = vperm.xlu2 %7568, %v4648_v61   ;;  %v4741_v2 = vmul.f32 %v11459_v31, %v11408_v19  ;;  %v12627_v39 = vld [vmem:[#allocation53_spill] sm:$0xff]  ;;  %v4692_v60 = vor.u32 1.1754944e-38, %v4691_v48  ;;  %v4677_v61 = vor.u32 1.1754944e-38, %v4676_v7 }
 0x930   : > { %v11488_v8 = vadd.f32 %v4321_v14, %v12628_v20  ;;  %vm4675_vm15 = vcmp.eq.f32.partialorder %v4674_v32, 8.507059e+37  ;;  %v4714_v14 = vadd.f32 %v11417_v3, %v4713_v21  ;;  %vm4716_vm1 = vweird.f32 %v11417_v3 }
 0x931   : > { %v4668_v42 = vmul.f32 %v7737_v44, %v4667_v12  ;;  %v4693_v46 = vsel %vm4690_vm13, %v4692_v60, %v4688_v28  ;;  %v4742_v37 = vsub.f32 1.0, %v4741_v2  ;;  %vm4715_vm3 = vweird.f32 %v11359_v38  ;;  %v11503_v28 = vpop.f32.mrf.mxu0 }
 0x932   : > { %6934 = vperm.xlu1 %7569, %v4663_v10   ;;  %v4721_v7 = vand.u32 2147483648, %v11359_v38  ;;  %v4706_v32 = vand.u32 2147483648, %v11445_v45  ;;  %vm11511_vm5 = vmor %vm4715_vm3, %vm4716_vm1  ;;  %vm4700_vm6 = vweird.f32 %v11445_v45  ;;  %vm4746_vm10 = vweird.f32 %v11459_v31 }
 0x933   : > { %v4289_v40 = vpop.permute.xlu1 %4288  ;;  %v4669_v9 = vadd.f32 %v7737_v44, %v4668_v42  ;;  %v11495_v42 = vpop.f32.mrf.mxu3  ;;  %v4718_v60 = vsel %vm11511_vm5, %v11417_v3, %v4714_v14  ;;  %vm4745_vm12 = vweird.f32 %v11408_v19 }
 0x934   : > { %v7743_v23 = vpop.eup %7742  ;;  %v4334_v41 = vpop.permute.xlu2 %4333  ;;  %v11484_v16 = vadd.f32 %v4289_v40, %v12627_v39  ;;  %v4704_v40 = vand.u32 2147483647, %v11445_v45  ;;  %v6525_v21 = vrot.slane %v11495_v42, 4  ;;  %vm11553_vm13 = vmor %vm4745_vm12, %vm4746_vm10 }
 0x935   : > { %v4696_v12 = vmul.f32 %v7743_v23, %v11445_v45  ;;  %v4673_v5 = vsel %vm4672_vm14, %v7737_v44, %v4669_v9  ;;  %v11492_v10 = vadd.f32 %v4334_v41, %v12629_v56  ;;  %v4719_v44 = vand.u32 2147483647, %v11359_v38  ;;  %v11530_v3 = vpop.f32.mrf.mxu1 }
 0x936   : > { %7744 = vrcp.f32 %v11484_v16  ;;  %v4678_v43 = vsel %vm4675_vm15, %v4677_v61, %v4673_v5  ;;  %vm4701_vm4 = vweird.f32 %v7743_v23  ;;  %v6514_v9 = vsel %vm1051_vm2, %v6513_v4, %v11503_v28  ;;  %v12632_v5 = vld [vmem:[#allocation76_spill] sm:$0xff] }
 0x937   : > { %v4697_v48 = vsub.f32 1.0, %v4696_v12  ;;  %6944 = vperm.xlu2 %7568, %v4693_v46   ;;  %6939 = vperm.xlu0 %7570, %v4678_v43   ;;  %7746 = vrcp.f32 %v11488_v8  ;;  %v11517_v38 = vsel %vm1051_vm2, %v6537_v25, %v11367_v22  ;;  %v4743_v4 = vmul.f32 %v11459_v31, %v4742_v37  ;;  %vm4702_vm7 = vmor %vm4700_vm6, %vm4701_vm4 }
 0x938   : > { %7748 = vrcp.f32 %v11492_v10  ;;  %v4787_v12 = vsub.f32 1.0, %v11474_v47  ;;  %v4722_v46 = vor.u32 1.1754944e-38, %v4721_v7  ;;  %v4707_v25 = vor.u32 1.1754944e-38, %v4706_v32 }
 0x939   : > { %v4698_v2 = vmul.f32 %v7743_v23, %v4697_v48  ;;  %vm4720_vm8 = vcmp.eq.f32.partialorder %v4719_v44, 8.507059e+37  ;;  %vm4705_vm9 = vcmp.eq.f32.partialorder %v4704_v40, 8.507059e+37  ;;  %v11533_v45 = vperm.slane %v6514_v9, %v12515_v18 }
 0x93a   : > { %v4723_v47 = vsel %vm4720_vm8, %v4722_v46, %v4718_v60  ;;  %v6526_v7 = vsel %vm1051_vm2, %v6525_v21, %v11530_v3  ;;  %v4749_v40 = vand.u32 2147483647, %v11408_v19  ;;  %v4751_v9 = vand.u32 2147483648, %v11408_v19 }
 0x93b   : > { %v4302_v39 = vpop.permute.xlu1 %4301  ;;  %v4699_v61 = vadd.f32 %v7743_v23, %v4698_v2  ;;  %v4736_v2 = vand.u32 2147483648, %v11484_v16  ;;  %v4788_v41 = vmul.f32 %v11448_v53, %v4787_v12  ;;  %v4734_v21 = vand.u32 2147483647, %v11484_v16 }
 0x93c   : > { %v7745_v20 = vpop.eup %7744  ;;  %v11526_v56 = vadd.f32 %v4302_v39, %v12632_v5  ;;  %v6532_v60 = vperm.slane %v6526_v7, %v12515_v18  ;;  %vm4790_vm14 = vweird.f32 %v11372_v24  ;;  %vm4791_vm15 = vweird.f32 %v11448_v53  ;;  %v12635_v7 = vld [vmem:[#allocation66_spill] sm:$0xff] }
 0x93d   : > { %v4726_v43 = vmul.f32 %v7745_v20, %v11484_v16  ;;  %v4703_v48 = vsel %vm4702_vm7, %v7743_v23, %v4699_v61  ;;  %v11536_v14 = vpop.eup %7746  ;;  %v4744_v23 = vadd.f32 %v11459_v31, %v4743_v4  ;;  %vm4731_vm11 = vweird.f32 %v7745_v20  ;;  %vm11581_vm6 = vmor %vm4790_vm14, %vm4791_vm15 }
 0x93e   : > { %7750 = vrcp.f32 %v11526_v56  ;;  %v4708_v37 = vsel %vm4705_vm9, %v4707_v25, %v4703_v48  ;;  %v11542_v44 = vpop.eup %7748  ;;  %v4801_v61 = vmul.f32 %v11536_v14, %v11488_v8  ;;  %vm4730_vm1 = vweird.f32 %v11484_v16 }
 0x93f   : > { %v4727_v32 = vsub.f32 1.0, %v4726_v43  ;;  %6954 = vperm.xlu0 %7570, %v4723_v47   ;;  %6949 = vperm.xlu1 %7569, %v4708_v37   ;;  %v4831_v12 = vmul.f32 %v11542_v44, %v11492_v10  ;;  %v4748_v19 = vsel %vm11553_vm13, %v11459_v31, %v4744_v23  ;;  %vm4732_vm3 = vmor %vm4730_vm1, %vm4731_vm11  ;;  %v4737_v43 = vor.u32 1.1754944e-38, %v4736_v2 }
 0x940   : > { %vm4750_vm4 = vcmp.eq.f32.partialorder %v4749_v40, 8.507059e+37  ;;  %v4752_v48 = vor.u32 1.1754944e-38, %v4751_v9  ;;  %v4789_v47 = vadd.f32 %v11448_v53, %v4788_v41  ;;  %vm4735_vm5 = vcmp.eq.f32.partialorder %v4734_v21, 8.507059e+37 }
 0x941   : > { %v4728_v39 = vmul.f32 %v7745_v20, %v4727_v32  ;;  %v4794_v31 = vand.u32 2147483647, %v11372_v24  ;;  %v4796_v23 = vand.u32 2147483648, %v11372_v24  ;;  %v4802_v2 = vsub.f32 1.0, %v4801_v61 }
 0x942   : > { %v4753_v4 = vsel %vm4750_vm4, %v4752_v48, %v4748_v19  ;;  %v4832_v40 = vsub.f32 1.0, %v4831_v12  ;;  %v6563_v41 = vrot.slane %v11533_v45, 4  ;;  %v6540_v61 = vsel %vm1051_vm2, %v11442_v50, %v6539_v55 }
 0x943   : > { %v4729_v5 = vadd.f32 %v7745_v20, %v4728_v39  ;;  %v4793_v19 = vsel %vm11581_vm6, %v11448_v53, %v4789_v47  ;;  %vm4795_vm8 = vcmp.eq.f32.partialorder %v4794_v31, 8.507059e+37  ;;  %v4797_v24 = vor.u32 1.1754944e-38, %v4796_v23 }
 0x944   : > { %v7751_v46 = vpop.eup %7750  ;;  %v4354_v25 = vpop.permute.xlu2 %4353  ;;  %v6564_v22 = vsel %vm1051_vm2, %v6532_v60, %v6563_v41  ;;  %vm4760_vm9 = vweird.f32 %v11526_v56  ;;  %v4803_v55 = vmul.f32 %v11536_v14, %v4802_v2  ;;  %v4833_v50 = vmul.f32 %v11542_v44, %v4832_v40 }
 0x945   : > { %v4756_v37 = vmul.f32 %v7751_v46, %v11526_v56  ;;  %v11568_v32 = vadd.f32 %v4354_v25, %v12635_v7  ;;  %v4733_v39 = vsel %vm4732_vm3, %v7745_v20, %v4729_v5  ;;  %v6561_v25 = vrot.slane %v6532_v60, 4  ;;  %v12638_v7 = vld [vmem:[#allocation25_spill] sm:$0xff] }
 0x946   : > { %v4738_v16 = vsel %vm4735_vm5, %v4737_v43, %v4733_v39  ;;  %v4766_v20 = vand.u32 2147483648, %v11526_v56  ;;  %vm4761_vm7 = vweird.f32 %v7751_v46  ;;  %v4764_v5 = vand.u32 2147483647, %v11526_v56 }
 0x947   : > { %v4757_v9 = vsub.f32 1.0, %v4756_v37  ;;  %7752 = vrcp.f32 %v11568_v32  ;;  %6959 = vperm.xlu2 %7568, %v4738_v16   ;;  %6964 = vperm.xlu1 %7569, %v4753_v4   ;;  %v11595_v43 = vperm.slane %v11517_v38, %v12524_v30  ;;  %vm4762_vm10 = vmor %vm4760_vm9, %vm4761_vm7  ;;  %v4798_v47 = vsel %vm4795_vm8, %v4797_v24, %v4793_v19  ;;  %v4347_v19 = vpop.permute.xlu0 %4346  ;;  %v7764_v24 = vld [vmem:[%s7865_s29] sm:$0xff] }
 0x948   : > { %v4767_v53 = vor.u32 1.1754944e-38, %v4766_v20  ;;  %v6562_v38 = vsel %vm1051_vm2, %v6561_v25, %v11533_v45  ;;  %v11609_v60 = vstv %s11570_s8  ;;  %vm4765_vm11 = vcmp.eq.f32.partialorder %v4764_v5, 8.507059e+37 }
 0x949   : > { %v4758_v12 = vmul.f32 %v7751_v46, %v4757_v9  ;;  %vm4806_vm12 = vweird.f32 %v11536_v14  ;;  %v4804_v45 = vadd.f32 %v11536_v14, %v4803_v55  ;;  %vm4805_vm13 = vweird.f32 %v11488_v8 }
 0x94a   : > { %vm4836_vm14 = vweird.f32 %v11542_v44  ;;  %v4811_v41 = vand.u32 2147483648, %v11488_v8  ;;  %v4841_v25 = vand.u32 2147483648, %v11492_v10  ;;  %vm11632_vm15 = vmor %vm4805_vm13, %vm4806_vm12  ;;  %v4809_v20 = vand.u32 2147483647, %v11488_v8 }
 0x94b   : > { %v4308_v48 = vpop.permute.xlu1 %4307  ;;  %v4759_v37 = vadd.f32 %v7751_v46, %v4758_v12  ;;  %vm4835_vm1 = vweird.f32 %v11492_v10  ;;  %v4839_v21 = vand.u32 2147483647, %v11492_v10  ;;  %v11640_v12 = vperm.slane %v6562_v38, %v12524_v30  ;;  %v12643_v38 = vld [vmem:[#allocation56_spill] sm:$0xff] }
 0x94c   : > { %v11602_v39 = vadd.f32 %v4308_v48, %v12638_v7  ;;  %v11644_v5 = vperm.slane %v11439_v59, %v12515_v18  ;;  %vm11649_vm3 = vmor %vm4835_vm1, %vm4836_vm14  ;;  %v6827_v8 = vadd.f32 %v11321_v6, %v10722_v57  ;;  %v11656_v10 = vperm.slane %v6564_v22, %v12524_v30 }
 0x94d   : > { %v11606_v16 = vpop.eup %7752  ;;  %v6860_v4 = vpop.permute.xlu2 %6859  ;;  %v4763_v31 = vsel %vm4762_vm10, %v7751_v46, %v4759_v37  ;;  %v4834_v46 = vadd.f32 %v11542_v44, %v4833_v50  ;;  %v4808_v59 = vsel %vm11632_vm15, %v11536_v14, %v4804_v45  ;;  %v6587_v50 = vrot.slane %v11595_v43, 4 }
 0x94e   : > { %v4876_v56 = vmul.f32 %v11606_v16, %v11568_v32  ;;  %7754 = vrcp.f32 %v11602_v39  ;;  %v7017_v23 = vmul.f32 %v6860_v4, %v11405_v0  ;;  %v4768_v2 = vsel %vm4765_vm11, %v4767_v53, %v4763_v31 }
 0x94f   : > { %6969 = vperm.xlu0 %7570, %v4768_v2   ;;  %6979 = vperm.xlu1 %7569, %v4798_v47   ;;  %v4838_v55 = vsel %vm11649_vm3, %v11542_v44, %v4834_v46  ;;  %v6527_v47 = vrot.slane %v11530_v3, 4  ;;  %v4812_v57 = vor.u32 1.1754944e-38, %v4811_v41  ;;  %v4842_v6 = vor.u32 1.1754944e-38, %v4841_v25 }
 0x950   : > { %v4877_v40 = vsub.f32 1.0, %v4876_v56  ;;  %v7050_v9 = vmul.f32 %v11609_v60, %v7017_v23  ;;  %v11670_v22 = vperm.slane %v6540_v61, %v12524_v30  ;;  %vm4810_vm4 = vcmp.eq.f32.partialorder %v4809_v20, 8.507059e+37 }
 0x951   : > { %vm4840_vm5 = vcmp.eq.f32.partialorder %v4839_v21, 8.507059e+37  ;;  %v6588_v44 = vsel %vm1051_vm2, %v11640_v12, %v6587_v50  ;;  %v11676_v4 = vadd.f32 %v4347_v19, %v12643_v38  ;;  %v4813_v31 = vsel %vm4810_vm4, %v4812_v57, %v4808_v59  ;;  %v7767_v21 = vld [vmem:[%s7865_s29 + $0x28] sm:$0xff] }
 0x952   : > { %v7082_v48 = vadd.f32 %v7764_v24, %v7050_v9  ;;  %v4878_v7 = vmul.f32 %v11606_v16, %v4877_v40  ;;  %v4843_v56 = vsel %vm4840_vm5, %v4842_v6, %v4838_v55  ;;  %v6589_v3 = vrot.slane %v11656_v10, 4  ;;  %v12646_v55 = vld [vmem:[#allocation80_spill] sm:$0xff] }
 0x953   : > { %v6528_v23 = vsel %vm1051_vm2, %v11495_v42, %v6527_v47  ;;  %vm4881_vm6 = vweird.f32 %v11606_v16  ;;  %v6828_v45 = vadd.f32 %v6588_v44, %v10736_v54  ;;  %v4781_v46 = vand.u32 2147483648, %v11602_v39 }
 0x954   : > { %v7755_v53 = vpop.eup %7754  ;;  %7114 = vst.msk [vmem:[%s11628_s11] sm:$0xff] %vm247_vm0, %v7082_v48  ;;  %v4879_v61 = vadd.f32 %v11606_v16, %v4878_v7  ;;  %vm4880_vm7 = vweird.f32 %v11568_v32  ;;  %v4886_v40 = vand.u32 2147483648, %v11568_v32  ;;  %v4779_v42 = vand.u32 2147483647, %v11602_v39 }
 0x955   : > { %v4771_v14 = vmul.f32 %v7755_v53, %v11602_v39  ;;  %vm4776_vm8 = vweird.f32 %v7755_v53  ;;  %v4884_v25 = vand.u32 2147483647, %v11568_v32  ;;  %v11690_v0 = vperm.slane %v6528_v23, %v12515_v18  ;;  %vm11693_vm9 = vmor %vm4880_vm7, %vm4881_vm6 }
 0x956   : > { %7756 = vrcp.f32 %v11676_v4  ;;  %v6590_v19 = vsel %vm1051_vm2, %v6589_v3, %v11670_v22  ;;  %vm4775_vm10 = vweird.f32 %v11602_v39  ;;  %v4883_v32 = vsel %vm11693_vm9, %v11606_v16, %v4879_v61  ;;  %v7765_v39 = vld [vmem:[%s7865_s29 + $0x18] sm:$0xff] }
 0x957   : > { %v4772_v2 = vsub.f32 1.0, %v4771_v14  ;;  %6984 = vperm.xlu0 %7570, %v4813_v31   ;;  %6994 = vperm.xlu1 %7569, %v4843_v56   ;;  %vm4777_vm11 = vmor %vm4775_vm10, %vm4776_vm8  ;;  %v4782_v7 = vor.u32 1.1754944e-38, %v4781_v46  ;;  %v4887_v47 = vor.u32 1.1754944e-38, %v4886_v40  ;;  %vm4780_vm12 = vcmp.eq.f32.partialorder %v4779_v42, 8.507059e+37  ;;  %v7766_v31 = vld [vmem:[%s7865_s29 + $0x10] sm:$0xff] }
 0x958   : > { %vm4885_vm13 = vcmp.eq.f32.partialorder %v4884_v25, 8.507059e+37  ;;  %v6492_v44 = vsel %vm1051_vm2, %v10964_v15, %v6491_v17  ;;  %v6515_v38 = vrot.slane %v11503_v28, 4  ;;  %v6549_v3 = vrot.slane %v11644_v5, 4  ;;  %v12647_v42 = vld [vmem:[#allocation85_spill] sm:$0xff] }
 0x959   : > { %v6875_v9 = vpop.permute.xlu2 %6874  ;;  %v4773_v41 = vmul.f32 %v7755_v53, %v4772_v2  ;;  %v4888_v14 = vsel %vm4885_vm13, %v4887_v47, %v4883_v32  ;;  %v6830_v23 = vadd.f32 %v6590_v19, %v10743_v36  ;;  %v6481_v17 = vrot.slane %v11289_v63, 4 }
 0x95a   : > { %v7020_v20 = vmul.f32 %v6875_v9, %v6828_v45  ;;  %v6870_v54 = vpop.permute.xlu0 %6869  ;;  %v6516_v35 = vsel %vm1051_vm2, %v11457_v29, %v6515_v38  ;;  %v11729_v28 = vperm.slane %v6492_v44, %v12515_v18  ;;  %v6573_v2 = vrot.slane %v11690_v0, 4 }
 0x95b   : > { %v7019_v24 = vmul.f32 %v6870_v54, %v6827_v8  ;;  %v4328_v48 = vpop.permute.xlu1 %4327  ;;  %v4774_v37 = vadd.f32 %v7755_v53, %v4773_v41  ;;  %v11736_v36 = vperm.slane %v10867_v26, %v12524_v30  ;;  %v11741_v9 = vperm.slane %v6516_v35, %v12515_v18 }
 0x95c   : > { %v7053_v59 = vmul.f32 %v11609_v60, %v7020_v20  ;;  %v11705_v50 = vadd.f32 %v4328_v48, %v12646_v55  ;;  %v6550_v40 = vsel %vm1051_vm2, %v6549_v3, %v11729_v28  ;;  %v7768_v3 = vld [vmem:[%s7865_s29 + $0x40] sm:$0xff]  ;;  %vm4865_vm5 = vweird.f32 %v11676_v4 }
 0x95d   : > { %v7052_v8 = vmul.f32 %v11609_v60, %v7019_v24  ;;  %v4778_v57 = vsel %vm4777_vm11, %v7755_v53, %v4774_v37  ;;  %v11717_v53 = vpop.eup %7756  ;;  %v6482_v54 = vsel %vm1051_vm2, %v6481_v17, %v11736_v36  ;;  %v6574_v19 = vsel %vm1051_vm2, %v6573_v2, %v11741_v9  ;;  %v11775_v17 = vpop.f32.mrf.mxu3  ;;  %v12648_v2 = vld [vmem:[#allocation88_spill] sm:$0xff] }
 0x95e   : > { %v7085_v6 = vadd.f32 %v7765_v39, %v7053_v59  ;;  %7758 = vrcp.f32 %v11705_v50  ;;  %v4783_v16 = vsel %vm4780_vm12, %v4782_v7, %v4778_v57  ;;  %v4861_v45 = vmul.f32 %v11717_v53, %v11676_v4 }
 0x95f   : > { %v7084_v56 = vadd.f32 %v7766_v31, %v7052_v8  ;;  %6974 = vperm.xlu2 %7568, %v4783_v16   ;;  %7009 = vperm.xlu1 %7569, %v4888_v14   ;;  %v11755_v37 = vperm.slane %v6550_v40, %v12524_v30  ;;  %v6833_v32 = vadd.f32 %v6482_v54, %v10757_v13  ;;  %v4826_v59 = vand.u32 2147483648, %v11705_v50 }
 0x960   : > { %7117 = vst.msk [vmem:[%s11628_s11 + $0x18] sm:$0xff] %vm247_vm0, %v7085_v6  ;;  %v4862_v24 = vsub.f32 1.0, %v4861_v45  ;;  %v4824_v47 = vand.u32 2147483647, %v11705_v50  ;;  %v11763_v8 = vperm.slane %v6574_v19, %v12524_v30  ;;  %vm4820_vm15 = vweird.f32 %v11705_v50 }
 0x961   : > { %7116 = vst.msk [vmem:[%s11628_s11 + $0x10] sm:$0xff] %vm247_vm0, %v7084_v56  ;;  %v6885_v15 = vpop.permute.xlu2 %6884  ;;  %v6595_v6 = vrot.slane %v11755_v37, 4  ;;  %v4827_v44 = vor.u32 1.1754944e-38, %v4826_v59  ;;  %vm4866_vm4 = vweird.f32 %v11717_v53  ;;  %v6749_v19 = vrot.slane %v11775_v17, 4 }
 0x962   : > { %v7022_v61 = vmul.f32 %v6885_v15, %v6830_v23  ;;  %v4863_v16 = vmul.f32 %v11717_v53, %v4862_v24  ;;  %vm4825_vm3 = vcmp.eq.f32.partialorder %v4824_v47, 8.507059e+37  ;;  %vm11786_vm7 = vmor %vm4865_vm5, %vm4866_vm4 }
 0x963   : > { %v4341_v46 = vpop.permute.xlu1 %4340  ;;  %v6596_v56 = vsel %vm1051_vm2, %v11763_v8, %v6595_v6 }
 0x964   : > { %v7759_v29 = vpop.eup %7758  ;;  %v7055_v41 = vmul.f32 %v11609_v60, %v7022_v61  ;;  %v11745_v25 = vadd.f32 %v4341_v46, %v12647_v42  ;;  %v4864_v15 = vadd.f32 %v11717_v53, %v4863_v16  ;;  %v6836_v61 = vadd.f32 %v6596_v56, %v12648_v2  ;;  %v11827_v2 = vpop.f32.mrf.mxu0 }
 0x965   : > { %v4816_v20 = vmul.f32 %v7759_v29, %v11705_v50  ;;  %vm4821_vm14 = vweird.f32 %v7759_v29  ;;  %v4871_v46 = vand.u32 2147483648, %v11676_v4  ;;  %v4869_v42 = vand.u32 2147483647, %v11676_v4 }
 0x966   : > { %v7087_v26 = vadd.f32 %v7767_v21, %v7055_v41  ;;  %7760 = vrcp.f32 %v11745_v25  ;;  %vm4822_vm1 = vmor %vm4820_vm15, %vm4821_vm14  ;;  %v4856_v45 = vand.u32 2147483648, %v11745_v25  ;;  %v4854_v41 = vand.u32 2147483647, %v11745_v25  ;;  %v12654_v21 = vld [vmem:[#allocation58_spill] sm:$0xff] }
 0x967   : > { %v4817_v48 = vsub.f32 1.0, %v4816_v20  ;;  %v6451_v20 = vrot.slane %v11138_v51, 4  ;;  %vm4850_vm8 = vweird.f32 %v11745_v25  ;;  %v4868_v4 = vsel %vm11786_vm7, %v11717_v53, %v4864_v15  ;;  %v7769_v53 = vld [vmem:[%s7865_s29 + $0x58] sm:$0xff] }
 0x968   : > { %7119 = vst.msk [vmem:[%s11628_s11 + $0x28] sm:$0xff] %vm247_vm0, %v7087_v26  ;;  %v6585_v26 = vrot.slane %v11640_v12, 4  ;;  %v4872_v12 = vor.u32 1.1754944e-38, %v4871_v46  ;;  %vm4855_vm10 = vcmp.eq.f32.partialorder %v4854_v41, 8.507059e+37  ;;  %vm4870_vm11 = vcmp.eq.f32.partialorder %v4869_v42, 8.507059e+37 }
 0x969   : > { %v6900_v55 = vpop.permute.xlu2 %6899  ;;  %v4818_v7 = vmul.f32 %v7759_v29, %v4817_v48  ;;  %v6452_v47 = vsel %vm1051_vm2, %v11108_v11, %v6451_v20 }
 0x96a   : > { %v7025_v57 = vmul.f32 %v6900_v55, %v6833_v32  ;;  %v12651_v32 = vld [vmem:[#allocation55_spill] sm:$0xff]  ;;  %v4857_v55 = vor.u32 1.1754944e-38, %v4856_v45  ;;  %v4873_v16 = vsel %vm4870_vm11, %v4872_v12, %v4868_v4  ;;  %v6586_v11 = vsel %vm1051_vm2, %v6585_v26, %v11595_v43 }
 0x96b   : > { %v4819_v39 = vadd.f32 %v7759_v29, %v4818_v7 }
 0x96c   : > { %v7761_v13 = vpop.eup %7760  ;;  %v7058_v14 = vmul.f32 %v11609_v60, %v7025_v57  ;;  %v11804_v57 = vpop.f32.mrf.mxu2 }
 0x96d   : > { %v4846_v38 = vmul.f32 %v7761_v13, %v11745_v25  ;;  %v4823_v31 = vsel %vm4822_vm1, %v7759_v29, %v4819_v39  ;;  %vm4851_vm6 = vweird.f32 %v7761_v13  ;;  %v11802_v25 = vpop.f32.mrf.mxu1 }
 0x96e   : > { %v7090_v23 = vadd.f32 %v7768_v3, %v7058_v14  ;;  %v4828_v50 = vsel %vm4825_vm3, %v4827_v44, %v4823_v31  ;;  %vm4852_vm9 = vmor %vm4850_vm8, %vm4851_vm6  ;;  %v6750_v14 = vsel %vm1051_vm2, %v6749_v19, %v11802_v25  ;;  %v6427_v44 = vrot.slane %v11097_v27, 4  ;;  %v12652_v3 = vld [vmem:[#allocation45_spill] sm:$0xff] }
 0x96f   : > { %v4847_v35 = vsub.f32 1.0, %v4846_v38  ;;  %6989 = vperm.xlu2 %7568, %v4828_v50   ;;  %v6737_v38 = vrot.slane %v11804_v57, 4  ;;  %v6463_v31 = vrot.slane %v11147_v33, 4  ;;  %v11819_v56 = vperm.slane %v6750_v14, %v12515_v18 }
 0x970   : > { %7122 = vst.msk [vmem:[%s11628_s11 + $0x40] sm:$0xff] %vm247_vm0, %v7090_v23  ;;  %v6826_v23 = vadd.f32 %v6586_v11, %v12652_v3  ;;  %v6591_v50 = vrot.slane %v11670_v22, 4  ;;  %v7771_v3 = vld [vmem:[%s7865_s29 + $0x38] sm:$0xff] }
 0x971   : > { %v6915_v29 = vpop.permute.xlu2 %6914  ;;  %v4848_v40 = vmul.f32 %v7761_v13, %v4847_v35  ;;  %v6428_v35 = vsel %vm1051_vm2, %v11072_v52, %v6427_v44  ;;  %v6464_v43 = vsel %vm1051_vm2, %v11126_v62, %v6463_v31  ;;  %v6738_v33 = vsel %vm1051_vm2, %v6737_v38, %v11827_v2  ;;  %v12653_v52 = vld [vmem:[#allocation47_spill] sm:$0xff] }
 0x972   : > { %v7028_v54 = vmul.f32 %v6915_v29, %v6836_v61  ;;  %v6592_v22 = vsel %vm1051_vm2, %v11656_v10, %v6591_v50  ;;  %v11836_v29 = vperm.slane %v12653_v52, %v12524_v30  ;;  %v6785_v62 = vrot.slane %v11819_v56, 4 }
 0x973   : > { %v4360_v24 = vpop.permute.xlu1 %4359  ;;  %v4849_v48 = vadd.f32 %v7761_v13, %v4848_v40  ;;  %v6436_v40 = vperm.slane %v6428_v35, %v12524_v30  ;;  %v11842_v20 = vperm.slane %v6464_v43, %v12524_v30  ;;  %v6832_v10 = vadd.f32 %v6592_v22, %v12654_v21 }
 0x974   : > { %v7061_v51 = vmul.f32 %v11609_v60, %v7028_v54  ;;  %v11798_v59 = vadd.f32 %v4360_v24, %v12651_v32  ;;  %v11845_v54 = vperm.slane %v6738_v33, %v12515_v18  ;;  %v7770_v24 = vld [vmem:[%s7865_s29 + $0x8] sm:$0xff]  ;;  %v6487_v12 = vrot.slane %v11836_v29, 4  ;;  %v7772_v33 = vld [vmem:[%s7865_s29 + $0x20] sm:$0xff] }
 0x975   : > { %v4853_v7 = vsel %vm4852_vm9, %v7761_v13, %v4849_v48  ;;  %v6460_v13 = vperm.slane %v6452_v47, %v12524_v30  ;;  %v12655_v47 = vld [vmem:[#allocation49_spill] sm:$0xff]  ;;  %v6479_v50 = vrot.slane %v6436_v40, 4  ;;  %v6575_v43 = vrot.slane %v11741_v9, 4 }
 0x976   : > { %v7093_v39 = vadd.f32 %v7769_v53, %v7061_v51  ;;  %7762 = vrcp.f32 %v11798_v59  ;;  %v4858_v6 = vsel %vm4855_vm10, %v4857_v55, %v4853_v7  ;;  %v4901_v19 = vand.u32 2147483648, %v11798_v59 }
 0x977   : > { %6999 = vperm.xlu0 %7570, %v4858_v6   ;;  %7004 = vperm.xlu2 %7568, %v4873_v16   ;;  %v6477_v61 = vrot.slane %v6460_v13, 4  ;;  %v4899_v32 = vand.u32 2147483647, %v11798_v59  ;;  %v6786_v7 = vsel %vm1051_vm2, %v6785_v62, %v11845_v54  ;;  %vm4895_vm13 = vweird.f32 %v11798_v59 }
 0x978   : > { %7125 = vst.msk [vmem:[%s11628_s11 + $0x58] sm:$0xff] %vm247_vm0, %v7093_v39  ;;  %v4902_v14 = vor.u32 1.1754944e-38, %v4901_v19  ;;  %v6488_v11 = vsel %vm1051_vm2, %v11842_v20, %v6487_v12  ;;  %v11863_v31 = vperm.slane %v6786_v7, %v12524_v30  ;;  %v6576_v52 = vsel %vm1051_vm2, %v11690_v0, %v6575_v43  ;;  %v7776_v43 = vld [vmem:[%s7865_s29 + $0x50] sm:$0xff] }
 0x979   : > { %v6478_v26 = vsel %vm1051_vm2, %v6477_v61, %v6436_v40  ;;  %vm4900_vm15 = vcmp.eq.f32.partialorder %v4899_v32, 8.507059e+37  ;;  %v12657_v40 = vld [vmem:[#allocation34_spill] sm:$0xff]  ;;  %v6584_v0 = vperm.slane %v6576_v52, %v12524_v30 }
 0x97a   : > { %v6829_v53 = vadd.f32 %v6478_v26, %v12655_v47  ;;  %v6809_v22 = vrot.slane %v11863_v31, 4 }
 0x97c   : > { %v7763_v15 = vpop.eup %7762  ;;  %v6865_v27 = vpop.permute.xlu1 %6864 }
 0x97d   : > { %v4891_v45 = vmul.f32 %v7763_v15, %v11798_v59  ;;  %v7018_v46 = vmul.f32 %v6865_v27, %v6826_v23  ;;  %vm4896_vm12 = vweird.f32 %v7763_v15  ;;  %v12656_v27 = vld [vmem:[#allocation81_spill] sm:$0xff] }
 0x97e   : > { %vm4897_vm14 = vmor %vm4895_vm13, %vm4896_vm12  ;;  %v6839_v61 = vadd.f32 %v6488_v11, %v12656_v27 }
 0x97f   : > { %v4892_v41 = vsub.f32 1.0, %v4891_v45  ;;  %v7051_v42 = vmul.f32 %v11609_v60, %v7018_v46 }
 0x981   : > { %v7083_v48 = vadd.f32 %v7770_v24, %v7051_v42  ;;  %v6895_v4 = vpop.permute.xlu0 %6894  ;;  %v4893_v51 = vmul.f32 %v7763_v15, %v4892_v41  ;;  %v11881_v41 = vperm.slane %v11004_v49, %v12524_v30  ;;  %v6551_v49 = vrot.slane %v11729_v28, 4 }
 0x982   : > { %v7024_v55 = vmul.f32 %v6895_v4, %v6832_v10  ;;  %v6593_v10 = vrot.slane %v11763_v8, 4  ;;  %v12658_v8 = vld [vmem:[#allocation82_spill] sm:$0xff] }
 0x983   : > { %7115 = vst.msk [vmem:[%s11628_s11 + $0x8] sm:$0xff] %vm247_vm0, %v7083_v48  ;;  %v4894_v39 = vadd.f32 %v7763_v15, %v4893_v51  ;;  %v6810_v19 = vsel %vm1051_vm2, %v6809_v22, %v11881_v41  ;;  %v7773_v48 = vld [vmem:[%s7865_s29 + $0x70] sm:$0xff]  ;;  %v6552_v51 = vsel %vm1051_vm2, %v11644_v5, %v6551_v49  ;;  %v12660_v5 = vld [vmem:[#allocation19_spill] sm:$0xff] }
 0x984   : > { %v7057_v6 = vmul.f32 %v11609_v60, %v7024_v55  ;;  %v6880_v16 = vpop.permute.xlu1 %6879  ;;  %v6842_v32 = vadd.f32 %v6810_v19, %v12658_v8  ;;  %v12659_v55 = vld [vmem:[#allocation57_spill] sm:$0xff]  ;;  %v6594_v7 = vsel %vm1051_vm2, %v6593_v10, %v11755_v37  ;;  %v6560_v11 = vperm.slane %v6552_v51, %v12524_v30  ;;  %v12663_v19 = vld [vmem:[#allocation30_spill] sm:$0xff] }
 0x985   : > { %v7021_v44 = vmul.f32 %v6880_v16, %v6829_v53  ;;  %v4898_v38 = vsel %vm4897_vm14, %v7763_v15, %v4894_v39  ;;  %v6480_v15 = vsel %vm1051_vm2, %v6460_v13, %v6479_v50  ;;  %v6483_v13 = vrot.slane %v11736_v36, 4  ;;  %v7775_v50 = vld [vmem:[%s7865_s29 + $0x88] sm:$0xff] }
 0x986   : > { %v7089_v23 = vadd.f32 %v7771_v3, %v7057_v6  ;;  %v4903_v59 = vsel %vm4900_vm15, %v4902_v14, %v4898_v38  ;;  %v6831_v9 = vadd.f32 %v6480_v15, %v12657_v40  ;;  %v6597_v39 = vrot.slane %v6584_v0, 4  ;;  %v12661_v15 = vld [vmem:[#allocation42_spill] sm:$0xff] }
 0x987   : > { %v7054_v35 = vmul.f32 %v11609_v60, %v7021_v44  ;;  %7014 = vperm.xlu0 %7570, %v4903_v59   ;;  %v6484_v24 = vsel %vm1051_vm2, %v11289_v63, %v6483_v13  ;;  %v7774_v63 = vld [vmem:[%s7865_s29 + $0x30] sm:$0xff]  ;;  %v6834_v14 = vadd.f32 %v6594_v7, %v12660_v5  ;;  %v6485_v3 = vrot.slane %v11842_v20, 4  ;;  %v7777_v20 = vld [vmem:[%s7865_s29 + $0x48] sm:$0xff]  ;;  %v7781_v5 = vld [vmem:[%s7865_s29 + $0x78] sm:$0xff] }
 0x988   : > { %7121 = vst.msk [vmem:[%s11628_s11 + $0x38] sm:$0xff] %vm247_vm0, %v7089_v23  ;;  %v6835_v12 = vadd.f32 %v6484_v24, %v12659_v55  ;;  %v6598_v59 = vsel %vm1051_vm2, %v6597_v39, %v6560_v11  ;;  %v12664_v24 = vld [vmem:[#allocation40_spill] sm:$0xff]  ;;  %v12666_v39 = vld [vmem:[#allocation54_spill] sm:$0xff] }
 0x989   : > { %v7086_v45 = vadd.f32 %v7772_v33, %v7054_v35  ;;  %v6930_v46 = vpop.permute.xlu2 %6929  ;;  %v6838_v33 = vadd.f32 %v6598_v59, %v12661_v15  ;;  %v6845_v49 = vadd.f32 %v12664_v24, %v12663_v19  ;;  %v6751_v59 = vrot.slane %v11802_v25, 4  ;;  %v12670_v15 = vld [vmem:[#allocation39_spill] sm:$0xff]  ;;  %v12672_v24 = vld [vmem:[#allocation74_spill] sm:$0xff] }
 0x98a   : > { %v7031_v62 = vmul.f32 %v6930_v46, %v6839_v61 }
 0x98b   : > { %7118 = vst.msk [vmem:[%s11628_s11 + $0x20] sm:$0xff] %vm247_vm0, %v7086_v45  ;;  %v6486_v45 = vsel %vm1051_vm2, %v6485_v3, %v11836_v29  ;;  %v6599_v29 = vrot.slane %v6560_v11, 4 }
 0x98c   : > { %v7064_v42 = vmul.f32 %v11609_v60, %v7031_v62  ;;  %v6890_v21 = vpop.permute.xlu1 %6889  ;;  %v12662_v62 = vld [vmem:[#allocation33_spill] sm:$0xff] }
 0x98d   : > { %v7023_v26 = vmul.f32 %v6890_v21, %v6831_v9  ;;  %v6837_v40 = vadd.f32 %v6486_v45, %v12662_v62  ;;  %v7778_v21 = vld [vmem:[%s7865_s29 + $0x68] sm:$0xff] }
 0x98e   : > { %v7096_v36 = vadd.f32 %v7773_v48, %v7064_v42  ;;  %v6600_v48 = vsel %vm1051_vm2, %v6584_v0, %v6599_v29  ;;  %v6787_v0 = vrot.slane %v11845_v54, 4 }
 0x98f   : > { %v7056_v4 = vmul.f32 %v11609_v60, %v7023_v26 }
 0x990   : > { %7128 = vst.msk [vmem:[%s11628_s11 + $0x70] sm:$0xff] %vm247_vm0, %v7096_v36  ;;  %v7779_v36 = vld [vmem:[%s7865_s29 + $0x60] sm:$0xff] }
 0x991   : > { %v7088_v28 = vadd.f32 %v7774_v63, %v7056_v4  ;;  %v6945_v47 = vpop.permute.xlu2 %6944  ;;  %v6910_v53 = vpop.permute.xlu0 %6909 }
 0x992   : > { %v7034_v6 = vmul.f32 %v6945_v47, %v6842_v32  ;;  %v7027_v16 = vmul.f32 %v6910_v53, %v6835_v12  ;;  %v12665_v32 = vld [vmem:[#allocation43_spill] sm:$0xff] }
 0x993   : > { %7120 = vst.msk [vmem:[%s11628_s11 + $0x30] sm:$0xff] %vm247_vm0, %v7088_v28  ;;  %v6840_v55 = vadd.f32 %v6600_v48, %v12665_v32  ;;  %v7780_v28 = vld [vmem:[%s7865_s29 + $0xa0] sm:$0xff] }
 0x994   : > { %v7067_v37 = vmul.f32 %v11609_v60, %v7034_v6  ;;  %v7060_v44 = vmul.f32 %v11609_v60, %v7027_v16  ;;  %v6905_v38 = vpop.permute.xlu1 %6904  ;;  %v12667_v6 = vld [vmem:[#allocation69_spill] sm:$0xff] }
 0x995   : > { %v7026_v23 = vmul.f32 %v6905_v38, %v6834_v14  ;;  %v6841_v16 = vadd.f32 %v12667_v6, %v12666_v39  ;;  %v6811_v38 = vrot.slane %v11881_v41, 4  ;;  %v12668_v41 = vld [vmem:[#allocation79_spill] sm:$0xff]  ;;  %v12674_v39 = vld [vmem:[#allocation89_spill] sm:$0xff] }
 0x996   : > { %v7099_v35 = vadd.f32 %v7775_v50, %v7067_v37  ;;  %v7092_v27 = vadd.f32 %v7776_v43, %v7060_v44  ;;  %v6788_v44 = vsel %vm1051_vm2, %v11819_v56, %v6787_v0  ;;  %v7782_v50 = vld [vmem:[%s7865_s29 + $0x80] sm:$0xff]  ;;  %v6772_v43 = vperm.slane %v10998_v34, %v12524_v30 }
 0x997   : > { %v7059_v61 = vmul.f32 %v11609_v60, %v7026_v23  ;;  %v6812_v54 = vsel %vm1051_vm2, %v11863_v31, %v6811_v38  ;;  %v6796_v23 = vperm.slane %v6788_v44, %v12524_v30  ;;  %v6752_v56 = vsel %vm1051_vm2, %v11775_v17, %v6751_v59  ;;  %v12673_v0 = vld [vmem:[#allocation83_spill] sm:$0xff] }
 0x998   : > { %7131 = vst.msk [vmem:[%s11628_s11 + $0x88] sm:$0xff] %vm247_vm0, %v7099_v35  ;;  %v6844_v31 = vadd.f32 %v6812_v54, %v12670_v15  ;;  %v6760_v34 = vperm.slane %v6752_v56, %v12515_v18  ;;  %v6739_v17 = vrot.slane %v11827_v2, 4  ;;  %v12671_v2 = vld [vmem:[#allocation37_spill] sm:$0xff]  ;;  %v6849_v6 = vadd.f32 %v12674_v39, %v12673_v0  ;;  %v12677_v15 = vld [vmem:[#allocation86_spill] sm:$0xff]  ;;  %v12685_v0 = vld [vmem:[#allocation44_spill] sm:$0xff] }
 0x999   : > { %7124 = vst.msk [vmem:[%s11628_s11 + $0x50] sm:$0xff] %vm247_vm0, %v7092_v27  ;;  %v7091_v46 = vadd.f32 %v7777_v20, %v7059_v61  ;;  %v6925_v22 = vpop.permute.xlu0 %6924  ;;  %v12669_v27 = vld [vmem:[#allocation28_spill] sm:$0xff]  ;;  %v6813_v25 = vrot.slane %v6796_v23, 4 }
 0x99a   : > { %v7030_v52 = vmul.f32 %v6925_v22, %v6838_v33  ;;  %v6843_v61 = vadd.f32 %v12669_v27, %v12668_v41  ;;  %v6815_v22 = vrot.slane %v6772_v43, 4  ;;  %v7788_v41 = vld [vmem:[%s7865_s29 + $0xb0] sm:$0xff] }
 0x99b   : > { %7123 = vst.msk [vmem:[%s11628_s11 + $0x48] sm:$0xff] %vm247_vm0, %v7091_v46 }
 0x99c   : > { %v7063_v9 = vmul.f32 %v11609_v60, %v7030_v52  ;;  %v6920_v13 = vpop.permute.xlu1 %6919 }
 0x99d   : > { %v7029_v42 = vmul.f32 %v6920_v13, %v6837_v40  ;;  %v6816_v40 = vsel %vm1051_vm2, %v6796_v23, %v6815_v22  ;;  %v6740_v13 = vsel %vm1051_vm2, %v11804_v57, %v6739_v17 }
 0x99e   : > { %v7095_v10 = vadd.f32 %v7778_v21, %v7063_v9  ;;  %v6814_v9 = vsel %vm1051_vm2, %v6813_v25, %v6772_v43  ;;  %v6848_v19 = vadd.f32 %v6816_v40, %v12671_v2  ;;  %v6748_v48 = vperm.slane %v6740_v13, %v12515_v18  ;;  %v7787_v43 = vld [vmem:[%s7865_s29 + $0xc0] sm:$0xff] }
 0x99f   : > { %v7062_v26 = vmul.f32 %v11609_v60, %v7029_v42  ;;  %v7783_v42 = vld [vmem:[%s7865_s29 + $0x90] sm:$0xff]  ;;  %v6784_v13 = vperm.slane %v10991_v58, %v12524_v30  ;;  %v12682_v58 = vld [vmem:[#allocation63_spill] sm:$0xff] }
 0x9a0   : > { %7127 = vst.msk [vmem:[%s11628_s11 + $0x68] sm:$0xff] %vm247_vm0, %v7095_v10  ;;  %v7784_v10 = vld [vmem:[%s7865_s29 + $0x98] sm:$0xff] }
 0x9a1   : > { %v7094_v4 = vadd.f32 %v7779_v36, %v7062_v26  ;;  %v6960_v51 = vpop.permute.xlu2 %6959  ;;  %v6797_v26 = vrot.slane %v6760_v34, 4 }
 0x9a2   : > { %v7037_v8 = vmul.f32 %v6960_v51, %v6845_v49  ;;  %v6846_v49 = vadd.f32 %v6814_v9, %v12672_v24 }
 0x9a3   : > { %7126 = vst.msk [vmem:[%s11628_s11 + $0x60] sm:$0xff] %vm247_vm0, %v7094_v4 }
 0x9a4   : > { %v7070_v12 = vmul.f32 %v11609_v60, %v7037_v8  ;;  %v6935_v7 = vpop.permute.xlu1 %6934  ;;  %v6798_v8 = vsel %vm1051_vm2, %v6797_v26, %v6748_v48  ;;  %v7789_v26 = vld [vmem:[%s7865_s29 + $0xd0] sm:$0xff] }
 0x9a5   : > { %v7032_v63 = vmul.f32 %v6935_v7, %v6840_v55  ;;  %v6804_v18 = vperm.slane %v6798_v8, %v12524_v30 }
 0x9a6   : > { %v7102_v47 = vadd.f32 %v7780_v28, %v7070_v12  ;;  %v7785_v12 = vld [vmem:[%s7865_s29 + $0xb8] sm:$0xff] }
 0x9a7   : > { %v7065_v53 = vmul.f32 %v11609_v60, %v7032_v63  ;;  %v7786_v63 = vld [vmem:[%s7865_s29 + $0xa8] sm:$0xff] }
 0x9a8   : > { %7134 = vst.msk [vmem:[%s11628_s11 + $0xa0] sm:$0xff] %vm247_vm0, %v7102_v47  ;;  %v6780_v47 = vperm.slane %v10995_v1, %v12524_v30 }
 0x9a9   : > { %v7097_v14 = vadd.f32 %v7781_v5, %v7065_v53  ;;  %v6940_v11 = vpop.permute.xlu0 %6939  ;;  %v6799_v53 = vrot.slane %v6748_v48, 4  ;;  %v12676_v5 = vld [vmem:[#allocation64_spill] sm:$0xff] }
 0x9aa   : > { %v7033_v37 = vmul.f32 %v6940_v11, %v6841_v16  ;;  %v12675_v16 = vld [vmem:[#allocation32_spill] sm:$0xff]  ;;  %v6819_v54 = vrot.slane %v6780_v47, 4 }
 0x9ab   : > { %7129 = vst.msk [vmem:[%s11628_s11 + $0x78] sm:$0xff] %vm247_vm0, %v7097_v14  ;;  %v6847_v14 = vadd.f32 %v12676_v5, %v12675_v16  ;;  %v6800_v44 = vsel %vm1051_vm2, %v6760_v34, %v6799_v53  ;;  %v12680_v34 = vld [vmem:[#allocation72_spill] sm:$0xff]  ;;  %v12684_v53 = vld [vmem:[#allocation77_spill] sm:$0xff] }
 0x9ac   : > { %v7066_v3 = vmul.f32 %v11609_v60, %v7033_v37  ;;  %v6853_v39 = vadd.f32 %v12685_v0, %v12684_v53 }
 0x9ae   : > { %v7098_v35 = vadd.f32 %v7782_v50, %v7066_v3  ;;  %v6817_v3 = vrot.slane %v6804_v18, 4  ;;  %v6808_v50 = vperm.slane %v6800_v44, %v12524_v30  ;;  %v12681_v30 = vld [vmem:[#allocation73_spill] sm:$0xff] }
 0x9b0   : > { %7130 = vst.msk [vmem:[%s11628_s11 + $0x80] sm:$0xff] %vm247_vm0, %v7098_v35  ;;  %v6820_v35 = vsel %vm1051_vm2, %v6804_v18, %v6819_v54  ;;  %v6821_v17 = vrot.slane %v6808_v50, 4  ;;  %v7793_v18 = vld [vmem:[%s7865_s29 + $0xe8] sm:$0xff] }
 0x9b1   : > { %v6950_v33 = vpop.permute.xlu1 %6949  ;;  %v6955_v45 = vpop.permute.xlu0 %6954 }
 0x9b2   : > { %v7035_v20 = vmul.f32 %v6950_v33, %v6843_v61  ;;  %v7036_v46 = vmul.f32 %v6955_v45, %v6844_v31  ;;  %v6818_v61 = vsel %vm1051_vm2, %v6817_v3, %v6780_v47  ;;  %v12678_v31 = vld [vmem:[#allocation87_spill] sm:$0xff]  ;;  %v12679_v45 = vld [vmem:[#allocation36_spill] sm:$0xff] }
 0x9b3   : > { %v6851_v33 = vadd.f32 %v12678_v31, %v12677_v15  ;;  %v6852_v25 = vadd.f32 %v6820_v35, %v12679_v45  ;;  %v6850_v22 = vadd.f32 %v6818_v61, %v12680_v34 }
 0x9b4   : > { %v7068_v52 = vmul.f32 %v11609_v60, %v7035_v20  ;;  %v7069_v62 = vmul.f32 %v11609_v60, %v7036_v46 }
 0x9b6   : > { %v7100_v21 = vadd.f32 %v7783_v42, %v7068_v52  ;;  %v7101_v29 = vadd.f32 %v7784_v10, %v7069_v62 }
 0x9b8   : > { %7132 = vst.msk [vmem:[%s11628_s11 + $0x90] sm:$0xff] %vm247_vm0, %v7100_v21 }
 0x9b9   : > { %7133 = vst.msk [vmem:[%s11628_s11 + $0x98] sm:$0xff] %vm247_vm0, %v7101_v29  ;;  %v6975_v36 = vpop.permute.xlu2 %6974  ;;  %v6965_v57 = vpop.permute.xlu1 %6964  ;;  %v6822_v29 = vsel %vm1051_vm2, %v6821_v17, %v6784_v13 }
 0x9ba   : > { %v7040_v4 = vmul.f32 %v6975_v36, %v6848_v19  ;;  %v7038_v51 = vmul.f32 %v6965_v57, %v6846_v49  ;;  %v7790_v19 = vld [vmem:[%s7865_s29 + $0xd8] sm:$0xff]  ;;  %v7791_v49 = vld [vmem:[%s7865_s29 + $0xc8] sm:$0xff]  ;;  %v6855_v36 = vadd.f32 %v12682_v58, %v12681_v30  ;;  %v12683_v57 = vld [vmem:[#allocation41_spill] sm:$0xff] }
 0x9bc   : > { %v7073_v32 = vmul.f32 %v11609_v60, %v7040_v4  ;;  %v7071_v55 = vmul.f32 %v11609_v60, %v7038_v51  ;;  %v6854_v4 = vadd.f32 %v6822_v29, %v12683_v57 }
 0x9be   : > { %v7105_v7 = vadd.f32 %v7785_v12, %v7073_v32  ;;  %v7103_v28 = vadd.f32 %v7786_v63, %v7071_v55  ;;  %v7792_v63 = vld [vmem:[%s7865_s29 + $0xf0] sm:$0xff] }
 0x9c0   : > { %7137 = vst.msk [vmem:[%s11628_s11 + $0xb8] sm:$0xff] %vm247_vm0, %v7105_v7 }
 0x9c1   : > { %7135 = vst.msk [vmem:[%s11628_s11 + $0xa8] sm:$0xff] %vm247_vm0, %v7103_v28  ;;  %v6980_v11 = vpop.permute.xlu1 %6979  ;;  %v6970_v37 = vpop.permute.xlu0 %6969 }
 0x9c2   : > { %v7041_v38 = vmul.f32 %v6980_v11, %v6849_v6  ;;  %v7039_v1 = vmul.f32 %v6970_v37, %v6847_v14  ;;  %v7794_v14 = vld [vmem:[%s7865_s29 + $0xe0] sm:$0xff]  ;;  %v6823_v37 = vrot.slane %v6784_v13, 4 }
 0x9c4   : > { %v7074_v23 = vmul.f32 %v11609_v60, %v7041_v38  ;;  %v7072_v59 = vmul.f32 %v11609_v60, %v7039_v1  ;;  %v6824_v44 = vsel %vm1051_vm2, %v6808_v50, %v6823_v37  ;;  %v12686_v38 = vld [vmem:[#allocation70_spill] sm:$0xff] }
 0x9c5   : > { %v6856_v1 = vadd.f32 %v6824_v44, %v12686_v38 }
 0x9c6   : > { %v7106_v56 = vadd.f32 %v7787_v43, %v7074_v23  ;;  %v7104_v27 = vadd.f32 %v7788_v41, %v7072_v59  ;;  %v7795_v59 = vld [vmem:[%s7865_s29 + $0xf8] sm:$0xff] }
 0x9c8   : > { %7138 = vst.msk [vmem:[%s11628_s11 + $0xc0] sm:$0xff] %vm247_vm0, %v7106_v56 }
 0x9c9   : > { %7136 = vst.msk [vmem:[%s11628_s11 + $0xb0] sm:$0xff] %vm247_vm0, %v7104_v27  ;;  %v6990_v20 = vpop.permute.xlu2 %6989  ;;  %v6995_v46 = vpop.permute.xlu1 %6994 }
 0x9ca   : > { %v7043_v52 = vmul.f32 %v6990_v20, %v6851_v33  ;;  %v7044_v62 = vmul.f32 %v6995_v46, %v6852_v25  ;;  %v6985_v40 = vpop.permute.xlu0 %6984 }
 0x9cb   : > { %v7042_v9 = vmul.f32 %v6985_v40, %v6850_v22 }
 0x9cc   : > { %v7076_v42 = vmul.f32 %v11609_v60, %v7043_v52  ;;  %v7077_v21 = vmul.f32 %v11609_v60, %v7044_v62 }
 0x9cd   : > { %v7075_v10 = vmul.f32 %v11609_v60, %v7042_v9 }
 0x9ce   : > { %v7108_v2 = vadd.f32 %v7789_v26, %v7076_v42  ;;  %v7109_v24 = vadd.f32 %v7790_v19, %v7077_v21 }
 0x9cf   : > { %v7107_v48 = vadd.f32 %v7791_v49, %v7075_v10 }
 0x9d0   : > { %7140 = vst.msk [vmem:[%s11628_s11 + $0xd0] sm:$0xff] %vm247_vm0, %v7108_v2 }
 0x9d1   : > { %7141 = vst.msk [vmem:[%s11628_s11 + $0xd8] sm:$0xff] %vm247_vm0, %v7109_v24  ;;  %v7010_v51 = vpop.permute.xlu1 %7009  ;;  %v7005_v8 = vpop.permute.xlu2 %7004 }
 0x9d2   : > { %7139 = vst.msk [vmem:[%s11628_s11 + $0xc8] sm:$0xff] %vm247_vm0, %v7107_v48  ;;  %v7047_v32 = vmul.f32 %v7010_v51, %v6855_v36  ;;  %v7046_v55 = vmul.f32 %v7005_v8, %v6854_v4 }
 0x9d4   : > { %v7080_v12 = vmul.f32 %v11609_v60, %v7047_v32  ;;  %v7079_v7 = vmul.f32 %v11609_v60, %v7046_v55 }
 0x9d6   : > { %v7112_v28 = vadd.f32 %v7792_v63, %v7080_v12  ;;  %v7111_v47 = vadd.f32 %v7793_v18, %v7079_v7 }
 0x9d8   : > { %7144 = vst.msk [vmem:[%s11628_s11 + $0xf0] sm:$0xff] %vm247_vm0, %v7112_v28 }
 0x9d9   : > { %7143 = vst.msk [vmem:[%s11628_s11 + $0xe8] sm:$0xff] %vm247_vm0, %v7111_v47 }
 0x9e9   : > { %v7000_v6 = vpop.permute.xlu0 %6999 }
 0x9ea   : > { %v7045_v16 = vmul.f32 %v7000_v6, %v6853_v39 }
 0x9ec   : > { %v7078_v5 = vmul.f32 %v11609_v60, %v7045_v16 }
 0x9ee   : > { %v7110_v11 = vadd.f32 %v7794_v14, %v7078_v5 }
 0x9f0   : > { %7142 = vst.msk [vmem:[%s11628_s11 + $0xe0] sm:$0xff] %vm247_vm0, %v7110_v11 }
 0x9f9   : > { %v7015_v3 = vpop.permute.xlu0 %7014 }
 0x9fa   : > { %v7048_v54 = vmul.f32 %v7015_v3, %v6856_v1 }
 0x9fc   : > { %v7081_v23 = vmul.f32 %v11609_v60, %v7048_v54 }
 0x9fe   : > { %v7113_v35 = vadd.f32 %v7795_v59, %v7081_v23 }
 0xa00   : > { %7145 = vst.msk [vmem:[%s11628_s11 + $0xf8] sm:$0xff] %vm247_vm0, %v7113_v35 }
 0xa01 PF: > { %s15_s17 = sadd.s32 1, %s7802_s17  }
 0xa02   : > { %p12_p4 = scmp.ge.s32.totalorder %s15_s17, 4  }
 0xa04   :  { %14 = sbr.rel (!%p12_p4) target bundleno = 2 (0x2), region = 66 }

</bundles_post_ra>
